<compile_context>
chip_gen: v7x
topology: tpu7x:2x2x1
jax: 0.10.0
libtpu: 0.0.40
codegen_flags: <defaults>
</compile_context>

<pallas_src>
import functools

import jax
import jax.numpy as jnp
from jax import lax
from jax.experimental import pallas as pl
from jax.experimental.pallas import tpu as pltpu

LEAKY_SLOPE = 0.01   # nn.LeakyReLU() default
BN_EPS = 1e-5        # nn.BatchNorm2d default
LANE = 128


def _round_up(x, m):
    return (x + m - 1) // m * m


def _kw_offsets(dils):
    """Sorted unique width offsets used by any 3x3 tap (plus the centre)."""
    return tuple(sorted({0} | {d for d in dils} | {-d for d in dils}))


def _choose_tile_h(h, w, kpack, dmax, coutp, rows_target=2048,
                   vmem_budget=24 * 2**20):
    """Largest divisor of `h` whose per-step footprint fits the VMEM budget
    and whose row count does not grossly overshoot `rows_target`."""
    best = 1
    for t in range(1, h + 1):
        if h % t:
            continue
        rows = t * w
        win = 2 * (t + 2 * dmax) * w * kpack * 2          # window double buffer
        outblk = 2 * t * w * coutp * 2                    # bf16 output double buffer
        inter = rows * (4 * 256) * 4 * 2 + rows * coutp * 4   # f32 activations
        if win + outblk + inter > vmem_budget:
            break
        if rows <= max(rows_target, w):
            best = t
    return best


# ----------------------------------------------------------------------------
# Host-side kw packing: bake the width taps of the dilated 3x3 convs into the
# channel (contraction) dim so the kernel only needs row (height) offsets.
# ----------------------------------------------------------------------------
def _pack_kw(x_nhwc, offsets, kpack):
    n, h, w, cin = x_nhwc.shape
    groups = []
    for off in offsets:
        if off >= w or -off >= w:
            s = jnp.zeros_like(x_nhwc)
        elif off >= 0:
            s = jnp.pad(x_nhwc[:, :, off:, :],
                        ((0, 0), (0, 0), (0, off), (0, 0)))
        else:
            s = jnp.pad(x_nhwc[:, :, :w + off, :],
                        ((0, 0), (0, 0), (-off, 0), (0, 0)))
        groups.append(s)
    xk = jnp.concatenate(groups, axis=-1)            # (N, H, W, 7*Cin)
    pad = kpack - xk.shape[-1]
    if pad:
        xk = jnp.pad(xk, ((0, 0), (0, 0), (0, 0), (0, pad)))
    return xk


# ----------------------------------------------------------------------------
# Fused ASPP kernel: aspp1..aspp4 + BN + LeakyReLU + concat + final 1x1 conv
# + BN + GAP-branch bias + ReLU, one (batch, row-tile) block per grid step.
# ----------------------------------------------------------------------------
def _aspp_fused_kernel(xk_hbm, wc_ref, ws_ref, wf_ref, bbr_ref, bfin_ref,
                       o_ref, xwin, sem, *, tile_h, width, kpack, coutp,
                       dmax, dils):
    """
    xk_hbm  : (N, Hp, W, KPACK) bf16 HBM ref; Hp = H + 2*dmax, KPACK lanes
              hold the width-shifted copies of the Cin input channels.
    wc_ref  : (KPACK, 1024) bf16   centre-row weights of aspp1..aspp4
    ws_ref  : (3, 2, KPACK, 256) bf16  (-d, +d) row weights of aspp2..aspp4
    wf_ref  : (1024, Coutp) bf16   final 1x1 conv (BN scale folded)
    bbr_ref : (4, 256) f32         per-branch BN biases
    bfin_ref: (1, 1, Coutp) f32    final BN bias + per-batch GAP term
    o_ref   : (1, tile_h, W, Coutp) bf16
    xwin    : VMEM (2, tile_h + 2*dmax, W, KPACK) double buffer
    sem     : DMA semaphores (2,)
    """
    b = pl.program_id(0)
    t = pl.program_id(1)
    num_t = pl.num_programs(1)
    rows = tile_h * width
    win_h = tile_h + 2 * dmax
    slot = t % 2

    def window_copy(tt, sl):
        row0 = pl.multiple_of(tt * tile_h, tile_h)
        return pltpu.make_async_copy(xk_hbm.at[b, pl.ds(row0, win_h)],
                                     xwin.at[sl], sem.at[sl])

    # Prime the double buffer at the start of every batch strip (per-batch
    # priming keeps the batch axis safe to shard across TensorCores).
    @pl.when(t == 0)
    def _():
        window_copy(t, slot).start()

    # Wait on this tile's window -- identical descriptor to the matching start.
    window_copy(t, slot).wait()

    # Prefetch the next row-tile of the *same* batch; overlaps compute.
    @pl.when(t + 1 < num_t)
    def _():
        window_copy(t + 1, 1 - slot).start()

    win = xwin.at[slot]

    def row_slab(row_off):
        # (rows, KPACK) view of the window shifted by `row_off` output rows.
        v = win[pl.ds(dmax + row_off, tile_h)]
        return v.reshape(rows, kpack)

    def leaky(v):
        return jnp.where(v > 0, v, LEAKY_SLOPE * v)

    # Centre row of all four branches (aspp1's 1x1 plus the middle-row taps
    # of the three dilated 3x3s) as a single matmul.
    zc = jnp.dot(row_slab(0), wc_ref[...], preferred_element_type=jnp.float32)

    parts = [leaky(zc[:, 0:256] + bbr_ref[0:1, :]).astype(jnp.bfloat16)]
    for k, d in enumerate(dils):
        lo = 256 * (k + 1)
        zk = (zc[:, lo:lo + 256]
              + jnp.dot(row_slab(-d), ws_ref[k, 0],
                        preferred_element_type=jnp.float32)
              + jnp.dot(row_slab(d), ws_ref[k, 1],
                        preferred_element_type=jnp.float32)
              + bbr_ref[k + 1:k + 2, :])
        parts.append(leaky(zk).astype(jnp.bfloat16))

    # Concatenated branch activations -> single final 1x1 conv, then final BN
    # bias + per-batch GAP-branch term + ReLU, stored once in bf16.
    ycat = jnp.concatenate(parts, axis=-1)                       # (rows, 1024)
    out = jnp.dot(ycat, wf_ref[...], preferred_element_type=jnp.float32)
    out = jnp.maximum(out + bfin_ref[0], 0.0)
    o_ref[...] = out.reshape(1, tile_h, width, coutp).astype(o_ref.dtype)


def aspp_fused(xk, wc, ws, wf, br_bias, fin_bias, *, h, width, tile_h, dmax,
               dils, kpack):
    n = xk.shape[0]
    coutp = wf.shape[-1]
    win_h = tile_h + 2 * dmax
    rows = tile_h * width

    est = (2 * win_h * width * kpack * 2          # window double buffer
           + 2 * tile_h * width * coutp * 2       # output double buffer
           + rows * (4 * 256) * 4 * 2             # f32 branch activations
           + rows * coutp * 4
           + 2 * (wc.size + ws.size + wf.size) * 2)
    vmem_limit = int(min(48 * 2**20, max(32 * 2**20, 2 * est)))

    kern = functools.partial(_aspp_fused_kernel, tile_h=tile_h, width=width,
                             kpack=kpack, coutp=coutp, dmax=dmax, dils=dils)
    return pl.pallas_call(
        kern,
        out_shape=jax.ShapeDtypeStruct((n, h, width, coutp), jnp.bfloat16),
        grid=(n, h // tile_h),
        in_specs=[
            pl.BlockSpec(memory_space=pl.ANY),                       # x (HBM)
            pl.BlockSpec(wc.shape, lambda b, t: (0, 0)),             # centre-row W
            pl.BlockSpec(ws.shape, lambda b, t: (0, 0, 0, 0)),       # side-row W
            pl.BlockSpec(wf.shape, lambda b, t: (0, 0)),             # final 1x1 W
            pl.BlockSpec(br_bias.shape, lambda b, t: (0, 0)),        # branch biases
            pl.BlockSpec((1, 1, coutp), lambda b, t: (b, 0, 0)),     # per-batch bias
        ],
        out_specs=pl.BlockSpec((1, tile_h, width, coutp),
                               lambda b, t: (b, t, 0, 0)),
        scratch_shapes=[
            pltpu.VMEM((2, win_h, width, kpack), jnp.bfloat16),
            pltpu.SemaphoreType.DMA((2,)),
        ],
        compiler_params=pltpu.CompilerParams(
            # Batch axis is independent (per-batch priming, no cross-batch
            # prefetch) -> megacore-parallel on v7x; the row-tile axis carries
            # the manual prefetch state and stays sequential.
            dimension_semantics=("parallel", "arbitrary"),
            vmem_limit_bytes=vmem_limit),
    )(xk, wc, ws, wf, br_bias, fin_bias)


# ----------------------------------------------------------------------------
# Parameters (mirrors ASPP.__init__ / _init_weight).
# ----------------------------------------------------------------------------
def _kaiming_normal(key, shape, fan_in):
    std = (2.0 / fan_in) ** 0.5
    return std * jax.random.normal(key, shape, dtype=jnp.float32)


def _bn_fold(c):
    """Folded (scale, bias) for BatchNorm with gamma=1, beta=0, mean=0, var=1."""
    gamma = jnp.ones((c,), jnp.float32)
    beta = jnp.zeros((c,), jnp.float32)
    mean = jnp.zeros((c,), jnp.float32)
    var = jnp.ones((c,), jnp.float32)
    scale = gamma * lax.rsqrt(var + BN_EPS)
    bias = beta - mean * scale
    return scale, bias


def make_aspp_params(key, inplanes, out_dim):
    k = jax.random.split(key, 6)
    p = {}
    p["w1"] = _kaiming_normal(k[0], (inplanes, 256), inplanes)
    p["w2"] = _kaiming_normal(k[1], (3, 3, inplanes, 256), inplanes * 9)
    p["w3"] = _kaiming_normal(k[2], (3, 3, inplanes, 256), inplanes * 9)
    p["w4"] = _kaiming_normal(k[3], (3, 3, inplanes, 256), inplanes * 9)
    p["wg"] = _kaiming_normal(k[4], (inplanes, 256), inplanes)
    p["wf"] = _kaiming_normal(k[5], (5 * 256, out_dim), 5 * 256)
    for name in ("bn1", "bn2", "bn3", "bn4", "bng"):
        p[name] = _bn_fold(256)
    p["bnf"] = _bn_fold(out_dim)
    return p


def prepare_params(p, inplanes, out_dim, dilations, compute_dtype=jnp.bfloat16):
    """Fold BN scales into the conv weights and re-lay the branch weights onto
    the kw-packed contraction dim (KPACK = |unique kw offsets| * Cin, padded
    to a multiple of 8)."""
    dils = tuple(int(d) for d in dilations[1:])
    offs = _kw_offsets(dils)
    off_idx = {o: i for i, o in enumerate(offs)}
    kpack = _round_up(len(offs) * inplanes, 8)
    coutp = _round_up(out_dim, LANE)

    s1, b1 = p["bn1"]; s2, b2 = p["bn2"]; s3, b3 = p["bn3"]; s4, b4 = p["bn4"]
    sg, bg = p["bng"]; sf, bf = p["bnf"]
    br_scales = (s2, s3, s4)
    br_w = (p["w2"], p["w3"], p["w4"])

    # Centre-row weights of all four branches: (KPACK, 4*256).
    wc = jnp.zeros((kpack, 4 * 256), jnp.float32)
    lo0 = off_idx[0] * inplanes
    wc = wc.at[lo0:lo0 + inplanes, 0:256].set(p["w1"] * s1[None, :])
    # Off-centre-row weights: (branch, kh side -/+, KPACK, 256).
    ws = jnp.zeros((3, 2, kpack, 256), jnp.float32)
    for bi, d in enumerate(dils):
        w = br_w[bi] * br_scales[bi][None, None, None, :]   # (3, 3, Cin, 256)
        col = 256 * (bi + 1)
        for kw in range(3):
            lo = off_idx[(kw - 1) * d] * inplanes
            wc = wc.at[lo:lo + inplanes, col:col + 256].set(w[1, kw])
            ws = ws.at[bi, 0, lo:lo + inplanes, :].set(w[0, kw])
            ws = ws.at[bi, 1, lo:lo + inplanes, :].set(w[2, kw])

    # Final 1x1 conv: fold BN scale, split the GAP slice off (it becomes part
    # of the per-batch bias) and lane-pad the output channels.
    wf = p["wf"] * sf[None, :]
    wf = jnp.pad(wf, ((0, 0), (0, coutp - out_dim)))

    return {
        "wc": wc.astype(compute_dtype),                    # (KPACK, 1024)
        "ws": ws.astype(compute_dtype),                    # (3, 2, KPACK, 256)
        "wf_main": wf[:4 * 256].astype(compute_dtype),     # (1024, Coutp)
        "wf_gap": wf[4 * 256:],                            # (256, Coutp) f32
        "br_bias": jnp.stack([b1, b2, b3, b4], axis=0),    # (4, 256) f32
        "bf": jnp.pad(bf, (0, coutp - out_dim)),           # (Coutp,) f32
        "wg": p["wg"] * sg[None, :],                       # (Cin, 256) f32
        "bg": bg,                                          # (256,) f32
    }


# ----------------------------------------------------------------------------
# ASPP forward.
# ----------------------------------------------------------------------------
def aspp_forward(x_nchw, prep, *, dilations, out_dim):
    n, cin, h, w = x_nchw.shape
    dils = tuple(int(d) for d in dilations[1:])
    dmax = max(dils)
    offs = _kw_offsets(dils)
    kpack = _round_up(len(offs) * cin, 8)
    coutp = prep["wf_main"].shape[-1]
    cdt = prep["wc"].dtype

    # Global-average-pool branch (plain jnp: per-batch Cin->256->Coutp chain
    # that collapses into a bias of the final 1x1 conv; the bilinear upsample
    # from 1x1 with align_corners=True is an exact broadcast).
    gap = jnp.mean(x_nchw, axis=(2, 3))                                # (N,Cin)
    x5 = jax.nn.relu(jnp.dot(gap, prep["wg"]) + prep["bg"][None, :])   # (N,256)
    fin_bias = prep["bf"][None, :] + jnp.dot(x5, prep["wf_gap"])       # (N,Coutp)
    fin_bias = fin_bias.reshape(n, 1, coutp).astype(jnp.float32)

    # kw-packed, height-padded input for the fused kernel.
    x = jnp.transpose(x_nchw, (0, 2, 3, 1)).astype(cdt)                # NHWC bf16
    xk = _pack_kw(x, offs, kpack)                                      # (N,H,W,K)
    xk = jnp.pad(xk, ((0, 0), (dmax, dmax), (0, 0), (0, 0)))           # pad H

    tile_h = _choose_tile_h(h, w, kpack, dmax, coutp)
    out = aspp_fused(xk, prep["wc"], prep["ws"], prep["wf_main"],
                     prep["br_bias"], fin_bias,
                     h=h, width=w, tile_h=tile_h, dmax=dmax, dils=dils,
                     kpack=kpack)
    out = out[:, :, :, :out_dim].astype(jnp.float32)   # drop lane padding
    return jnp.transpose(out, (0, 3, 1, 2))            # -> NCHW


if __name__ == "__main__":
    key = jax.random.PRNGKey(0)
    k_x, k_p = jax.random.split(key)

    N, INPLANES, H, W = 2, 4, 16, 16
    OUT_DIM = 32
    DILATIONS = (1, 2, 4, 8)

    x = jax.random.normal(k_x, (N, INPLANES, H, W), dtype=jnp.float32)
    params = make_aspp_params(k_p, INPLANES, OUT_DIM)
    prep = prepare_params(params, INPLANES, OUT_DIM, DILATIONS)

    fwd = jax.jit(functools.partial(aspp_forward, dilations=DILATIONS,
                                    out_dim=OUT_DIM))
    out = fwd(x, prep)
    jax.block_until_ready(out)

    assert out.shape == (N, OUT_DIM, H, W), out.shape
    assert bool(jnp.all(jnp.isfinite(out)))
    print("KERNEL_OK")
</pallas_src>

<mosaic_0001>
module attributes {stable_mosaic.version = 11 : i64} {
  func.func @_aspp_fused_kernel(%arg0: i32, %arg1: i32, %arg2: memref<2x32x16x32xbf16, #tpu.memory_space<any>>, %arg3: memref<32x1024xbf16, #tpu.memory_space<vmem>>, %arg4: memref<3x2x32x256xbf16, #tpu.memory_space<vmem>>, %arg5: memref<1024x128xbf16, #tpu.memory_space<vmem>>, %arg6: memref<4x256xf32, #tpu.memory_space<vmem>>, %arg7: memref<1x1x128xf32, #tpu.memory_space<vmem>>, %arg8: memref<1x16x16x128xbf16, #tpu.memory_space<vmem>>, %arg9: memref<2x32x16x32xbf16, #tpu.memory_space<vmem>>, %arg10: memref<2x!tpu.dma_semaphore, #tpu.memory_space<semaphore_mem>>) attributes {dimension_semantics = [#tpu.dimension_semantics<parallel>, #tpu.dimension_semantics<arbitrary>], iteration_bounds = array<i64: 2, 1>, scalar_prefetch = 0 : i64, scratch_operands = 2 : i64, tpu.core_type = #tpu.core_type<tc>, window_params = [{}, {pipeline_mode = #tpu.pipeline_mode<synchronous>, transform_indices = @transform_1, window_bounds = array<i64: 32, 1024>}, {pipeline_mode = #tpu.pipeline_mode<synchronous>, transform_indices = @transform_2, window_bounds = array<i64: 3, 2, 32, 256>}, {pipeline_mode = #tpu.pipeline_mode<synchronous>, transform_indices = @transform_3, window_bounds = array<i64: 1024, 128>}, {pipeline_mode = #tpu.pipeline_mode<synchronous>, transform_indices = @transform_4, window_bounds = array<i64: 4, 256>}, {transform_indices = @transform_5, window_bounds = array<i64: 1, 1, 128>}, {transform_indices = @transform_6, window_bounds = array<i64: 1, 16, 16, 128>}]} {
    %c2_i32 = arith.constant 2 : i32
    %c0_i32 = arith.constant 0 : i32
    %0 = arith.cmpi eq, %c2_i32, %c0_i32 : i32
    %c1_i32 = arith.constant 1 : i32
    %1 = arith.select %0, %c1_i32, %c2_i32 : i32
    %2 = arith.remsi %arg1, %1 : i32
    %c0_i32_0 = arith.constant 0 : i32
    %3 = arith.cmpi ne, %2, %c0_i32_0 : i32
    %c0_i32_1 = arith.constant 0 : i32
    %4 = arith.cmpi slt, %2, %c0_i32_1 : i32
    %c0_i32_2 = arith.constant 0 : i32
    %5 = arith.cmpi slt, %1, %c0_i32_2 : i32
    %6 = arith.xori %4, %5 : i1
    %7 = arith.andi %6, %3 : i1
    %8 = arith.addi %2, %1 : i32
    %9 = arith.select %7, %8, %2 : i32
    %c0_i32_3 = arith.constant 0 : i32
    %10 = arith.cmpi eq, %arg1, %c0_i32_3 : i32
    %11 = arith.extui %10 : i1 to i32
    %c0_i32_4 = arith.constant 0 : i32
    %12 = arith.cmpi ne, %11, %c0_i32_4 : i32
    scf.if %12 {
      %c16_i32_104 = arith.constant 16 : i32
      %131 = arith.muli %arg1, %c16_i32_104 : i32
      %132 = tpu.assume_multiple %131, 16 : i32
      %c0_i32_105 = arith.constant 0 : i32
      %c0_i32_106 = arith.constant 0 : i32
      %133 = tpu.memref_slice %arg2[%arg0, %132, %c0_i32_105, %c0_i32_106] : memref<2x32x16x32xbf16, #tpu.memory_space<any>> -> memref<1x32x16x32xbf16, #tpu.memory_space<any>>
      %134 = tpu.memref_squeeze %133 : memref<1x32x16x32xbf16, #tpu.memory_space<any>> -> memref<32x16x32xbf16, #tpu.memory_space<any>>
      %c0_i32_107 = arith.constant 0 : i32
      %c0_i32_108 = arith.constant 0 : i32
      %c0_i32_109 = arith.constant 0 : i32
      %135 = tpu.memref_slice %arg9[%9, %c0_i32_107, %c0_i32_108, %c0_i32_109] : memref<2x32x16x32xbf16, #tpu.memory_space<vmem>> -> memref<1x32x16x32xbf16, #tpu.memory_space<vmem>>
      %136 = tpu.memref_squeeze %135 : memref<1x32x16x32xbf16, #tpu.memory_space<vmem>> -> memref<32x16x32xbf16, #tpu.memory_space<vmem>>
      %137 = tpu.memref_slice %arg10[%9] : memref<2x!tpu.dma_semaphore, #tpu.memory_space<semaphore_mem>> -> memref<1x!tpu.dma_semaphore, #tpu.memory_space<semaphore_mem>>
      %138 = tpu.memref_squeeze %137 : memref<1x!tpu.dma_semaphore, #tpu.memory_space<semaphore_mem>> -> memref<!tpu.dma_semaphore, #tpu.memory_space<semaphore_mem>>
      tpu.enqueue_dma source(%134 : memref<32x16x32xbf16, #tpu.memory_space<any>>) target(%136 : memref<32x16x32xbf16, #tpu.memory_space<vmem>>) target_semaphore(%138 : memref<!tpu.dma_semaphore, #tpu.memory_space<semaphore_mem>>)
    } else {
    }
    %c16_i32 = arith.constant 16 : i32
    %13 = arith.muli %arg1, %c16_i32 : i32
    %14 = tpu.assume_multiple %13, 16 : i32
    %c0_i32_5 = arith.constant 0 : i32
    %c0_i32_6 = arith.constant 0 : i32
    %15 = tpu.memref_slice %arg2[%arg0, %14, %c0_i32_5, %c0_i32_6] : memref<2x32x16x32xbf16, #tpu.memory_space<any>> -> memref<1x32x16x32xbf16, #tpu.memory_space<any>>
    %16 = tpu.memref_squeeze %15 : memref<1x32x16x32xbf16, #tpu.memory_space<any>> -> memref<32x16x32xbf16, #tpu.memory_space<any>>
    %c0_i32_7 = arith.constant 0 : i32
    %c0_i32_8 = arith.constant 0 : i32
    %c0_i32_9 = arith.constant 0 : i32
    %17 = tpu.memref_slice %arg9[%9, %c0_i32_7, %c0_i32_8, %c0_i32_9] : memref<2x32x16x32xbf16, #tpu.memory_space<vmem>> -> memref<1x32x16x32xbf16, #tpu.memory_space<vmem>>
    %18 = tpu.memref_squeeze %17 : memref<1x32x16x32xbf16, #tpu.memory_space<vmem>> -> memref<32x16x32xbf16, #tpu.memory_space<vmem>>
    %19 = tpu.memref_slice %arg10[%9] : memref<2x!tpu.dma_semaphore, #tpu.memory_space<semaphore_mem>> -> memref<1x!tpu.dma_semaphore, #tpu.memory_space<semaphore_mem>>
    %20 = tpu.memref_squeeze %19 : memref<1x!tpu.dma_semaphore, #tpu.memory_space<semaphore_mem>> -> memref<!tpu.dma_semaphore, #tpu.memory_space<semaphore_mem>>
    tpu.wait_dma2 semaphore(%20 : memref<!tpu.dma_semaphore, #tpu.memory_space<semaphore_mem>>) src(%16 : memref<32x16x32xbf16, #tpu.memory_space<any>>) dst(%18 : memref<32x16x32xbf16, #tpu.memory_space<vmem>>)
    %c1_i32_10 = arith.constant 1 : i32
    %21 = arith.addi %arg1, %c1_i32_10 : i32
    %c1_i32_11 = arith.constant 1 : i32
    %22 = arith.cmpi slt, %21, %c1_i32_11 : i32
    %23 = arith.extui %22 : i1 to i32
    %c0_i32_12 = arith.constant 0 : i32
    %24 = arith.cmpi ne, %23, %c0_i32_12 : i32
    scf.if %24 {
      %c1_i32_104 = arith.constant 1 : i32
      %131 = arith.addi %arg1, %c1_i32_104 : i32
      %c1_i32_105 = arith.constant 1 : i32
      %132 = arith.subi %c1_i32_105, %9 : i32
      %c16_i32_106 = arith.constant 16 : i32
      %133 = arith.muli %131, %c16_i32_106 : i32
      %134 = tpu.assume_multiple %133, 16 : i32
      %c0_i32_107 = arith.constant 0 : i32
      %c0_i32_108 = arith.constant 0 : i32
      %135 = tpu.memref_slice %arg2[%arg0, %134, %c0_i32_107, %c0_i32_108] : memref<2x32x16x32xbf16, #tpu.memory_space<any>> -> memref<1x32x16x32xbf16, #tpu.memory_space<any>>
      %136 = tpu.memref_squeeze %135 : memref<1x32x16x32xbf16, #tpu.memory_space<any>> -> memref<32x16x32xbf16, #tpu.memory_space<any>>
      %c0_i32_109 = arith.constant 0 : i32
      %c0_i32_110 = arith.constant 0 : i32
      %c0_i32_111 = arith.constant 0 : i32
      %137 = tpu.memref_slice %arg9[%132, %c0_i32_109, %c0_i32_110, %c0_i32_111] : memref<2x32x16x32xbf16, #tpu.memory_space<vmem>> -> memref<1x32x16x32xbf16, #tpu.memory_space<vmem>>
      %138 = tpu.memref_squeeze %137 : memref<1x32x16x32xbf16, #tpu.memory_space<vmem>> -> memref<32x16x32xbf16, #tpu.memory_space<vmem>>
      %139 = tpu.memref_slice %arg10[%132] : memref<2x!tpu.dma_semaphore, #tpu.memory_space<semaphore_mem>> -> memref<1x!tpu.dma_semaphore, #tpu.memory_space<semaphore_mem>>
      %140 = tpu.memref_squeeze %139 : memref<1x!tpu.dma_semaphore, #tpu.memory_space<semaphore_mem>> -> memref<!tpu.dma_semaphore, #tpu.memory_space<semaphore_mem>>
      tpu.enqueue_dma source(%136 : memref<32x16x32xbf16, #tpu.memory_space<any>>) target(%138 : memref<32x16x32xbf16, #tpu.memory_space<vmem>>) target_semaphore(%140 : memref<!tpu.dma_semaphore, #tpu.memory_space<semaphore_mem>>)
    } else {
    }
    %c0_i32_13 = arith.constant 0 : i32
    %c0_i32_14 = arith.constant 0 : i32
    %c0_i32_15 = arith.constant 0 : i32
    %25 = tpu.memref_slice %arg9[%9, %c0_i32_13, %c0_i32_14, %c0_i32_15] : memref<2x32x16x32xbf16, #tpu.memory_space<vmem>> -> memref<1x32x16x32xbf16, #tpu.memory_space<vmem>>
    %26 = tpu.memref_squeeze %25 : memref<1x32x16x32xbf16, #tpu.memory_space<vmem>> -> memref<32x16x32xbf16, #tpu.memory_space<vmem>>
    %c8 = arith.constant 8 : index
    %c0 = arith.constant 0 : index
    %c0_16 = arith.constant 0 : index
    %27 = vector.load %26[%c8, %c0, %c0_16] : memref<32x16x32xbf16, #tpu.memory_space<vmem>>, vector<16x16x32xbf16>
    %28 = vector.shape_cast %27 : vector<16x16x32xbf16> to vector<256x32xbf16>
    %c0_17 = arith.constant 0 : index
    %c0_18 = arith.constant 0 : index
    %29 = vector.load %arg3[%c0_17, %c0_18] : memref<32x1024xbf16, #tpu.memory_space<vmem>>, vector<32x1024xbf16>
    %cst = arith.constant dense<0.000000e+00> : vector<256x1024xf32>
    %30 = tpu.matmul %28, %29, %cst {dimension_numbers = #tpu.dot_dimension_numbers<[1], [0], [0], [1], [0, 0, 1, 1], [], []>} : vector<256x32xbf16>, vector<32x1024xbf16>, vector<256x1024xf32> -> vector<256x1024xf32>
    %31 = vector.extract_strided_slice %30 {offsets = [0, 0], sizes = [256, 256], strides = [1, 1]} : vector<256x1024xf32> to vector<256x256xf32>
    %c0_19 = arith.constant 0 : index
    %c0_20 = arith.constant 0 : index
    %32 = vector.load %arg6[%c0_19, %c0_20] : memref<4x256xf32, #tpu.memory_space<vmem>>, vector<1x256xf32>
    %33 = vector.broadcast %32 : vector<1x256xf32> to vector<256x256xf32>
    %34 = arith.addf %31, %33 : vector<256x256xf32>
    %cst_21 = arith.constant 0.000000e+00 : f32
    %35 = vector.broadcast %cst_21 : f32 to vector<256x256xf32>
    %36 = arith.cmpf ogt, %34, %35 : vector<256x256xf32>
    %cst_22 = arith.constant 0.00999999977 : f32
    %37 = vector.broadcast %cst_22 : f32 to vector<256x256xf32>
    %38 = arith.mulf %37, %34 : vector<256x256xf32>
    %39 = arith.select %36, %34, %38 : vector<256x256xi1>, vector<256x256xf32>
    %40 = arith.truncf %39 : vector<256x256xf32> to vector<256x256xbf16>
    %41 = vector.extract_strided_slice %30 {offsets = [0, 256], sizes = [256, 256], strides = [1, 1]} : vector<256x1024xf32> to vector<256x256xf32>
    %c0_i32_23 = arith.constant 0 : i32
    %c0_i32_24 = arith.constant 0 : i32
    %c0_i32_25 = arith.constant 0 : i32
    %42 = tpu.memref_slice %arg9[%9, %c0_i32_23, %c0_i32_24, %c0_i32_25] : memref<2x32x16x32xbf16, #tpu.memory_space<vmem>> -> memref<1x32x16x32xbf16, #tpu.memory_space<vmem>>
    %43 = tpu.memref_squeeze %42 : memref<1x32x16x32xbf16, #tpu.memory_space<vmem>> -> memref<32x16x32xbf16, #tpu.memory_space<vmem>>
    %c6 = arith.constant 6 : index
    %c0_26 = arith.constant 0 : index
    %c0_27 = arith.constant 0 : index
    %44 = vector.load %43[%c6, %c0_26, %c0_27] : memref<32x16x32xbf16, #tpu.memory_space<vmem>>, vector<16x16x32xbf16>
    %45 = vector.shape_cast %44 : vector<16x16x32xbf16> to vector<256x32xbf16>
    %c0_28 = arith.constant 0 : index
    %c0_29 = arith.constant 0 : index
    %c0_30 = arith.constant 0 : index
    %c0_31 = arith.constant 0 : index
    %46 = vector.load %arg4[%c0_28, %c0_29, %c0_30, %c0_31] : memref<3x2x32x256xbf16, #tpu.memory_space<vmem>>, vector<1x1x32x256xbf16>
    %47 = vector.shape_cast %46 : vector<1x1x32x256xbf16> to vector<32x256xbf16>
    %cst_32 = arith.constant dense<0.000000e+00> : vector<256x256xf32>
    %48 = tpu.matmul %45, %47, %cst_32 {dimension_numbers = #tpu.dot_dimension_numbers<[1], [0], [0], [1], [0, 0, 1, 1], [], []>} : vector<256x32xbf16>, vector<32x256xbf16>, vector<256x256xf32> -> vector<256x256xf32>
    %49 = arith.addf %41, %48 : vector<256x256xf32>
    %c0_i32_33 = arith.constant 0 : i32
    %c0_i32_34 = arith.constant 0 : i32
    %c0_i32_35 = arith.constant 0 : i32
    %50 = tpu.memref_slice %arg9[%9, %c0_i32_33, %c0_i32_34, %c0_i32_35] : memref<2x32x16x32xbf16, #tpu.memory_space<vmem>> -> memref<1x32x16x32xbf16, #tpu.memory_space<vmem>>
    %51 = tpu.memref_squeeze %50 : memref<1x32x16x32xbf16, #tpu.memory_space<vmem>> -> memref<32x16x32xbf16, #tpu.memory_space<vmem>>
    %c10 = arith.constant 10 : index
    %c0_36 = arith.constant 0 : index
    %c0_37 = arith.constant 0 : index
    %52 = vector.load %51[%c10, %c0_36, %c0_37] : memref<32x16x32xbf16, #tpu.memory_space<vmem>>, vector<16x16x32xbf16>
    %53 = vector.shape_cast %52 : vector<16x16x32xbf16> to vector<256x32xbf16>
    %c0_38 = arith.constant 0 : index
    %c1 = arith.constant 1 : index
    %c0_39 = arith.constant 0 : index
    %c0_40 = arith.constant 0 : index
    %54 = vector.load %arg4[%c0_38, %c1, %c0_39, %c0_40] : memref<3x2x32x256xbf16, #tpu.memory_space<vmem>>, vector<1x1x32x256xbf16>
    %55 = vector.shape_cast %54 : vector<1x1x32x256xbf16> to vector<32x256xbf16>
    %cst_41 = arith.constant dense<0.000000e+00> : vector<256x256xf32>
    %56 = tpu.matmul %53, %55, %cst_41 {dimension_numbers = #tpu.dot_dimension_numbers<[1], [0], [0], [1], [0, 0, 1, 1], [], []>} : vector<256x32xbf16>, vector<32x256xbf16>, vector<256x256xf32> -> vector<256x256xf32>
    %57 = arith.addf %49, %56 : vector<256x256xf32>
    %c1_42 = arith.constant 1 : index
    %c0_43 = arith.constant 0 : index
    %58 = vector.load %arg6[%c1_42, %c0_43] : memref<4x256xf32, #tpu.memory_space<vmem>>, vector<1x256xf32>
    %59 = vector.broadcast %58 : vector<1x256xf32> to vector<256x256xf32>
    %60 = arith.addf %57, %59 : vector<256x256xf32>
    %cst_44 = arith.constant 0.000000e+00 : f32
    %61 = vector.broadcast %cst_44 : f32 to vector<256x256xf32>
    %62 = arith.cmpf ogt, %60, %61 : vector<256x256xf32>
    %cst_45 = arith.constant 0.00999999977 : f32
    %63 = vector.broadcast %cst_45 : f32 to vector<256x256xf32>
    %64 = arith.mulf %63, %60 : vector<256x256xf32>
    %65 = arith.select %62, %60, %64 : vector<256x256xi1>, vector<256x256xf32>
    %66 = arith.truncf %65 : vector<256x256xf32> to vector<256x256xbf16>
    %67 = vector.extract_strided_slice %30 {offsets = [0, 512], sizes = [256, 256], strides = [1, 1]} : vector<256x1024xf32> to vector<256x256xf32>
    %c0_i32_46 = arith.constant 0 : i32
    %c0_i32_47 = arith.constant 0 : i32
    %c0_i32_48 = arith.constant 0 : i32
    %68 = tpu.memref_slice %arg9[%9, %c0_i32_46, %c0_i32_47, %c0_i32_48] : memref<2x32x16x32xbf16, #tpu.memory_space<vmem>> -> memref<1x32x16x32xbf16, #tpu.memory_space<vmem>>
    %69 = tpu.memref_squeeze %68 : memref<1x32x16x32xbf16, #tpu.memory_space<vmem>> -> memref<32x16x32xbf16, #tpu.memory_space<vmem>>
    %c4 = arith.constant 4 : index
    %c0_49 = arith.constant 0 : index
    %c0_50 = arith.constant 0 : index
    %70 = vector.load %69[%c4, %c0_49, %c0_50] : memref<32x16x32xbf16, #tpu.memory_space<vmem>>, vector<16x16x32xbf16>
    %71 = vector.shape_cast %70 : vector<16x16x32xbf16> to vector<256x32xbf16>
    %c1_51 = arith.constant 1 : index
    %c0_52 = arith.constant 0 : index
    %c0_53 = arith.constant 0 : index
    %c0_54 = arith.constant 0 : index
    %72 = vector.load %arg4[%c1_51, %c0_52, %c0_53, %c0_54] : memref<3x2x32x256xbf16, #tpu.memory_space<vmem>>, vector<1x1x32x256xbf16>
    %73 = vector.shape_cast %72 : vector<1x1x32x256xbf16> to vector<32x256xbf16>
    %cst_55 = arith.constant dense<0.000000e+00> : vector<256x256xf32>
    %74 = tpu.matmul %71, %73, %cst_55 {dimension_numbers = #tpu.dot_dimension_numbers<[1], [0], [0], [1], [0, 0, 1, 1], [], []>} : vector<256x32xbf16>, vector<32x256xbf16>, vector<256x256xf32> -> vector<256x256xf32>
    %75 = arith.addf %67, %74 : vector<256x256xf32>
    %c0_i32_56 = arith.constant 0 : i32
    %c0_i32_57 = arith.constant 0 : i32
    %c0_i32_58 = arith.constant 0 : i32
    %76 = tpu.memref_slice %arg9[%9, %c0_i32_56, %c0_i32_57, %c0_i32_58] : memref<2x32x16x32xbf16, #tpu.memory_space<vmem>> -> memref<1x32x16x32xbf16, #tpu.memory_space<vmem>>
    %77 = tpu.memref_squeeze %76 : memref<1x32x16x32xbf16, #tpu.memory_space<vmem>> -> memref<32x16x32xbf16, #tpu.memory_space<vmem>>
    %c12 = arith.constant 12 : index
    %c0_59 = arith.constant 0 : index
    %c0_60 = arith.constant 0 : index
    %78 = vector.load %77[%c12, %c0_59, %c0_60] : memref<32x16x32xbf16, #tpu.memory_space<vmem>>, vector<16x16x32xbf16>
    %79 = vector.shape_cast %78 : vector<16x16x32xbf16> to vector<256x32xbf16>
    %c1_61 = arith.constant 1 : index
    %c1_62 = arith.constant 1 : index
    %c0_63 = arith.constant 0 : index
    %c0_64 = arith.constant 0 : index
    %80 = vector.load %arg4[%c1_61, %c1_62, %c0_63, %c0_64] : memref<3x2x32x256xbf16, #tpu.memory_space<vmem>>, vector<1x1x32x256xbf16>
    %81 = vector.shape_cast %80 : vector<1x1x32x256xbf16> to vector<32x256xbf16>
    %cst_65 = arith.constant dense<0.000000e+00> : vector<256x256xf32>
    %82 = tpu.matmul %79, %81, %cst_65 {dimension_numbers = #tpu.dot_dimension_numbers<[1], [0], [0], [1], [0, 0, 1, 1], [], []>} : vector<256x32xbf16>, vector<32x256xbf16>, vector<256x256xf32> -> vector<256x256xf32>
    %83 = arith.addf %75, %82 : vector<256x256xf32>
    %c2 = arith.constant 2 : index
    %c0_66 = arith.constant 0 : index
    %84 = vector.load %arg6[%c2, %c0_66] : memref<4x256xf32, #tpu.memory_space<vmem>>, vector<1x256xf32>
    %85 = vector.broadcast %84 : vector<1x256xf32> to vector<256x256xf32>
    %86 = arith.addf %83, %85 : vector<256x256xf32>
    %cst_67 = arith.constant 0.000000e+00 : f32
    %87 = vector.broadcast %cst_67 : f32 to vector<256x256xf32>
    %88 = arith.cmpf ogt, %86, %87 : vector<256x256xf32>
    %cst_68 = arith.constant 0.00999999977 : f32
    %89 = vector.broadcast %cst_68 : f32 to vector<256x256xf32>
    %90 = arith.mulf %89, %86 : vector<256x256xf32>
    %91 = arith.select %88, %86, %90 : vector<256x256xi1>, vector<256x256xf32>
    %92 = arith.truncf %91 : vector<256x256xf32> to vector<256x256xbf16>
    %93 = vector.extract_strided_slice %30 {offsets = [0, 768], sizes = [256, 256], strides = [1, 1]} : vector<256x1024xf32> to vector<256x256xf32>
    %c0_i32_69 = arith.constant 0 : i32
    %c0_i32_70 = arith.constant 0 : i32
    %c0_i32_71 = arith.constant 0 : i32
    %94 = tpu.memref_slice %arg9[%9, %c0_i32_69, %c0_i32_70, %c0_i32_71] : memref<2x32x16x32xbf16, #tpu.memory_space<vmem>> -> memref<1x32x16x32xbf16, #tpu.memory_space<vmem>>
    %95 = tpu.memref_squeeze %94 : memref<1x32x16x32xbf16, #tpu.memory_space<vmem>> -> memref<32x16x32xbf16, #tpu.memory_space<vmem>>
    %c0_72 = arith.constant 0 : index
    %c0_73 = arith.constant 0 : index
    %c0_74 = arith.constant 0 : index
    %96 = vector.load %95[%c0_72, %c0_73, %c0_74] : memref<32x16x32xbf16, #tpu.memory_space<vmem>>, vector<16x16x32xbf16>
    %97 = vector.shape_cast %96 : vector<16x16x32xbf16> to vector<256x32xbf16>
    %c2_75 = arith.constant 2 : index
    %c0_76 = arith.constant 0 : index
    %c0_77 = arith.constant 0 : index
    %c0_78 = arith.constant 0 : index
    %98 = vector.load %arg4[%c2_75, %c0_76, %c0_77, %c0_78] : memref<3x2x32x256xbf16, #tpu.memory_space<vmem>>, vector<1x1x32x256xbf16>
    %99 = vector.shape_cast %98 : vector<1x1x32x256xbf16> to vector<32x256xbf16>
    %cst_79 = arith.constant dense<0.000000e+00> : vector<256x256xf32>
    %100 = tpu.matmul %97, %99, %cst_79 {dimension_numbers = #tpu.dot_dimension_numbers<[1], [0], [0], [1], [0, 0, 1, 1], [], []>} : vector<256x32xbf16>, vector<32x256xbf16>, vector<256x256xf32> -> vector<256x256xf32>
    %101 = arith.addf %93, %100 : vector<256x256xf32>
    %c0_i32_80 = arith.constant 0 : i32
    %c0_i32_81 = arith.constant 0 : i32
    %c0_i32_82 = arith.constant 0 : i32
    %102 = tpu.memref_slice %arg9[%9, %c0_i32_80, %c0_i32_81, %c0_i32_82] : memref<2x32x16x32xbf16, #tpu.memory_space<vmem>> -> memref<1x32x16x32xbf16, #tpu.memory_space<vmem>>
    %103 = tpu.memref_squeeze %102 : memref<1x32x16x32xbf16, #tpu.memory_space<vmem>> -> memref<32x16x32xbf16, #tpu.memory_space<vmem>>
    %c16 = arith.constant 16 : index
    %c0_83 = arith.constant 0 : index
    %c0_84 = arith.constant 0 : index
    %104 = vector.load %103[%c16, %c0_83, %c0_84] : memref<32x16x32xbf16, #tpu.memory_space<vmem>>, vector<16x16x32xbf16>
    %105 = vector.shape_cast %104 : vector<16x16x32xbf16> to vector<256x32xbf16>
    %c2_85 = arith.constant 2 : index
    %c1_86 = arith.constant 1 : index
    %c0_87 = arith.constant 0 : index
    %c0_88 = arith.constant 0 : index
    %106 = vector.load %arg4[%c2_85, %c1_86, %c0_87, %c0_88] : memref<3x2x32x256xbf16, #tpu.memory_space<vmem>>, vector<1x1x32x256xbf16>
    %107 = vector.shape_cast %106 : vector<1x1x32x256xbf16> to vector<32x256xbf16>
    %cst_89 = arith.constant dense<0.000000e+00> : vector<256x256xf32>
    %108 = tpu.matmul %105, %107, %cst_89 {dimension_numbers = #tpu.dot_dimension_numbers<[1], [0], [0], [1], [0, 0, 1, 1], [], []>} : vector<256x32xbf16>, vector<32x256xbf16>, vector<256x256xf32> -> vector<256x256xf32>
    %109 = arith.addf %101, %108 : vector<256x256xf32>
    %c3 = arith.constant 3 : index
    %c0_90 = arith.constant 0 : index
    %110 = vector.load %arg6[%c3, %c0_90] : memref<4x256xf32, #tpu.memory_space<vmem>>, vector<1x256xf32>
    %111 = vector.broadcast %110 : vector<1x256xf32> to vector<256x256xf32>
    %112 = arith.addf %109, %111 : vector<256x256xf32>
    %cst_91 = arith.constant 0.000000e+00 : f32
    %113 = vector.broadcast %cst_91 : f32 to vector<256x256xf32>
    %114 = arith.cmpf ogt, %112, %113 : vector<256x256xf32>
    %cst_92 = arith.constant 0.00999999977 : f32
    %115 = vector.broadcast %cst_92 : f32 to vector<256x256xf32>
    %116 = arith.mulf %115, %112 : vector<256x256xf32>
    %117 = arith.select %114, %112, %116 : vector<256x256xi1>, vector<256x256xf32>
    %118 = arith.truncf %117 : vector<256x256xf32> to vector<256x256xbf16>
    %119 = tpu.concatenate %40, %66, %92, %118 in 1 : vector<256x256xbf16>, vector<256x256xbf16>, vector<256x256xbf16>, vector<256x256xbf16> -> vector<256x1024xbf16>
    %c0_93 = arith.constant 0 : index
    %c0_94 = arith.constant 0 : index
    %120 = vector.load %arg5[%c0_93, %c0_94] : memref<1024x128xbf16, #tpu.memory_space<vmem>>, vector<1024x128xbf16>
    %cst_95 = arith.constant dense<0.000000e+00> : vector<256x128xf32>
    %121 = tpu.matmul %119, %120, %cst_95 {dimension_numbers = #tpu.dot_dimension_numbers<[1], [0], [0], [1], [0, 0, 1, 1], [], []>} : vector<256x1024xbf16>, vector<1024x128xbf16>, vector<256x128xf32> -> vector<256x128xf32>
    %c0_96 = arith.constant 0 : index
    %c0_97 = arith.constant 0 : index
    %c0_98 = arith.constant 0 : index
    %122 = vector.load %arg7[%c0_96, %c0_97, %c0_98] : memref<1x1x128xf32, #tpu.memory_space<vmem>>, vector<1x1x128xf32>
    %123 = vector.shape_cast %122 : vector<1x1x128xf32> to vector<1x128xf32>
    %124 = vector.broadcast %123 : vector<1x128xf32> to vector<256x128xf32>
    %125 = arith.addf %121, %124 : vector<256x128xf32>
    %cst_99 = arith.constant 0.000000e+00 : f32
    %126 = vector.broadcast %cst_99 : f32 to vector<256x128xf32>
    %127 = arith.maximumf %125, %126 : vector<256x128xf32>
    %128 = vector.shape_cast %127 : vector<256x128xf32> to vector<1x16x16x128xf32>
    %129 = arith.truncf %128 : vector<1x16x16x128xf32> to vector<1x16x16x128xbf16>
    %c0_100 = arith.constant 0 : index
    %c0_101 = arith.constant 0 : index
    %c0_102 = arith.constant 0 : index
    %c0_103 = arith.constant 0 : index
    %130 = vector.load %arg8[%c0_100, %c0_101, %c0_102, %c0_103] : memref<1x16x16x128xbf16, #tpu.memory_space<vmem>>, vector<1x16x16x128xbf16>
    tpu.vector_store %arg8[%c0_100, %c0_101, %c0_102, %c0_103], %129 {strides = array<i32>} : memref<1x16x16x128xbf16, #tpu.memory_space<vmem>>, vector<1x16x16x128xbf16>,
    return
  }
  func.func @transform_1(%arg0: i32, %arg1: i32) -> (i32, i32) {
    %c0_i32 = arith.constant 0 : i32
    %c0_i32_0 = arith.constant 0 : i32
    %c0_i32_1 = arith.constant 0 : i32
    return %c0_i32, %c0_i32_0 : i32, i32
  }
  func.func @transform_2(%arg0: i32, %arg1: i32) -> (i32, i32, i32, i32) {
    %c0_i32 = arith.constant 0 : i32
    %c0_i32_0 = arith.constant 0 : i32
    %c0_i32_1 = arith.constant 0 : i32
    %c0_i32_2 = arith.constant 0 : i32
    %c0_i32_3 = arith.constant 0 : i32
    return %c0_i32, %c0_i32_0, %c0_i32_1, %c0_i32_2 : i32, i32, i32, i32
  }
  func.func @transform_3(%arg0: i32, %arg1: i32) -> (i32, i32) {
    %c0_i32 = arith.constant 0 : i32
    %c0_i32_0 = arith.constant 0 : i32
    %c0_i32_1 = arith.constant 0 : i32
    return %c0_i32, %c0_i32_0 : i32, i32
  }
  func.func @transform_4(%arg0: i32, %arg1: i32) -> (i32, i32) {
    %c0_i32 = arith.constant 0 : i32
    %c0_i32_0 = arith.constant 0 : i32
    %c0_i32_1 = arith.constant 0 : i32
    return %c0_i32, %c0_i32_0 : i32, i32
  }
  func.func @transform_5(%arg0: i32, %arg1: i32) -> (i32, i32, i32) {
    %c0_i32 = arith.constant 0 : i32
    %c0_i32_0 = arith.constant 0 : i32
    %c0_i32_1 = arith.constant 0 : i32
    return %arg0, %c0_i32, %c0_i32_0 : i32, i32, i32
  }
  func.func @transform_6(%arg0: i32, %arg1: i32) -> (i32, i32, i32, i32) {
    %c0_i32 = arith.constant 0 : i32
    %c0_i32_0 = arith.constant 0 : i32
    %c0_i32_1 = arith.constant 0 : i32
    return %arg0, %arg1, %c0_i32, %c0_i32_0 : i32, i32, i32, i32
  }
}

</mosaic_0001>

<bundles_post_ra>
// kernel: aspp_forward.1
= control target key start
LH: loop header
LB: loop body
LE: loop exit
PB: predicated region body
PF: predicated region fallthrough
CT: control target
= control target key end

     0   :  { %s7858_s21 = smov 0   ;;  %s7860_s22 = smov 0   ;;  %s11007_s0 = inlined_call_operand.vmem [shape: bf16[2,32,16,32], index: 0, kind: input, shape index: {}]   ;;  %s11008_s1 = inlined_call_operand.vmem [shape: bf16[32,1024], index: 1, kind: input, shape index: {}]   ;;  %s11009_s2 = inlined_call_operand.vmem [shape: bf16[3,2,32,256], index: 2, kind: input, shape index: {}]   ;;  %s11010_s3 = inlined_call_operand.vmem [shape: bf16[1024,128], index: 3, kind: input, shape index: {}]   ;;  %s11011_s4 = inlined_call_operand.vmem [shape: f32[4,256], index: 4, kind: input, shape index: {}]   ;;  %s11012_s5 = inlined_call_operand.vmem [shape: f32[2,1,128], index: 5, kind: input, shape index: {}]   ;;  %s11013_s6 = inlined_call_operand.vmem [shape: bf16[2,16,16,128], index: 6, kind: output, shape index: {}]  }
   0x1   :  { %s7862_s23 = smov 0  }
   0x2 LB: > { %s28_s24 = sadd.s32 1, %s7816_s22  ;;  %p6215_p0 = scmp.ge.s32.totalorder %s7820_s23, 1  ;;  %s7820_s23 = sphi %s7862_s23, %s16_s23   ;;  %s7816_s22 = sphi %s7860_s22, %s11475_s22   ;;  %s7812_s21 = sphi %s7858_s21, %s11474_s21  }
   0x3   : > { %p30_p1 = scmp.ge.s32.totalorder %s28_s24, 2  ;;  %p200_p2 = scmp.lt.s32.totalorder %s7820_s23, 3 }
   0x5   : > { %s11477_s24 = smov (%p30_p1, %s28_s24), 0  ;;  %p201_p3 = pnand %p6215_p0, %p200_p2 }
   0x7   : > { %204 = sbr.rel (%p201_p3) target bundleno = 1256 (0x4e8), region = 40 }
   0xe   : > { %p231_p4 = scmp.lt.s32.totalorder %s7812_s21, 1  ;;  %s6709_s25 = sshll.u32 %s7812_s21, 8 }
   0xf   : > { %s7879_s28 = scalar_lea.vmem %s11007_s0, %s6709_s25 }
  0x10   : > { %s11479_s21 = smov (!%p231_p4, %s7812_s21), 1  ;;  %v7882_v0 = vld [vmem:[%s7879_s28] sm:$0xff]  ;;  %v7885_v1 = vld [vmem:[%s7879_s28 + $0x8] sm:$0xff]  ;;  %v7888_v2 = vld [vmem:[%s7879_s28 + $0x10] sm:$0xff] }
  0x11   : > { %v7891_v3 = vld [vmem:[%s7879_s28 + $0x18] sm:$0xff]  ;;  %v7894_v4 = vld [vmem:[%s7879_s28 + $0x20] sm:$0xff]  ;;  %v7897_v5 = vld [vmem:[%s7879_s28 + $0x28] sm:$0xff]  ;;  %s7902_s7 = scalar_lea.vmem %s11012_s5, %s11479_s21  ;;  %s6708_s8 = sshll.u32 %s11479_s21, 7 }
  0x12   : > { %11117 = vst [vmem:[#allocation7_spill] sm:$0xff] %v7891_v3  ;;  %11118 = vst [vmem:[#allocation8_spill] sm:$0xff] %v7894_v4  ;;  %v7905_v6 = vld [vmem:[%s7879_s28 + $0x30] sm:$0xff]  ;;  %v7908_v7 = vld [vmem:[%s7879_s28 + $0x38] sm:$0xff]  ;;  %s7916_s11 = scalar_lea.vmem %s11013_s6, %s6708_s8 }
  0x13   : > { %11119 = vst [vmem:[#allocation9_spill] sm:$0xff] %v7897_v5  ;;  %11120 = vst [vmem:[#allocation10_spill] sm:$0xff] %v7905_v6  ;;  %v7911_v8 = vld [vmem:[%s7879_s28 + $0x40] sm:$0xff]  ;;  %v7919_v9 = vld [vmem:[%s7879_s28 + $0x48] sm:$0xff] }
  0x14   : > { %11121 = vst [vmem:[#allocation11_spill] sm:$0xff] %v7908_v7  ;;  %11122 = vst [vmem:[#allocation12_spill] sm:$0xff] %v7911_v8  ;;  %v7922_v10 = vld [vmem:[%s7879_s28 + $0x50] sm:$0xff]  ;;  %v7925_v11 = vld [vmem:[%s7879_s28 + $0x58] sm:$0xff] }
  0x15   : > { %11123 = vst [vmem:[#allocation13_spill] sm:$0xff] %v7919_v9  ;;  %v7928_v12 = vld [vmem:[%s7879_s28 + $0x60] sm:$0xff]  ;;  %v7931_v13 = vld [vmem:[%s7879_s28 + $0x68] sm:$0xff]  ;;  %v7934_v14 = vld [vmem:[%s7879_s28 + $0x70] sm:$0xff] }
  0x16   : > { %v7937_v15 = vld [vmem:[%s7879_s28 + $0x78] sm:$0xff]  ;;  %v7940_v16 = vld [vmem:[%s7879_s28 + $0x80] sm:$0xff]  ;;  %v7943_v17 = vld [vmem:[%s7879_s28 + $0x88] sm:$0xff] }
  0x17   : > { %v7946_v18 = vld [vmem:[%s7879_s28 + $0x90] sm:$0xff]  ;;  %v7949_v19 = vld [vmem:[%s7879_s28 + $0x98] sm:$0xff]  ;;  %v7952_v20 = vld [vmem:[%s7879_s28 + $0xa0] sm:$0xff] }
  0x18   : > { %v7955_v21 = vld [vmem:[%s7879_s28 + $0xa8] sm:$0xff]  ;;  %v7958_v22 = vld [vmem:[%s7879_s28 + $0xb0] sm:$0xff]  ;;  %v7961_v23 = vld [vmem:[%s7879_s28 + $0xb8] sm:$0xff] }
  0x19   : > { %v7964_v24 = vld [vmem:[%s7879_s28 + $0xc0] sm:$0xff]  ;;  %v7967_v25 = vld [vmem:[%s7879_s28 + $0xc8] sm:$0xff]  ;;  %v7970_v26 = vld [vmem:[%s7879_s28 + $0xd0] sm:$0xff] }
  0x1a   : > { %11124 = vst [vmem:[#allocation14_spill] sm:$0xff] %v7967_v25  ;;  %11125 = vst [vmem:[#allocation15_spill] sm:$0xff] %v7970_v26  ;;  %v7973_v27 = vld [vmem:[%s7879_s28 + $0xd8] sm:$0xff]  ;;  %v7976_v28 = vld [vmem:[%s7879_s28 + $0xe0] sm:$0xff] }
  0x1b   : > { %11126 = vst [vmem:[#allocation16_spill] sm:$0xff] %v7973_v27  ;;  %11127 = vst [vmem:[#allocation17_spill] sm:$0xff] %v7976_v28  ;;  %v7979_v29 = vld [vmem:[%s7879_s28 + $0xe8] sm:$0xff]  ;;  %v7982_v30 = vld [vmem:[%s7879_s28 + $0xf0] sm:$0xff] }
  0x1c   : > { %11128 = vst [vmem:[#allocation18_spill] sm:$0xff] %v7979_v29  ;;  %11129 = vst [vmem:[#allocation19_spill] sm:$0xff] %v7982_v30  ;;  %v7985_v31 = vld [vmem:[%s7879_s28 + $0xf8] sm:$0xff] }
  0x1d   : > { %11130 = vst [vmem:[#allocation20_spill] sm:$0xff] %v7985_v31 }
  0x1e   : > { %375 = vsyncadd [#allocation3], 4096 }
  0x1f   : > { %7808 = dma.done.wait [#allocation3], 4096 }
  0x20   : > { %7809 = vsyncadd [#allocation3], 4294963200  ;;  %v11014_v32 = vmov 0   ;;  %v523_v33 = vld [vmem:[%s11008_s1] sm:$0xff]  ;;  %v524_v35 = vld [vmem:[%s11008_s1 + $0x8] sm:$0xff]  ;;  %vm619_vm0 = vcmask 261120  }
  0x21   : > { %700 = vmatprep.mubr.bf16.mxu0 %v11014_v32  ;;  %893 = vmatprep.mubr.bf16.mxu1 %v11014_v32  ;;  %v527_v34 = vld [vmem:[%s11008_s1 + $0x20] sm:$0xff]  ;;  %v528_v37 = vld [vmem:[%s11008_s1 + $0x28] sm:$0xff]  ;;  %v526_v47 = vld [vmem:[%s11008_s1 + $0x18] sm:$0xff] }
  0x22   : > { %v6305_v36 = vcombine.high %v523_v33, %v527_v34  ;;  %v6304_v38 = vcombine.low %v523_v33, %v527_v34  ;;  %v531_v39 = vld [vmem:[%s11008_s1 + $0x40] sm:$0xff]  ;;  %v6307_v41 = vcombine.high %v524_v35, %v528_v37  ;;  %v6306_v42 = vcombine.low %v524_v35, %v528_v37  ;;  %v532_v44 = vld [vmem:[%s11008_s1 + $0x48] sm:$0xff]  ;;  %v530_v48 = vld [vmem:[%s11008_s1 + $0x38] sm:$0xff] }
  0x23   : > { %v535_v40 = vld [vmem:[%s11008_s1 + $0x60] sm:$0xff]  ;;  %v536_v45 = vld [vmem:[%s11008_s1 + $0x68] sm:$0xff]  ;;  %v525_v50 = vld [vmem:[%s11008_s1 + $0x10] sm:$0xff]  ;;  %v6311_v56 = vcombine.high %v526_v47, %v530_v48  ;;  %v6310_v59 = vcombine.low %v526_v47, %v530_v48 }
  0x24   : > { %v6313_v43 = vcombine.high %v531_v39, %v535_v40  ;;  %668 = vmatprep.subr.bf16.mxu0 %v6305_v36  ;;  %v6315_v46 = vcombine.high %v532_v44, %v536_v45  ;;  %861 = vmatprep.subr.bf16.mxu1 %v6307_v41  ;;  %v6312_v49 = vcombine.low %v531_v39, %v535_v40  ;;  %v529_v51 = vld [vmem:[%s11008_s1 + $0x30] sm:$0xff]  ;;  %v534_v53 = vld [vmem:[%s11008_s1 + $0x58] sm:$0xff]  ;;  %v7697_v63 = vld [vmem:[%s11009_s2 + $0x4] ss:$8 sps:$4 sm:$0xff]  }
  0x25   : > { %669 = vmatpush1.bf16.msra.mxu0 %v6304_v38  ;;  %862 = vmatpush1.bf16.msra.mxu1 %v6306_v42  ;;  %v6314_v52 = vcombine.low %v532_v44, %v536_v45  ;;  %v538_v54 = vld [vmem:[%s11008_s1 + $0x78] sm:$0xff]  ;;  %v6309_v55 = vcombine.high %v525_v50, %v529_v51  ;;  %v533_v57 = vld [vmem:[%s11008_s1 + $0x50] sm:$0xff]  ;;  %v6308_v61 = vcombine.low %v525_v50, %v529_v51  ;;  %v7703_v35 = vld [vmem:[%s11009_s2 + $0x44] ss:$8 sps:$4 sm:$0xff]  }
  0x26   : > { %670 = vmatprep.subr.bf16.mxu0 %v6313_v43  ;;  %863 = vmatprep.subr.bf16.mxu1 %v6315_v46  ;;  %v537_v58 = vld [vmem:[%s11008_s1 + $0x70] sm:$0xff]  ;;  %v6319_v60 = vcombine.high %v534_v53, %v538_v54  ;;  %v6318_v33 = vcombine.low %v534_v53, %v538_v54  ;;  %v7695_v36 = vld [vmem:[%s11009_s2] ss:$8 sps:$4 sm:$0xff]   ;;  %v7709_v42 = vld [vmem:[%s11009_s2 + $0x24] ss:$8 sps:$4 sm:$0xff]   ;;  %v1442_v43 = vlaneseq }
  0x27   : > { %v6317_v62 = vcombine.high %v533_v57, %v537_v58  ;;  %v6316_v34 = vcombine.low %v533_v57, %v537_v58  ;;  %v7700_v37 = vld [vmem:[%s11009_s2 + $0x14] ss:$8 sps:$4 sm:$0xff]   ;;  %v7701_v38 = vld [vmem:[%s11009_s2 + $0x40] ss:$8 sps:$4 sm:$0xff]   ;;  %v7698_v40 = vld [vmem:[%s11009_s2 + $0x10] ss:$8 sps:$4 sm:$0xff]  }
  0x28   : > { %v7706_v39 = vld [vmem:[%s11009_s2 + $0x54] ss:$8 sps:$4 sm:$0xff]   ;;  %v7704_v41 = vld [vmem:[%s11009_s2 + $0x50] ss:$8 sps:$4 sm:$0xff]   ;;  %v1443_v44 = vshrl.u32 %v1442_v43, 7 }
  0x29   : > { %671 = vmatpush1.bf16.msra.mxu0 %v6312_v49  ;;  %864 = vmatpush1.bf16.msra.mxu1 %v6314_v52  ;;  %v1440_v46 = vld [vmem:[%s11011_s4] ss:$4 sm:$0x3] }
  0x2a   : > { %1054 = vmatprep.subr.bf16.mxu0 %v6309_v55  ;;  %1247 = vmatprep.subr.bf16.mxu1 %v6311_v56  ;;  %v8220_v45 = vsub.s32 0, %v1443_v44  ;;  %v8225_v47 = vsub.s32 1, %v1443_v44  ;;  %v7713_v28 = vld [vmem:[%s11009_s2 + $0x60] ss:$8 sps:$4 sm:$0xff]  }
  0x2c   : > { %6320 = vmatmul.mubr.msk.bf16.vlgmr.msra.gmra.mrb[0].mxu0 %vm619_vm0, %v7911_v8  ;;  %6336 = vmatmul.mubr.msk.bf16.vlgmr.msra.gmra.mrb[0].mxu1 %vm619_vm0, %v7911_v8  ;;  %11131 = vst [vmem:[#allocation21_spill] sm:$0xff] %v8220_v45  ;;  %11132 = vst [vmem:[#allocation22_spill] sm:$0xff] %v8225_v47  ;;  %v8230_v48 = vrot.slane %v1440_v46, %v8220_v45  ;;  %v8236_v49 = vrot.slane %v1440_v46, %v8225_v47  ;;  %v7718_v45 = vld [vmem:[%s11009_s2 + $0x74] ss:$8 sps:$4 sm:$0xff]  }
  0x2d   : > { %710 = vmatprep.mubr.bf16.mxu0 %v11014_v32  ;;  %1248 = vmatpush1.bf16.msra.mxu1 %v6310_v59 }
  0x2e   : > { %903 = vmatprep.mubr.bf16.mxu1 %v11014_v32  ;;  %1249 = vmatprep.subr.bf16.mxu1 %v6319_v60 }
  0x2f   : > { %1055 = vmatpush1.bf16.msra.mxu0 %v6308_v61 }
  0x30   : > { %1056 = vmatprep.subr.bf16.mxu0 %v6317_v62 }
  0x31   : > { %1250 = vmatpush1.bf16.msra.mxu1 %v6318_v33 }
  0x32   : > { %1829 = vmatprep.subr.bf16.mxu1 %v7697_v63  ;;  %v7715_v63 = vld [vmem:[%s11009_s2 + $0x64] ss:$8 sps:$4 sm:$0xff]  }
  0x33   : > { %1057 = vmatpush1.bf16.msra.mxu0 %v6316_v34 }
  0x34   : > { %6321 = vmatmul.mubr.msk.bf16.gmra.mrb[4].mxu0 %vm619_vm0, %v7919_v9  ;;  %6337 = vmatmul.mubr.msk.bf16.gmra.mrb[4].mxu1 %vm619_vm0, %v7919_v9 }
  0x35   : > { %720 = vmatprep.mubr.bf16.mxu0 %v11014_v32  ;;  %913 = vmatprep.mubr.bf16.mxu1 %v11014_v32 }
  0x36   : > { %2824 = vmatprep.subr.bf16.mxu0 %v7703_v35 }
  0x3c   : > { %6322 = vmatmul.mubr.msk.bf16.gmra.mrb[8].mxu0 %vm619_vm0, %v7922_v10  ;;  %6338 = vmatmul.mubr.msk.bf16.gmra.mrb[8].mxu1 %vm619_vm0, %v7922_v10 }
  0x3d   : > { %730 = vmatprep.mubr.bf16.mxu0 %v11014_v32  ;;  %923 = vmatprep.mubr.bf16.mxu1 %v11014_v32 }
  0x44   : > { %6323 = vmatmul.mubr.msk.bf16.gmra.mrb[12].mxu0 %vm619_vm0, %v7925_v11  ;;  %6339 = vmatmul.mubr.msk.bf16.gmra.mrb[12].mxu1 %vm619_vm0, %v7925_v11 }
  0x45   : > { %740 = vmatprep.mubr.bf16.mxu0 %v11014_v32  ;;  %933 = vmatprep.mubr.bf16.mxu1 %v11014_v32 }
  0x4c   : > { %6324 = vmatmul.mubr.msk.bf16.gmra.mrb[16].mxu0 %vm619_vm0, %v7928_v12  ;;  %6340 = vmatmul.mubr.msk.bf16.gmra.mrb[16].mxu1 %vm619_vm0, %v7928_v12 }
  0x4d   : > { %750 = vmatprep.mubr.bf16.mxu0 %v11014_v32  ;;  %943 = vmatprep.mubr.bf16.mxu1 %v11014_v32 }
  0x54   : > { %6325 = vmatmul.mubr.msk.bf16.gmra.mrb[20].mxu0 %vm619_vm0, %v7931_v13  ;;  %6341 = vmatmul.mubr.msk.bf16.gmra.mrb[20].mxu1 %vm619_vm0, %v7931_v13 }
  0x55   : > { %760 = vmatprep.mubr.bf16.mxu0 %v11014_v32  ;;  %953 = vmatprep.mubr.bf16.mxu1 %v11014_v32 }
  0x5c   : > { %6326 = vmatmul.mubr.msk.bf16.gmra.mrb[24].mxu0 %vm619_vm0, %v7934_v14  ;;  %6342 = vmatmul.mubr.msk.bf16.gmra.mrb[24].mxu1 %vm619_vm0, %v7934_v14 }
  0x5d   : > { %770 = vmatprep.mubr.bf16.mxu0 %v11014_v32  ;;  %963 = vmatprep.mubr.bf16.mxu1 %v11014_v32 }
  0x64   : > { %6327 = vmatmul.mubr.msk.bf16.gmra.mrb[28].mxu0 %vm619_vm0, %v7937_v15  ;;  %6343 = vmatmul.mubr.msk.bf16.gmra.mrb[28].mxu1 %vm619_vm0, %v7937_v15 }
  0x65   : > { %780 = vmatprep.mubr.bf16.mxu0 %v11014_v32  ;;  %973 = vmatprep.mubr.bf16.mxu1 %v11014_v32 }
  0x6c   : > { %6328 = vmatmul.mubr.msk.bf16.gmra.mrb[32].mxu0 %vm619_vm0, %v7940_v16  ;;  %6344 = vmatmul.mubr.msk.bf16.gmra.mrb[32].mxu1 %vm619_vm0, %v7940_v16 }
  0x6d   : > { %790 = vmatprep.mubr.bf16.mxu0 %v11014_v32  ;;  %983 = vmatprep.mubr.bf16.mxu1 %v11014_v32 }
  0x74   : > { %6329 = vmatmul.mubr.msk.bf16.gmra.mrb[36].mxu0 %vm619_vm0, %v7943_v17  ;;  %6345 = vmatmul.mubr.msk.bf16.gmra.mrb[36].mxu1 %vm619_vm0, %v7943_v17 }
  0x75   : > { %800 = vmatprep.mubr.bf16.mxu0 %v11014_v32  ;;  %993 = vmatprep.mubr.bf16.mxu1 %v11014_v32 }
  0x7c   : > { %6330 = vmatmul.mubr.msk.bf16.gmra.mrb[40].mxu0 %vm619_vm0, %v7946_v18  ;;  %6346 = vmatmul.mubr.msk.bf16.gmra.mrb[40].mxu1 %vm619_vm0, %v7946_v18 }
  0x7d   : > { %810 = vmatprep.mubr.bf16.mxu0 %v11014_v32  ;;  %1003 = vmatprep.mubr.bf16.mxu1 %v11014_v32 }
  0x84   : > { %6331 = vmatmul.mubr.msk.bf16.gmra.mrb[44].mxu0 %vm619_vm0, %v7949_v19  ;;  %6347 = vmatmul.mubr.msk.bf16.gmra.mrb[44].mxu1 %vm619_vm0, %v7949_v19 }
  0x85   : > { %820 = vmatprep.mubr.bf16.mxu0 %v11014_v32  ;;  %1013 = vmatprep.mubr.bf16.mxu1 %v11014_v32 }
  0x8c   : > { %6332 = vmatmul.mubr.msk.bf16.gmra.mrb[48].mxu0 %vm619_vm0, %v7952_v20  ;;  %6348 = vmatmul.mubr.msk.bf16.gmra.mrb[48].mxu1 %vm619_vm0, %v7952_v20 }
  0x8d   : > { %830 = vmatprep.mubr.bf16.mxu0 %v11014_v32  ;;  %1023 = vmatprep.mubr.bf16.mxu1 %v11014_v32 }
  0x94   : > { %6333 = vmatmul.mubr.msk.bf16.gmra.mrb[52].mxu0 %vm619_vm0, %v7955_v21  ;;  %6349 = vmatmul.mubr.msk.bf16.gmra.mrb[52].mxu1 %vm619_vm0, %v7955_v21 }
  0x95   : > { %840 = vmatprep.mubr.bf16.mxu0 %v11014_v32  ;;  %1033 = vmatprep.mubr.bf16.mxu1 %v11014_v32 }
  0x9c   : > { %6334 = vmatmul.mubr.msk.bf16.gmra.mrb[56].mxu0 %vm619_vm0, %v7958_v22  ;;  %6350 = vmatmul.mubr.msk.bf16.gmra.mrb[56].mxu1 %vm619_vm0, %v7958_v22 }
  0x9d   : > { %850 = vmatprep.mubr.bf16.mxu0 %v11014_v32  ;;  %1043 = vmatprep.mubr.bf16.mxu1 %v11014_v32 }
  0xa4   : > { %6335 = vmatmul.mubr.msk.bf16.gmra.mrb[60].mxu0 %vm619_vm0, %v7961_v23  ;;  %6351 = vmatmul.mubr.msk.bf16.gmra.mrb[60].mxu1 %vm619_vm0, %v7961_v23 }
  0xa5   : > { %1086 = vmatprep.mubr.bf16.mxu0 %v11014_v32  ;;  %1279 = vmatprep.mubr.bf16.mxu1 %v11014_v32 }
  0xac   : > { %6352 = vmatmul.mubr.msk.bf16.vlgmr.msra.gmra.mrb[64].mxu0 %vm619_vm0, %v7911_v8  ;;  %6368 = vmatmul.mubr.msk.bf16.vlgmr.msra.gmra.mrb[64].mxu1 %vm619_vm0, %v7911_v8 }
  0xad   : > { %1096 = vmatprep.mubr.bf16.mxu0 %v11014_v32  ;;  %1830 = vmatpush1.bf16.msra.mxu1 %v7695_v36 }
  0xae   : > { %1289 = vmatprep.mubr.bf16.mxu1 %v11014_v32  ;;  %1831 = vmatprep.subr.bf16.mxu1 %v7700_v37 }
  0xaf   : > { %2825 = vmatpush1.bf16.msra.mxu0 %v7701_v38 }
  0xb0   : > { %2826 = vmatprep.subr.bf16.mxu0 %v7706_v39 }
  0xb1   : > { %1832 = vmatpush1.bf16.msra.mxu1 %v7698_v40 }
  0xb2   : > { %2176 = vmatprep.subr.bf16.mxu1 %v7709_v42 }
  0xb3   : > { %2827 = vmatpush1.bf16.msra.mxu0 %v7704_v41 }
  0xb4   : > { %6353 = vmatmul.mubr.msk.bf16.gmra.mrb[68].mxu0 %vm619_vm0, %v7919_v9  ;;  %6369 = vmatmul.mubr.msk.bf16.gmra.mrb[68].mxu1 %vm619_vm0, %v7919_v9 }
  0xb5   : > { %1106 = vmatprep.mubr.bf16.mxu0 %v11014_v32  ;;  %1299 = vmatprep.mubr.bf16.mxu1 %v11014_v32 }
  0xb6   : > { %3171 = vmatprep.subr.bf16.mxu0 %v7715_v63 }
  0xbc   : > { %6354 = vmatmul.mubr.msk.bf16.gmra.mrb[72].mxu0 %vm619_vm0, %v7922_v10  ;;  %6370 = vmatmul.mubr.msk.bf16.gmra.mrb[72].mxu1 %vm619_vm0, %v7922_v10 }
  0xbd   : > { %1116 = vmatprep.mubr.bf16.mxu0 %v11014_v32  ;;  %1309 = vmatprep.mubr.bf16.mxu1 %v11014_v32 }
  0xc4   : > { %6355 = vmatmul.mubr.msk.bf16.gmra.mrb[76].mxu0 %vm619_vm0, %v7925_v11  ;;  %6371 = vmatmul.mubr.msk.bf16.gmra.mrb[76].mxu1 %vm619_vm0, %v7925_v11 }
  0xc5   : > { %1126 = vmatprep.mubr.bf16.mxu0 %v11014_v32  ;;  %1319 = vmatprep.mubr.bf16.mxu1 %v11014_v32 }
  0xcc   : > { %6356 = vmatmul.mubr.msk.bf16.gmra.mrb[80].mxu0 %vm619_vm0, %v7928_v12  ;;  %6372 = vmatmul.mubr.msk.bf16.gmra.mrb[80].mxu1 %vm619_vm0, %v7928_v12 }
  0xcd   : > { %1136 = vmatprep.mubr.bf16.mxu0 %v11014_v32  ;;  %1329 = vmatprep.mubr.bf16.mxu1 %v11014_v32 }
  0xd4   : > { %6357 = vmatmul.mubr.msk.bf16.gmra.mrb[84].mxu0 %vm619_vm0, %v7931_v13  ;;  %6373 = vmatmul.mubr.msk.bf16.gmra.mrb[84].mxu1 %vm619_vm0, %v7931_v13 }
  0xd5   : > { %1146 = vmatprep.mubr.bf16.mxu0 %v11014_v32  ;;  %1339 = vmatprep.mubr.bf16.mxu1 %v11014_v32 }
  0xdc   : > { %6358 = vmatmul.mubr.msk.bf16.gmra.mrb[88].mxu0 %vm619_vm0, %v7934_v14  ;;  %6374 = vmatmul.mubr.msk.bf16.gmra.mrb[88].mxu1 %vm619_vm0, %v7934_v14 }
  0xdd   : > { %1156 = vmatprep.mubr.bf16.mxu0 %v11014_v32  ;;  %1349 = vmatprep.mubr.bf16.mxu1 %v11014_v32 }
  0xe4   : > { %6359 = vmatmul.mubr.msk.bf16.gmra.mrb[92].mxu0 %vm619_vm0, %v7937_v15  ;;  %6375 = vmatmul.mubr.msk.bf16.gmra.mrb[92].mxu1 %vm619_vm0, %v7937_v15 }
  0xe5   : > { %1166 = vmatprep.mubr.bf16.mxu0 %v11014_v32  ;;  %1359 = vmatprep.mubr.bf16.mxu1 %v11014_v32 }
  0xec   : > { %6360 = vmatmul.mubr.msk.bf16.gmra.mrb[96].mxu0 %vm619_vm0, %v7940_v16  ;;  %6376 = vmatmul.mubr.msk.bf16.gmra.mrb[96].mxu1 %vm619_vm0, %v7940_v16 }
  0xed   : > { %1176 = vmatprep.mubr.bf16.mxu0 %v11014_v32  ;;  %1369 = vmatprep.mubr.bf16.mxu1 %v11014_v32 }
  0xf4   : > { %6361 = vmatmul.mubr.msk.bf16.gmra.mrb[100].mxu0 %vm619_vm0, %v7943_v17  ;;  %6377 = vmatmul.mubr.msk.bf16.gmra.mrb[100].mxu1 %vm619_vm0, %v7943_v17 }
  0xf5   : > { %1186 = vmatprep.mubr.bf16.mxu0 %v11014_v32  ;;  %1379 = vmatprep.mubr.bf16.mxu1 %v11014_v32 }
  0xfc   : > { %6362 = vmatmul.mubr.msk.bf16.gmra.mrb[104].mxu0 %vm619_vm0, %v7946_v18  ;;  %6378 = vmatmul.mubr.msk.bf16.gmra.mrb[104].mxu1 %vm619_vm0, %v7946_v18 }
  0xfd   : > { %1196 = vmatprep.mubr.bf16.mxu0 %v11014_v32  ;;  %1389 = vmatprep.mubr.bf16.mxu1 %v11014_v32 }
  0xff   : > { %v702_v50 = vpop.f32.mrb[0].mxu0 }
 0x100   : > { %v1452_v51 = vadd.f32 %v8230_v48, %v702_v50  ;;  %v704_v52 = vpop.f32.mrb[1].mxu0 }
 0x101   : > { %v1453_v53 = vadd.f32 %v8236_v49, %v704_v52  ;;  %v706_v54 = vpop.f32.mrb[2].mxu0 }
 0x102   : > { %vm1516_vm1 = vcmp.gt.f32.partialorder %v1452_v51, 0.0  ;;  %v1580_v55 = vmul.f32 0.01, %v1452_v51  ;;  %v1454_v56 = vadd.f32 %v8230_v48, %v706_v54  ;;  %v708_v57 = vpop.f32.mrb[3].mxu0 }
 0x103   : > { %v1581_v58 = vmul.f32 0.01, %v1453_v53  ;;  %v1455_v59 = vadd.f32 %v8236_v49, %v708_v57  ;;  %vm1517_vm2 = vcmp.gt.f32.partialorder %v1453_v53, 0.0 }
 0x104   : > { %6363 = vmatmul.mubr.msk.bf16.gmra.mrb[108].mxu0 %vm619_vm0, %v7949_v19  ;;  %v8245_v60 = vsel %vm1516_vm1, %v1452_v51, %v1580_v55  ;;  %vm1518_vm3 = vcmp.gt.f32.partialorder %v1454_v56, 0.0  ;;  %v1582_v61 = vmul.f32 0.01, %v1454_v56  ;;  %6379 = vmatmul.mubr.msk.bf16.gmra.mrb[108].mxu1 %vm619_vm0, %v7949_v19 }
 0x105   : > { %1206 = vmatprep.mubr.bf16.mxu0 %v11014_v32  ;;  %v1583_v62 = vmul.f32 0.01, %v1455_v59  ;;  %v8253_v33 = vsel %vm1517_vm2, %v1453_v53, %v1581_v58  ;;  %1399 = vmatprep.mubr.bf16.mxu1 %v11014_v32  ;;  %vm1519_vm4 = vcmp.gt.f32.partialorder %v1455_v59, 0.0 }
 0x106   : > { %v8256_v34 = vsel %vm1518_vm3, %v1454_v56, %v1582_v61 }
 0x107   : > { %v712_v36 = vpop.f32.mrb[4].mxu0  ;;  %v8260_v37 = vsel %vm1519_vm4, %v1455_v59, %v1583_v62 }
 0x108   : > { %v1456_v38 = vadd.f32 %v8230_v48, %v712_v36  ;;  %v714_v39 = vpop.f32.mrb[5].mxu0 }
 0x109   : > { %v1457_v41 = vadd.f32 %v8236_v49, %v714_v39  ;;  %v716_v42 = vpop.f32.mrb[6].mxu0 }
 0x10a   : > { %v1584_v43 = vmul.f32 0.01, %v1456_v38  ;;  %v1458_v44 = vadd.f32 %v8230_v48, %v716_v42  ;;  %v718_v46 = vpop.f32.mrb[7].mxu0  ;;  %vm1520_vm5 = vcmp.gt.f32.partialorder %v1456_v38, 0.0 }
 0x10b   : > { %v1585_v50 = vmul.f32 0.01, %v1457_v41  ;;  %v1459_v51 = vadd.f32 %v8236_v49, %v718_v46  ;;  %vm1521_vm6 = vcmp.gt.f32.partialorder %v1457_v41, 0.0 }
 0x10c   : > { %6364 = vmatmul.mubr.msk.bf16.gmra.mrb[112].mxu0 %vm619_vm0, %v7952_v20  ;;  %v1586_v52 = vmul.f32 0.01, %v1458_v44  ;;  %vm1522_vm7 = vcmp.gt.f32.partialorder %v1458_v44, 0.0  ;;  %v8270_v53 = vsel %vm1520_vm5, %v1456_v38, %v1584_v43  ;;  %6380 = vmatmul.mubr.msk.bf16.gmra.mrb[112].mxu1 %vm619_vm0, %v7952_v20 }
 0x10d   : > { %1216 = vmatprep.mubr.bf16.mxu0 %v11014_v32  ;;  %v1587_v54 = vmul.f32 0.01, %v1459_v51  ;;  %vm1523_vm8 = vcmp.gt.f32.partialorder %v1459_v51, 0.0  ;;  %v8275_v55 = vsel %vm1521_vm6, %v1457_v41, %v1585_v50  ;;  %1409 = vmatprep.mubr.bf16.mxu1 %v11014_v32 }
 0x10e   : > { %v8278_v56 = vsel %vm1522_vm7, %v1458_v44, %v1586_v52 }
 0x10f   : > { %v722_v57 = vpop.f32.mrb[8].mxu0  ;;  %v8280_v58 = vsel %vm1523_vm8, %v1459_v51, %v1587_v54 }
 0x110   : > { %v1460_v61 = vadd.f32 %v8230_v48, %v722_v57  ;;  %v724_v62 = vpop.f32.mrb[9].mxu0 }
 0x111   : > { %v1461_v36 = vadd.f32 %v8236_v49, %v724_v62  ;;  %v726_v38 = vpop.f32.mrb[10].mxu0 }
 0x112   : > { %v1588_v39 = vmul.f32 0.01, %v1460_v61  ;;  %v1462_v41 = vadd.f32 %v8230_v48, %v726_v38  ;;  %v728_v42 = vpop.f32.mrb[11].mxu0  ;;  %vm1524_vm9 = vcmp.gt.f32.partialorder %v1460_v61, 0.0 }
 0x113   : > { %v1589_v43 = vmul.f32 0.01, %v1461_v36  ;;  %v1463_v44 = vadd.f32 %v8236_v49, %v728_v42  ;;  %vm1525_vm10 = vcmp.gt.f32.partialorder %v1461_v36, 0.0 }
 0x114   : > { %6365 = vmatmul.mubr.msk.bf16.gmra.mrb[116].mxu0 %vm619_vm0, %v7955_v21  ;;  %v1590_v46 = vmul.f32 0.01, %v1462_v41  ;;  %vm1526_vm11 = vcmp.gt.f32.partialorder %v1462_v41, 0.0  ;;  %v8292_v50 = vsel %vm1524_vm9, %v1460_v61, %v1588_v39  ;;  %6381 = vmatmul.mubr.msk.bf16.gmra.mrb[116].mxu1 %vm619_vm0, %v7955_v21 }
 0x115   : > { %1226 = vmatprep.mubr.bf16.mxu0 %v11014_v32  ;;  %v1591_v51 = vmul.f32 0.01, %v1463_v44  ;;  %vm1527_vm12 = vcmp.gt.f32.partialorder %v1463_v44, 0.0  ;;  %v8297_v52 = vsel %vm1525_vm10, %v1461_v36, %v1589_v43  ;;  %1419 = vmatprep.mubr.bf16.mxu1 %v11014_v32 }
 0x116   : > { %v8300_v54 = vsel %vm1526_vm11, %v1462_v41, %v1590_v46 }
 0x117   : > { %v732_v57 = vpop.f32.mrb[12].mxu0  ;;  %v8302_v62 = vsel %vm1527_vm12, %v1463_v44, %v1591_v51 }
 0x118   : > { %v1464_v38 = vadd.f32 %v8230_v48, %v732_v57  ;;  %v734_v39 = vpop.f32.mrb[13].mxu0 }
 0x119   : > { %v1465_v59 = vadd.f32 %v8236_v49, %v734_v39  ;;  %v736_v36 = vpop.f32.mrb[14].mxu0 }
 0x11a   : > { %v1592_v43 = vmul.f32 0.01, %v1464_v38  ;;  %v1466_v63 = vadd.f32 %v8230_v48, %v736_v36  ;;  %v738_v41 = vpop.f32.mrb[15].mxu0  ;;  %vm1528_vm13 = vcmp.gt.f32.partialorder %v1464_v38, 0.0 }
 0x11b   : > { %v1593_v46 = vmul.f32 0.01, %v1465_v59  ;;  %v1467_v44 = vadd.f32 %v8236_v49, %v738_v41  ;;  %vm1529_vm14 = vcmp.gt.f32.partialorder %v1465_v59, 0.0 }
 0x11c   : > { %6366 = vmatmul.mubr.msk.bf16.gmra.mrb[120].mxu0 %vm619_vm0, %v7958_v22  ;;  %v1594_v51 = vmul.f32 0.01, %v1466_v63  ;;  %vm1530_vm15 = vcmp.gt.f32.partialorder %v1466_v63, 0.0  ;;  %v8314_v57 = vsel %vm1528_vm13, %v1464_v38, %v1592_v43  ;;  %6382 = vmatmul.mubr.msk.bf16.gmra.mrb[120].mxu1 %vm619_vm0, %v7958_v22 }
 0x11d   : > { %11133 = vst [vmem:[#allocation23_spill] sm:$0xff] %v8314_v57  ;;  %1236 = vmatprep.mubr.bf16.mxu0 %v11014_v32  ;;  %v1595_v39 = vmul.f32 0.01, %v1467_v44  ;;  %vm1531_vm1 = vcmp.gt.f32.partialorder %v1467_v44, 0.0  ;;  %v8319_v36 = vsel %vm1529_vm14, %v1465_v59, %v1593_v46  ;;  %1429 = vmatprep.mubr.bf16.mxu1 %v11014_v32 }
 0x11e   : > { %v8322_v41 = vsel %vm1530_vm15, %v1466_v63, %v1594_v51 }
 0x11f   : > { %v742_v61 = vpop.f32.mrb[16].mxu0  ;;  %v8324_v42 = vsel %vm1531_vm1, %v1467_v44, %v1595_v39 }
 0x120   : > { %v1468_v43 = vadd.f32 %v8230_v48, %v742_v61  ;;  %v744_v35 = vpop.f32.mrb[17].mxu0 }
 0x121   : > { %v1469_v31 = vadd.f32 %v8236_v49, %v744_v35  ;;  %v746_v59 = vpop.f32.mrb[18].mxu0  ;;  %v11135_v35 = vmov 0  }
 0x122   : > { %v1596_v46 = vmul.f32 0.01, %v1468_v43  ;;  %v1470_v32 = vadd.f32 %v8230_v48, %v746_v59  ;;  %v748_v63 = vpop.f32.mrb[19].mxu0  ;;  %vm1532_vm2 = vcmp.gt.f32.partialorder %v1468_v43, 0.0 }
 0x123   : > { %v1597_v51 = vmul.f32 0.01, %v1469_v31  ;;  %v1471_v44 = vadd.f32 %v8236_v49, %v748_v63  ;;  %vm1533_vm3 = vcmp.gt.f32.partialorder %v1469_v31, 0.0 }
 0x124   : > { %6367 = vmatmul.mubr.msk.bf16.gmra.mrb[124].mxu0 %vm619_vm0, %v7961_v23  ;;  %v1598_v61 = vmul.f32 0.01, %v1470_v32  ;;  %vm1534_vm4 = vcmp.gt.f32.partialorder %v1470_v32, 0.0  ;;  %v8336_v39 = vsel %vm1532_vm2, %v1468_v43, %v1596_v46  ;;  %6383 = vmatmul.mubr.msk.bf16.gmra.mrb[124].mxu1 %vm619_vm0, %v7961_v23 }
 0x125   : > { %11134 = vst [vmem:[#allocation24_spill] sm:$0xff] %v8336_v39  ;;  %2856 = vmatprep.mubr.bf16.mxu0 %v11135_v35  ;;  %v1599_v38 = vmul.f32 0.01, %v1471_v44  ;;  %v8341_v59 = vsel %vm1533_vm3, %v1469_v31, %v1597_v51  ;;  %1861 = vmatprep.mubr.bf16.mxu1 %v11135_v35  ;;  %vm1535_vm5 = vcmp.gt.f32.partialorder %v1471_v44, 0.0  ;;  %v7707_v31 = vld [vmem:[%s11009_s2 + $0x20] ss:$8 sps:$4 sm:$0xff]  }
 0x126   : > { %11136 = vst [vmem:[#allocation25_spill] sm:$0xff] %v8341_v59  ;;  %v8344_v63 = vsel %vm1534_vm4, %v1470_v32, %v1598_v61 }
 0x127   : > { %11137 = vst [vmem:[#allocation26_spill] sm:$0xff] %v8344_v63  ;;  %v752_v40 = vpop.f32.mrb[20].mxu0  ;;  %v8346_v30 = vsel %vm1535_vm5, %v1471_v44, %v1599_v38  ;;  %v7712_v38 = vld [vmem:[%s11009_s2 + $0x34] ss:$8 sps:$4 sm:$0xff]  }
 0x128   : > { %11138 = vst [vmem:[#allocation27_spill] sm:$0xff] %v8346_v30  ;;  %v1472_v46 = vadd.f32 %v8230_v48, %v752_v40  ;;  %v754_v29 = vpop.f32.mrb[21].mxu0 }
 0x129   : > { %v1473_v51 = vadd.f32 %v8236_v49, %v754_v29  ;;  %v756_v32 = vpop.f32.mrb[22].mxu0 }
 0x12a   : > { %v1600_v44 = vmul.f32 0.01, %v1472_v46  ;;  %v1474_v61 = vadd.f32 %v8230_v48, %v756_v32  ;;  %v758_v43 = vpop.f32.mrb[23].mxu0  ;;  %vm1536_vm6 = vcmp.gt.f32.partialorder %v1472_v46, 0.0 }
 0x12b   : > { %v1601_v40 = vmul.f32 0.01, %v1473_v51  ;;  %v1475_v47 = vadd.f32 %v8236_v49, %v758_v43  ;;  %vm1537_vm7 = vcmp.gt.f32.partialorder %v1473_v51, 0.0 }
 0x12c   : > { %6485 = vmatmul.mubr.msk.bf16.vlgmr.msra.gmra.mrb[64].mxu0 %vm619_vm0, %v7894_v4  ;;  %v1602_v29 = vmul.f32 0.01, %v1474_v61  ;;  %vm1538_vm8 = vcmp.gt.f32.partialorder %v1474_v61, 0.0  ;;  %v8370_v32 = vsel %vm1536_vm6, %v1472_v46, %v1600_v44  ;;  %6404 = vmatmul.mubr.msk.bf16.vlgmr.msra.gmra.mrb[0].mxu1 %vm619_vm0, %v7905_v6  ;;  %v7710_v4 = vld [vmem:[%s11009_s2 + $0x30] ss:$8 sps:$4 sm:$0xff]  }
 0x12d   : > { %2866 = vmatprep.mubr.bf16.mxu0 %v11135_v35  ;;  %v1603_v43 = vmul.f32 0.01, %v1475_v47  ;;  %v8375_v39 = vsel %vm1537_vm7, %v1473_v51, %v1601_v40  ;;  %2177 = vmatpush1.bf16.msra.mxu1 %v7707_v31  ;;  %vm1539_vm9 = vcmp.gt.f32.partialorder %v1475_v47, 0.0  ;;  %v7716_v44 = vld [vmem:[%s11009_s2 + $0x70] ss:$8 sps:$4 sm:$0xff]  }
 0x12e   : > { %1871 = vmatprep.mubr.bf16.mxu1 %v11135_v35  ;;  %v8381_v63 = vsel %vm1538_vm8, %v1474_v61, %v1602_v29  ;;  %2178 = vmatprep.subr.bf16.mxu1 %v7712_v38  ;;  %v7721_v31 = vld [vmem:[%s11009_s2 + $0x84] ss:$8 sps:$4 sm:$0xff]  }
 0x12f   : > { %v762_v46 = vpop.f32.mrb[24].mxu0  ;;  %3172 = vmatpush1.bf16.msra.mxu0 %v7713_v28  ;;  %v8389_v51 = vsel %vm1539_vm9, %v1475_v47, %v1603_v43 }
 0x130   : > { %v1476_v59 = vadd.f32 %v8230_v48, %v762_v46  ;;  %v764_v61 = vpop.f32.mrb[25].mxu0  ;;  %3173 = vmatprep.subr.bf16.mxu0 %v7718_v45 }
 0x131   : > { %v1477_v38 = vadd.f32 %v8236_v49, %v764_v61  ;;  %v766_v29 = vpop.f32.mrb[26].mxu0  ;;  %2179 = vmatpush1.bf16.msra.mxu1 %v7710_v4 }
 0x132   : > { %v1604_v30 = vmul.f32 0.01, %v1476_v59  ;;  %v1478_v3 = vadd.f32 %v8230_v48, %v766_v29  ;;  %v768_v57 = vpop.f32.mrb[27].mxu0  ;;  %vm1540_vm10 = vcmp.gt.f32.partialorder %v1476_v59, 0.0  ;;  %3818 = vmatprep.subr.bf16.mxu1 %v7721_v31 }
 0x133   : > { %v1605_v47 = vmul.f32 0.01, %v1477_v38  ;;  %v1479_v43 = vadd.f32 %v8236_v49, %v768_v57  ;;  %3174 = vmatpush1.bf16.msra.mxu0 %v7716_v44  ;;  %vm1541_vm11 = vcmp.gt.f32.partialorder %v1477_v38, 0.0 }
 0x134   : > { %6486 = vmatmul.mubr.msk.bf16.gmra.mrb[68].mxu0 %vm619_vm0, %v7897_v5  ;;  %v1606_v45 = vmul.f32 0.01, %v1478_v3  ;;  %vm1542_vm12 = vcmp.gt.f32.partialorder %v1478_v3, 0.0  ;;  %v8401_v46 = vsel %vm1540_vm10, %v1476_v59, %v1604_v30  ;;  %6405 = vmatmul.mubr.msk.bf16.gmra.mrb[4].mxu1 %vm619_vm0, %v7908_v7 }
 0x135   : > { %11139 = vst [vmem:[#allocation28_spill] sm:$0xff] %v8401_v46  ;;  %2876 = vmatprep.mubr.bf16.mxu0 %v11135_v35  ;;  %v1607_v4 = vmul.f32 0.01, %v1479_v43  ;;  %vm1543_vm13 = vcmp.gt.f32.partialorder %v1479_v43, 0.0  ;;  %v8406_v61 = vsel %vm1541_vm11, %v1477_v38, %v1605_v47  ;;  %1881 = vmatprep.mubr.bf16.mxu1 %v11135_v35 }
 0x136   : > { %11140 = vst [vmem:[#allocation29_spill] sm:$0xff] %v8406_v61  ;;  %v8409_v57 = vsel %vm1542_vm12, %v1478_v3, %v1606_v45 }
 0x137   : > { %11141 = vst [vmem:[#allocation30_spill] sm:$0xff] %v8409_v57  ;;  %v772_v44 = vpop.f32.mrb[28].mxu0  ;;  %v8411_v31 = vsel %vm1543_vm13, %v1479_v43, %v1607_v4 }
 0x138   : > { %v1480_v59 = vadd.f32 %v8230_v48, %v772_v44  ;;  %v774_v29 = vpop.f32.mrb[29].mxu0 }
 0x139   : > { %v1481_v28 = vadd.f32 %v8236_v49, %v774_v29  ;;  %v776_v38 = vpop.f32.mrb[30].mxu0 }
 0x13a   : > { %v1608_v47 = vmul.f32 0.01, %v1480_v59  ;;  %v1482_v5 = vadd.f32 %v8230_v48, %v776_v38  ;;  %v778_v3 = vpop.f32.mrb[31].mxu0  ;;  %vm1544_vm14 = vcmp.gt.f32.partialorder %v1480_v59, 0.0 }
 0x13b   : > { %v1609_v45 = vmul.f32 0.01, %v1481_v28  ;;  %v1483_v43 = vadd.f32 %v8236_v49, %v778_v3  ;;  %vm1545_vm15 = vcmp.gt.f32.partialorder %v1481_v28, 0.0 }
 0x13c   : > { %6487 = vmatmul.mubr.msk.bf16.gmra.mrb[72].mxu0 %vm619_vm0, %v7905_v6  ;;  %v1610_v4 = vmul.f32 0.01, %v1482_v5  ;;  %vm1546_vm1 = vcmp.gt.f32.partialorder %v1482_v5, 0.0  ;;  %v8423_v44 = vsel %vm1544_vm14, %v1480_v59, %v1608_v47  ;;  %6406 = vmatmul.mubr.msk.bf16.gmra.mrb[8].mxu1 %vm619_vm0, %v7911_v8 }
 0x13d   : > { %11142 = vst [vmem:[#allocation31_spill] sm:$0xff] %v8423_v44  ;;  %2886 = vmatprep.mubr.bf16.mxu0 %v11135_v35  ;;  %v1611_v29 = vmul.f32 0.01, %v1483_v43  ;;  %vm1547_vm2 = vcmp.gt.f32.partialorder %v1483_v43, 0.0  ;;  %v8428_v38 = vsel %vm1545_vm15, %v1481_v28, %v1609_v45  ;;  %1891 = vmatprep.mubr.bf16.mxu1 %v11135_v35 }
 0x13e   : > { %11143 = vst [vmem:[#allocation32_spill] sm:$0xff] %v8428_v38  ;;  %v8431_v3 = vsel %vm1546_vm1, %v1482_v5, %v1610_v4 }
 0x13f   : > { %11144 = vst [vmem:[#allocation33_spill] sm:$0xff] %v8431_v3  ;;  %v782_v30 = vpop.f32.mrb[32].mxu0  ;;  %v8433_v40 = vsel %vm1547_vm2, %v1483_v43, %v1611_v29 }
 0x140   : > { %v1484_v47 = vadd.f32 %v8230_v48, %v782_v30  ;;  %v784_v6 = vpop.f32.mrb[33].mxu0 }
 0x141   : > { %v1485_v57 = vadd.f32 %v8236_v49, %v784_v6  ;;  %v786_v28 = vpop.f32.mrb[34].mxu0 }
 0x142   : > { %v1612_v45 = vmul.f32 0.01, %v1484_v47  ;;  %v1486_v61 = vadd.f32 %v8230_v48, %v786_v28  ;;  %v788_v5 = vpop.f32.mrb[35].mxu0  ;;  %vm1548_vm3 = vcmp.gt.f32.partialorder %v1484_v47, 0.0 }
 0x143   : > { %v1613_v4 = vmul.f32 0.01, %v1485_v57  ;;  %v1487_v43 = vadd.f32 %v8236_v49, %v788_v5  ;;  %vm1549_vm4 = vcmp.gt.f32.partialorder %v1485_v57, 0.0 }
 0x144   : > { %6488 = vmatmul.mubr.msk.bf16.gmra.mrb[76].mxu0 %vm619_vm0, %v7908_v7  ;;  %v1614_v30 = vmul.f32 0.01, %v1486_v61  ;;  %vm1550_vm5 = vcmp.gt.f32.partialorder %v1486_v61, 0.0  ;;  %v8445_v29 = vsel %vm1548_vm3, %v1484_v47, %v1612_v45  ;;  %6407 = vmatmul.mubr.msk.bf16.gmra.mrb[12].mxu1 %vm619_vm0, %v7919_v9 }
 0x145   : > { %11145 = vst [vmem:[#allocation34_spill] sm:$0xff] %v8445_v29  ;;  %2896 = vmatprep.mubr.bf16.mxu0 %v11135_v35  ;;  %v1615_v6 = vmul.f32 0.01, %v1487_v43  ;;  %vm1551_vm6 = vcmp.gt.f32.partialorder %v1487_v43, 0.0  ;;  %v8450_v28 = vsel %vm1549_vm4, %v1485_v57, %v1613_v4  ;;  %1901 = vmatprep.mubr.bf16.mxu1 %v11135_v35 }
 0x146   : > { %11146 = vst [vmem:[#allocation35_spill] sm:$0xff] %v8450_v28  ;;  %v8453_v5 = vsel %vm1550_vm5, %v1486_v61, %v1614_v30 }
 0x147   : > { %11147 = vst [vmem:[#allocation36_spill] sm:$0xff] %v8453_v5  ;;  %v792_v59 = vpop.f32.mrb[36].mxu0  ;;  %v8455_v46 = vsel %vm1551_vm6, %v1487_v43, %v1615_v6 }
 0x148   : > { %v1488_v45 = vadd.f32 %v8230_v48, %v792_v59  ;;  %v794_v7 = vpop.f32.mrb[37].mxu0 }
 0x149   : > { %v1489_v3 = vadd.f32 %v8236_v49, %v794_v7  ;;  %v796_v57 = vpop.f32.mrb[38].mxu0 }
 0x14a   : > { %v1616_v4 = vmul.f32 0.01, %v1488_v45  ;;  %v1490_v38 = vadd.f32 %v8230_v48, %v796_v57  ;;  %v798_v61 = vpop.f32.mrb[39].mxu0  ;;  %vm1552_vm7 = vcmp.gt.f32.partialorder %v1488_v45, 0.0 }
 0x14b   : > { %v1617_v30 = vmul.f32 0.01, %v1489_v3  ;;  %v1491_v43 = vadd.f32 %v8236_v49, %v798_v61  ;;  %vm1553_vm8 = vcmp.gt.f32.partialorder %v1489_v3, 0.0 }
 0x14c   : > { %6489 = vmatmul.mubr.msk.bf16.gmra.mrb[80].mxu0 %vm619_vm0, %v7911_v8  ;;  %v1618_v59 = vmul.f32 0.01, %v1490_v38  ;;  %vm1554_vm9 = vcmp.gt.f32.partialorder %v1490_v38, 0.0  ;;  %v8467_v6 = vsel %vm1552_vm7, %v1488_v45, %v1616_v4  ;;  %6408 = vmatmul.mubr.msk.bf16.gmra.mrb[16].mxu1 %vm619_vm0, %v7922_v10 }
 0x14d   : > { %11148 = vst [vmem:[#allocation37_spill] sm:$0xff] %v8467_v6  ;;  %2906 = vmatprep.mubr.bf16.mxu0 %v11135_v35  ;;  %v1619_v7 = vmul.f32 0.01, %v1491_v43  ;;  %vm1555_vm10 = vcmp.gt.f32.partialorder %v1491_v43, 0.0  ;;  %v8472_v57 = vsel %vm1553_vm8, %v1489_v3, %v1617_v30  ;;  %1911 = vmatprep.mubr.bf16.mxu1 %v11135_v35 }
 0x14e   : > { %11149 = vst [vmem:[#allocation38_spill] sm:$0xff] %v8472_v57  ;;  %v8475_v61 = vsel %vm1554_vm9, %v1490_v38, %v1618_v59 }
 0x14f   : > { %11150 = vst [vmem:[#allocation39_spill] sm:$0xff] %v8475_v61  ;;  %v802_v47 = vpop.f32.mrb[40].mxu0  ;;  %v8477_v44 = vsel %vm1555_vm10, %v1491_v43, %v1619_v7 }
 0x150   : > { %v1492_v4 = vadd.f32 %v8230_v48, %v802_v47  ;;  %v804_v8 = vpop.f32.mrb[41].mxu0 }
 0x151   : > { %v1493_v5 = vadd.f32 %v8236_v49, %v804_v8  ;;  %v806_v3 = vpop.f32.mrb[42].mxu0 }
 0x152   : > { %v1620_v30 = vmul.f32 0.01, %v1492_v4  ;;  %v1494_v28 = vadd.f32 %v8230_v48, %v806_v3  ;;  %v808_v38 = vpop.f32.mrb[43].mxu0  ;;  %vm1556_vm11 = vcmp.gt.f32.partialorder %v1492_v4, 0.0 }
 0x153   : > { %v1621_v59 = vmul.f32 0.01, %v1493_v5  ;;  %v1495_v43 = vadd.f32 %v8236_v49, %v808_v38  ;;  %vm1557_vm12 = vcmp.gt.f32.partialorder %v1493_v5, 0.0 }
 0x154   : > { %6490 = vmatmul.mubr.msk.bf16.gmra.mrb[84].mxu0 %vm619_vm0, %v7919_v9  ;;  %v1622_v47 = vmul.f32 0.01, %v1494_v28  ;;  %vm1558_vm13 = vcmp.gt.f32.partialorder %v1494_v28, 0.0  ;;  %v8489_v7 = vsel %vm1556_vm11, %v1492_v4, %v1620_v30  ;;  %6409 = vmatmul.mubr.msk.bf16.gmra.mrb[20].mxu1 %vm619_vm0, %v7925_v11 }
 0x155   : > { %11151 = vst [vmem:[#allocation40_spill] sm:$0xff] %v8489_v7  ;;  %2916 = vmatprep.mubr.bf16.mxu0 %v11135_v35  ;;  %v1623_v8 = vmul.f32 0.01, %v1495_v43  ;;  %vm1559_vm14 = vcmp.gt.f32.partialorder %v1495_v43, 0.0  ;;  %v8494_v3 = vsel %vm1557_vm12, %v1493_v5, %v1621_v59  ;;  %1921 = vmatprep.mubr.bf16.mxu1 %v11135_v35 }
 0x156   : > { %11152 = vst [vmem:[#allocation41_spill] sm:$0xff] %v8494_v3  ;;  %v8497_v38 = vsel %vm1558_vm13, %v1494_v28, %v1622_v47 }
 0x157   : > { %11153 = vst [vmem:[#allocation42_spill] sm:$0xff] %v8497_v38  ;;  %v812_v45 = vpop.f32.mrb[44].mxu0  ;;  %v8499_v29 = vsel %vm1559_vm14, %v1495_v43, %v1623_v8 }
 0x158   : > { %11154 = vst [vmem:[#allocation43_spill] sm:$0xff] %v8499_v29  ;;  %v1496_v30 = vadd.f32 %v8230_v48, %v812_v45  ;;  %v814_v9 = vpop.f32.mrb[45].mxu0 }
 0x159   : > { %v1497_v61 = vadd.f32 %v8236_v49, %v814_v9  ;;  %v816_v5 = vpop.f32.mrb[46].mxu0 }
 0x15a   : > { %v1624_v59 = vmul.f32 0.01, %v1496_v30  ;;  %v1498_v57 = vadd.f32 %v8230_v48, %v816_v5  ;;  %v818_v28 = vpop.f32.mrb[47].mxu0  ;;  %vm1560_vm15 = vcmp.gt.f32.partialorder %v1496_v30, 0.0 }
 0x15b   : > { %v1625_v47 = vmul.f32 0.01, %v1497_v61  ;;  %v1499_v43 = vadd.f32 %v8236_v49, %v818_v28  ;;  %vm1561_vm1 = vcmp.gt.f32.partialorder %v1497_v61, 0.0 }
 0x15c   : > { %6491 = vmatmul.mubr.msk.bf16.gmra.mrb[88].mxu0 %vm619_vm0, %v7922_v10  ;;  %v1626_v45 = vmul.f32 0.01, %v1498_v57  ;;  %vm1562_vm2 = vcmp.gt.f32.partialorder %v1498_v57, 0.0  ;;  %v8511_v8 = vsel %vm1560_vm15, %v1496_v30, %v1624_v59  ;;  %6410 = vmatmul.mubr.msk.bf16.gmra.mrb[24].mxu1 %vm619_vm0, %v7928_v12 }
 0x15d   : > { %11155 = vst [vmem:[#allocation44_spill] sm:$0xff] %v8511_v8  ;;  %2926 = vmatprep.mubr.bf16.mxu0 %v11135_v35  ;;  %v1627_v9 = vmul.f32 0.01, %v1499_v43  ;;  %vm1563_vm3 = vcmp.gt.f32.partialorder %v1499_v43, 0.0  ;;  %v8516_v5 = vsel %vm1561_vm1, %v1497_v61, %v1625_v47  ;;  %1931 = vmatprep.mubr.bf16.mxu1 %v11135_v35 }
 0x15e   : > { %11156 = vst [vmem:[#allocation45_spill] sm:$0xff] %v8516_v5  ;;  %v8519_v28 = vsel %vm1562_vm2, %v1498_v57, %v1626_v45 }
 0x15f   : > { %11157 = vst [vmem:[#allocation46_spill] sm:$0xff] %v8519_v28  ;;  %v822_v4 = vpop.f32.mrb[48].mxu0  ;;  %v8521_v6 = vsel %vm1563_vm3, %v1499_v43, %v1627_v9 }
 0x160   : > { %11158 = vst [vmem:[#allocation47_spill] sm:$0xff] %v8521_v6  ;;  %v1500_v59 = vadd.f32 %v8230_v48, %v822_v4  ;;  %v824_v7 = vpop.f32.mrb[49].mxu0 }
 0x161   : > { %v1501_v3 = vadd.f32 %v8236_v49, %v824_v7  ;;  %v826_v61 = vpop.f32.mrb[50].mxu0 }
 0x162   : > { %v1628_v47 = vmul.f32 0.01, %v1500_v59  ;;  %v1502_v29 = vadd.f32 %v8230_v48, %v826_v61  ;;  %v828_v57 = vpop.f32.mrb[51].mxu0  ;;  %vm1564_vm4 = vcmp.gt.f32.partialorder %v1500_v59, 0.0 }
 0x163   : > { %v1629_v45 = vmul.f32 0.01, %v1501_v3  ;;  %v1503_v43 = vadd.f32 %v8236_v49, %v828_v57  ;;  %vm1565_vm5 = vcmp.gt.f32.partialorder %v1501_v3, 0.0 }
 0x164   : > { %6492 = vmatmul.mubr.msk.bf16.gmra.mrb[92].mxu0 %vm619_vm0, %v7925_v11  ;;  %v1630_v4 = vmul.f32 0.01, %v1502_v29  ;;  %vm1566_vm6 = vcmp.gt.f32.partialorder %v1502_v29, 0.0  ;;  %v8533_v9 = vsel %vm1564_vm4, %v1500_v59, %v1628_v47  ;;  %6411 = vmatmul.mubr.msk.bf16.gmra.mrb[28].mxu1 %vm619_vm0, %v7931_v13 }
 0x165   : > { %11159 = vst [vmem:[#allocation48_spill] sm:$0xff] %v8533_v9  ;;  %2936 = vmatprep.mubr.bf16.mxu0 %v11135_v35  ;;  %v1631_v7 = vmul.f32 0.01, %v1503_v43  ;;  %vm1567_vm7 = vcmp.gt.f32.partialorder %v1503_v43, 0.0  ;;  %v8538_v61 = vsel %vm1565_vm5, %v1501_v3, %v1629_v45  ;;  %1941 = vmatprep.mubr.bf16.mxu1 %v11135_v35 }
 0x166   : > { %11160 = vst [vmem:[#allocation49_spill] sm:$0xff] %v8538_v61  ;;  %v8541_v57 = vsel %vm1566_vm6, %v1502_v29, %v1630_v4 }
 0x167   : > { %11161 = vst [vmem:[#allocation50_spill] sm:$0xff] %v8541_v57  ;;  %v832_v30 = vpop.f32.mrb[52].mxu0  ;;  %v8543_v38 = vsel %vm1567_vm7, %v1503_v43, %v1631_v7 }
 0x168   : > { %11162 = vst [vmem:[#allocation51_spill] sm:$0xff] %v8543_v38  ;;  %v1504_v47 = vadd.f32 %v8230_v48, %v832_v30  ;;  %v834_v8 = vpop.f32.mrb[53].mxu0 }
 0x169   : > { %v1505_v5 = vadd.f32 %v8236_v49, %v834_v8  ;;  %v836_v3 = vpop.f32.mrb[54].mxu0 }
 0x16a   : > { %v1632_v45 = vmul.f32 0.01, %v1504_v47  ;;  %v1506_v6 = vadd.f32 %v8230_v48, %v836_v3  ;;  %v838_v29 = vpop.f32.mrb[55].mxu0  ;;  %vm1568_vm8 = vcmp.gt.f32.partialorder %v1504_v47, 0.0 }
 0x16b   : > { %v1633_v4 = vmul.f32 0.01, %v1505_v5  ;;  %v1507_v43 = vadd.f32 %v8236_v49, %v838_v29  ;;  %vm1569_vm9 = vcmp.gt.f32.partialorder %v1505_v5, 0.0 }
 0x16c   : > { %6493 = vmatmul.mubr.msk.bf16.gmra.mrb[96].mxu0 %vm619_vm0, %v7928_v12  ;;  %v1634_v30 = vmul.f32 0.01, %v1506_v6  ;;  %vm1570_vm10 = vcmp.gt.f32.partialorder %v1506_v6, 0.0  ;;  %v8555_v7 = vsel %vm1568_vm8, %v1504_v47, %v1632_v45  ;;  %6412 = vmatmul.mubr.msk.bf16.gmra.mrb[32].mxu1 %vm619_vm0, %v7934_v14 }
 0x16d   : > { %11163 = vst [vmem:[#allocation52_spill] sm:$0xff] %v8555_v7  ;;  %2946 = vmatprep.mubr.bf16.mxu0 %v11135_v35  ;;  %v1635_v8 = vmul.f32 0.01, %v1507_v43  ;;  %v8560_v3 = vsel %vm1569_vm9, %v1505_v5, %v1633_v4  ;;  %1951 = vmatprep.mubr.bf16.mxu1 %v11135_v35  ;;  %vm1571_vm11 = vcmp.gt.f32.partialorder %v1507_v43, 0.0 }
 0x16e   : > { %11164 = vst [vmem:[#allocation53_spill] sm:$0xff] %v8560_v3  ;;  %v8563_v29 = vsel %vm1570_vm10, %v1506_v6, %v1634_v30 }
 0x16f   : > { %11165 = vst [vmem:[#allocation54_spill] sm:$0xff] %v8563_v29  ;;  %v842_v59 = vpop.f32.mrb[56].mxu0  ;;  %v8565_v28 = vsel %vm1571_vm11, %v1507_v43, %v1635_v8 }
 0x170   : > { %11166 = vst [vmem:[#allocation55_spill] sm:$0xff] %v8565_v28  ;;  %v1508_v45 = vadd.f32 %v8230_v48, %v842_v59  ;;  %v844_v9 = vpop.f32.mrb[57].mxu0 }
 0x171   : > { %v1509_v5 = vadd.f32 %v8236_v49, %v844_v9  ;;  %v846_v4 = vpop.f32.mrb[58].mxu0 }
 0x172   : > { %v1636_v61 = vmul.f32 0.01, %v1508_v45  ;;  %v1510_v38 = vadd.f32 %v8230_v48, %v846_v4  ;;  %v848_v6 = vpop.f32.mrb[59].mxu0  ;;  %vm1572_vm12 = vcmp.gt.f32.partialorder %v1508_v45, 0.0 }
 0x173   : > { %v1637_v30 = vmul.f32 0.01, %v1509_v5  ;;  %v1511_v43 = vadd.f32 %v8236_v49, %v848_v6  ;;  %vm1573_vm13 = vcmp.gt.f32.partialorder %v1509_v5, 0.0 }
 0x174   : > { %6494 = vmatmul.mubr.msk.bf16.gmra.mrb[100].mxu0 %vm619_vm0, %v7931_v13  ;;  %v1638_v59 = vmul.f32 0.01, %v1510_v38  ;;  %vm1574_vm14 = vcmp.gt.f32.partialorder %v1510_v38, 0.0  ;;  %v8577_v8 = vsel %vm1572_vm12, %v1508_v45, %v1636_v61  ;;  %6413 = vmatmul.mubr.msk.bf16.gmra.mrb[36].mxu1 %vm619_vm0, %v7937_v15 }
 0x175   : > { %2956 = vmatprep.mubr.bf16.mxu0 %v11135_v35  ;;  %v1639_v9 = vmul.f32 0.01, %v1511_v43  ;;  %vm1575_vm15 = vcmp.gt.f32.partialorder %v1511_v43, 0.0  ;;  %v8582_v4 = vsel %vm1573_vm13, %v1509_v5, %v1637_v30  ;;  %1961 = vmatprep.mubr.bf16.mxu1 %v11135_v35 }
 0x176   : > { %v8585_v6 = vsel %vm1574_vm14, %v1510_v38, %v1638_v59 }
 0x177   : > { %v852_v47 = vpop.f32.mrb[60].mxu0  ;;  %v8587_v57 = vsel %vm1575_vm15, %v1511_v43, %v1639_v9 }
 0x178   : > { %v1512_v45 = vadd.f32 %v8230_v48, %v852_v47  ;;  %v854_v7 = vpop.f32.mrb[61].mxu0 }
 0x179   : > { %v1513_v3 = vadd.f32 %v8236_v49, %v854_v7  ;;  %v856_v5 = vpop.f32.mrb[62].mxu0 }
 0x17a   : > { %v1640_v30 = vmul.f32 0.01, %v1512_v45  ;;  %v1514_v28 = vadd.f32 %v8230_v48, %v856_v5  ;;  %v858_v38 = vpop.f32.mrb[63].mxu0  ;;  %vm1576_vm1 = vcmp.gt.f32.partialorder %v1512_v45, 0.0 }
 0x17b   : > { %v1641_v59 = vmul.f32 0.01, %v1513_v3  ;;  %v1515_v43 = vadd.f32 %v8236_v49, %v858_v38  ;;  %vm1577_vm2 = vcmp.gt.f32.partialorder %v1513_v3, 0.0 }
 0x17c   : > { %6495 = vmatmul.mubr.msk.bf16.gmra.mrb[104].mxu0 %vm619_vm0, %v7934_v14  ;;  %v1642_v47 = vmul.f32 0.01, %v1514_v28  ;;  %vm1578_vm3 = vcmp.gt.f32.partialorder %v1514_v28, 0.0  ;;  %v8599_v9 = vsel %vm1576_vm1, %v1512_v45, %v1640_v30  ;;  %6414 = vmatmul.mubr.msk.bf16.gmra.mrb[40].mxu1 %vm619_vm0, %v7940_v16  ;;  %v7724_v30 = vld [vmem:[%s11009_s2 + $0x94] ss:$8 sps:$4 sm:$0xff]  }
 0x17d   : > { %2966 = vmatprep.mubr.bf16.mxu0 %v11135_v35  ;;  %v1643_v7 = vmul.f32 0.01, %v1515_v43  ;;  %vm1579_vm4 = vcmp.gt.f32.partialorder %v1515_v43, 0.0  ;;  %v8604_v48 = vsel %vm1577_vm2, %v1513_v3, %v1641_v59  ;;  %1971 = vmatprep.mubr.bf16.mxu1 %v11135_v35  ;;  %v7719_v3 = vld [vmem:[%s11009_s2 + $0x80] ss:$8 sps:$4 sm:$0xff]  }
 0x17e   : > { %v8607_v49 = vsel %vm1578_vm3, %v1514_v28, %v1642_v47  ;;  %v7725_v28 = vld [vmem:[%s11010_s3 + $0x40] sm:$0xff]   ;;  %v7722_v47 = vld [vmem:[%s11009_s2 + $0x90] ss:$8 sps:$4 sm:$0xff]  }
 0x17f   : > { %v8609_v5 = vsel %vm1579_vm4, %v1515_v43, %v1643_v7  ;;  %6838 = vmatprep.subr.bf16.mxu0 %v7725_v28  ;;  %v7726_v59 = vld [vmem:[%s11010_s3] sm:$0xff]   ;;  %v7727_v43 = vld [vmem:[%s11010_s3 + $0x48] sm:$0xff]  }
 0x180   : > { %v7728_v7 = vld [vmem:[%s11010_s3 + $0x8] sm:$0xff]  }
 0x181   : > { %v7743_v28 = vld [vmem:[%s11009_s2 + $0xa4] ss:$8 sps:$4 sm:$0xff]  }
 0x184   : > { %6496 = vmatmul.mubr.msk.bf16.gmra.mrb[108].mxu0 %vm619_vm0, %v7937_v15  ;;  %6415 = vmatmul.mubr.msk.bf16.gmra.mrb[44].mxu1 %vm619_vm0, %v7943_v17 }
 0x185   : > { %2976 = vmatprep.mubr.bf16.mxu0 %v11135_v35  ;;  %1981 = vmatprep.mubr.bf16.mxu1 %v11135_v35 }
 0x18c   : > { %6497 = vmatmul.mubr.msk.bf16.gmra.mrb[112].mxu0 %vm619_vm0, %v7940_v16  ;;  %6416 = vmatmul.mubr.msk.bf16.gmra.mrb[48].mxu1 %vm619_vm0, %v7946_v18 }
 0x18d   : > { %2986 = vmatprep.mubr.bf16.mxu0 %v11135_v35  ;;  %1991 = vmatprep.mubr.bf16.mxu1 %v11135_v35 }
 0x194   : > { %6498 = vmatmul.mubr.msk.bf16.gmra.mrb[116].mxu0 %vm619_vm0, %v7943_v17  ;;  %6417 = vmatmul.mubr.msk.bf16.gmra.mrb[52].mxu1 %vm619_vm0, %v7949_v19 }
 0x195   : > { %2996 = vmatprep.mubr.bf16.mxu0 %v11135_v35  ;;  %2001 = vmatprep.mubr.bf16.mxu1 %v11135_v35 }
 0x19c   : > { %6499 = vmatmul.mubr.msk.bf16.gmra.mrb[120].mxu0 %vm619_vm0, %v7946_v18  ;;  %6418 = vmatmul.mubr.msk.bf16.gmra.mrb[56].mxu1 %vm619_vm0, %v7952_v20 }
 0x19d   : > { %3006 = vmatprep.mubr.bf16.mxu0 %v11135_v35  ;;  %2011 = vmatprep.mubr.bf16.mxu1 %v11135_v35 }
 0x1a4   : > { %6500 = vmatmul.mubr.msk.bf16.gmra.mrb[124].mxu0 %vm619_vm0, %v7949_v19  ;;  %6419 = vmatmul.mubr.msk.bf16.gmra.mrb[60].mxu1 %vm619_vm0, %v7955_v21 }
 0x1a5   : > { %3203 = vmatprep.mubr.bf16.mxu0 %v11135_v35  ;;  %2208 = vmatprep.mubr.bf16.mxu1 %v11135_v35 }
 0x1ac   : > { %6525 = vmatmul.mubr.msk.bf16.vlgmr.msra.gmra.mrb[64].mxu0 %vm619_vm0, %v7928_v12  ;;  %6444 = vmatmul.mubr.msk.bf16.vlgmr.msra.gmra.mrb[0].mxu1 %vm619_vm0, %v7922_v10 }
 0x1ad   : > { %3213 = vmatprep.mubr.bf16.mxu0 %v11135_v35  ;;  %3819 = vmatpush1.bf16.msra.mxu1 %v7719_v3  ;;  %v7729_v3 = vld [vmem:[%s11010_s3 + $0x50] sm:$0xff]  }
 0x1ae   : > { %2218 = vmatprep.mubr.bf16.mxu1 %v11135_v35  ;;  %3820 = vmatprep.subr.bf16.mxu1 %v7724_v30  ;;  %v7730_v30 = vld [vmem:[%s11010_s3 + $0x10] sm:$0xff]  }
 0x1af   : > { %6839 = vmatpush3.bf16.msra.mxu0 %v7726_v59  ;;  %v7731_v59 = vld [vmem:[%s11010_s3 + $0x58] sm:$0xff]  }
 0x1b0   : > { %6840 = vmatprep.subr.bf16.mxu0 %v7727_v43  ;;  %v7732_v43 = vld [vmem:[%s11010_s3 + $0x18] sm:$0xff]  }
 0x1b1   : > { %3821 = vmatpush1.bf16.msra.mxu1 %v7722_v47  ;;  %v7733_v47 = vld [vmem:[%s11010_s3 + $0x60] sm:$0xff]  }
 0x1b2   : > { %4165 = vmatprep.subr.bf16.mxu1 %v7743_v28  ;;  %v7735_v28 = vld [vmem:[%s11010_s3 + $0x68] sm:$0xff]  }
 0x1b3   : > { %6841 = vmatpush3.bf16.msra.mxu0 %v7728_v7  ;;  %v7734_v7 = vld [vmem:[%s11010_s3 + $0x20] sm:$0xff]  }
 0x1b4   : > { %6526 = vmatmul.mubr.msk.bf16.gmra.mrb[68].mxu0 %vm619_vm0, %v7931_v13  ;;  %6842 = vmatprep.subr.bf16.mxu0 %v7729_v3  ;;  %v7736_v3 = vld [vmem:[%s11010_s3 + $0x28] sm:$0xff]  }
 0x1b5   : > { %6445 = vmatmul.mubr.msk.bf16.gmra.mrb[4].mxu1 %vm619_vm0, %v7925_v11  ;;  %3223 = vmatprep.mubr.bf16.mxu0 %v11135_v35 }
 0x1b6   : > { %2228 = vmatprep.mubr.bf16.mxu1 %v11135_v35 }
 0x1b7   : > { %6843 = vmatpush3.bf16.msra.mxu0 %v7730_v30  ;;  %v7737_v30 = vld [vmem:[%s11010_s3 + $0x70] sm:$0xff]  }
 0x1b8   : > { %6844 = vmatprep.subr.bf16.mxu0 %v7731_v59  ;;  %v7738_v59 = vld [vmem:[%s11010_s3 + $0x30] sm:$0xff]  }
 0x1bb   : > { %6845 = vmatpush3.bf16.msra.mxu0 %v7732_v43  ;;  %v7739_v43 = vld [vmem:[%s11010_s3 + $0x78] sm:$0xff]  }
 0x1bc   : > { %6527 = vmatmul.mubr.msk.bf16.gmra.mrb[72].mxu0 %vm619_vm0, %v7934_v14  ;;  %6846 = vmatprep.subr.bf16.mxu0 %v7733_v47  ;;  %v7740_v47 = vld [vmem:[%s11010_s3 + $0x38] sm:$0xff]  }
 0x1bd   : > { %6446 = vmatmul.mubr.msk.bf16.gmra.mrb[8].mxu1 %vm619_vm0, %v7928_v12  ;;  %3233 = vmatprep.mubr.bf16.mxu0 %v11135_v35 }
 0x1be   : > { %2238 = vmatprep.mubr.bf16.mxu1 %v11135_v35 }
 0x1bf   : > { %6847 = vmatpush3.bf16.msra.mxu0 %v7734_v7  ;;  %v7747_v7 = vld [vmem:[%s11010_s3 + $0xc0] sm:$0xff]  }
 0x1c0   : > { %6848 = vmatprep.subr.bf16.mxu0 %v7735_v28  ;;  %v11167_v28 = vpack.c.bf16 %v8260_v37, %v8253_v33  ;;  %v7749_v33 = vld [vmem:[%s11010_s3 + $0xc8] sm:$0xff]   ;;  %v11169_v37 = vpack.c.bf16 %v8280_v58, %v8275_v55  ;;  %v11170_v55 = vpack.c.bf16 %v8278_v56, %v8270_v53  ;;  %v7753_v58 = vld [vmem:[%s11010_s3 + $0xd8] sm:$0xff]   ;;  %v7755_v56 = vld [vmem:[%s11010_s3 + $0xe0] sm:$0xff]  }
 0x1c1   : > { %v7754_v53 = vld [vmem:[%s11010_s3 + $0x98] sm:$0xff]  }
 0x1c3   : > { %6849 = vmatpush3.bf16.msra.mxu0 %v7736_v3  ;;  %v7741_v3 = vld [vmem:[%s11009_s2 + $0xa0] ss:$8 sps:$4 sm:$0xff]  }
 0x1c4   : > { %6528 = vmatmul.mubr.msk.bf16.gmra.mrb[76].mxu0 %vm619_vm0, %v7937_v15  ;;  %6850 = vmatprep.subr.bf16.mxu0 %v7737_v30  ;;  %v7746_v30 = vld [vmem:[%s11009_s2 + $0xb4] ss:$8 sps:$4 sm:$0xff]  }
 0x1c5   : > { %6447 = vmatmul.mubr.msk.bf16.gmra.mrb[12].mxu1 %vm619_vm0, %v7931_v13  ;;  %3243 = vmatprep.mubr.bf16.mxu0 %v11135_v35 }
 0x1c6   : > { %2248 = vmatprep.mubr.bf16.mxu1 %v11135_v35 }
 0x1c7   : > { %6851 = vmatpush3.bf16.msra.mxu0 %v7738_v59  ;;  %v7748_v59 = vld [vmem:[%s11010_s3 + $0x80] sm:$0xff]  }
 0x1c8   : > { %6852 = vmatprep.subr.bf16.mxu0 %v7739_v43  ;;  %v11168_v43 = vpack.c.bf16 %v8256_v34, %v8245_v60  ;;  %v7750_v60 = vld [vmem:[%s11010_s3 + $0x88] sm:$0xff]   ;;  %v7752_v34 = vld [vmem:[%s11010_s3 + $0x90] sm:$0xff]  }
 0x1cb   : > { %6853 = vmatpush3.bf16.msra.mxu0 %v7740_v47  ;;  %v7744_v47 = vld [vmem:[%s11009_s2 + $0xb0] ss:$8 sps:$4 sm:$0xff]  }
 0x1cc   : > { %6529 = vmatmul.mubr.msk.bf16.gmra.mrb[80].mxu0 %vm619_vm0, %v7940_v16  ;;  %6950 = vmatprep.subr.bf16.mxu0 %v7747_v7  ;;  %v11171_v7 = vpack.c.bf16 %v8302_v62, %v8297_v52  ;;  %v11172_v52 = vpack.c.bf16 %v8300_v54, %v8292_v50  ;;  %v7757_v62 = vld [vmem:[%s11010_s3 + $0xe8] sm:$0xff]   ;;  %v7759_v54 = vld [vmem:[%s11010_s3 + $0xf0] sm:$0xff]  }
 0x1cd   : > { %6448 = vmatmul.mubr.msk.bf16.gmra.mrb[16].mxu1 %vm619_vm0, %v7934_v14  ;;  %3253 = vmatprep.mubr.bf16.mxu0 %v11135_v35  ;;  %v7758_v50 = vld [vmem:[%s11010_s3 + $0xa8] sm:$0xff]  }
 0x1ce   : > { %2258 = vmatprep.mubr.bf16.mxu1 %v11135_v35 }
 0x1d4   : > { %6530 = vmatmul.mubr.msk.bf16.gmra.mrb[84].mxu0 %vm619_vm0, %v7943_v17 }
 0x1d5   : > { %6449 = vmatmul.mubr.msk.bf16.gmra.mrb[20].mxu1 %vm619_vm0, %v7937_v15  ;;  %3263 = vmatprep.mubr.bf16.mxu0 %v11135_v35 }
 0x1d6   : > { %2268 = vmatprep.mubr.bf16.mxu1 %v11135_v35 }
 0x1dc   : > { %6531 = vmatmul.mubr.msk.bf16.gmra.mrb[88].mxu0 %vm619_vm0, %v7946_v18 }
 0x1dd   : > { %6450 = vmatmul.mubr.msk.bf16.gmra.mrb[24].mxu1 %vm619_vm0, %v7940_v16  ;;  %3273 = vmatprep.mubr.bf16.mxu0 %v11135_v35 }
 0x1de   : > { %2278 = vmatprep.mubr.bf16.mxu1 %v11135_v35 }
 0x1e4   : > { %6532 = vmatmul.mubr.msk.bf16.gmra.mrb[92].mxu0 %vm619_vm0, %v7949_v19 }
 0x1e5   : > { %6451 = vmatmul.mubr.msk.bf16.gmra.mrb[28].mxu1 %vm619_vm0, %v7943_v17  ;;  %3283 = vmatprep.mubr.bf16.mxu0 %v11135_v35 }
 0x1e6   : > { %2288 = vmatprep.mubr.bf16.mxu1 %v11135_v35 }
 0x1ec   : > { %6533 = vmatmul.mubr.msk.bf16.gmra.mrb[96].mxu0 %vm619_vm0, %v7952_v20 }
 0x1ed   : > { %6452 = vmatmul.mubr.msk.bf16.gmra.mrb[32].mxu1 %vm619_vm0, %v7946_v18  ;;  %3293 = vmatprep.mubr.bf16.mxu0 %v11135_v35 }
 0x1ee   : > { %2298 = vmatprep.mubr.bf16.mxu1 %v11135_v35 }
 0x1f4   : > { %6534 = vmatmul.mubr.msk.bf16.gmra.mrb[100].mxu0 %vm619_vm0, %v7955_v21 }
 0x1f5   : > { %6453 = vmatmul.mubr.msk.bf16.gmra.mrb[36].mxu1 %vm619_vm0, %v7949_v19  ;;  %3303 = vmatprep.mubr.bf16.mxu0 %v11135_v35 }
 0x1f6   : > { %2308 = vmatprep.mubr.bf16.mxu1 %v11135_v35 }
 0x1fc   : > { %6535 = vmatmul.mubr.msk.bf16.gmra.mrb[104].mxu0 %vm619_vm0, %v7958_v22 }
 0x1fd   : > { %6454 = vmatmul.mubr.msk.bf16.gmra.mrb[40].mxu1 %vm619_vm0, %v7952_v20  ;;  %3313 = vmatprep.mubr.bf16.mxu0 %v11135_v35 }
 0x1fe   : > { %2318 = vmatprep.mubr.bf16.mxu1 %v11135_v35 }
 0x204   : > { %6536 = vmatmul.mubr.msk.bf16.gmra.mrb[108].mxu0 %vm619_vm0, %v7961_v23 }
 0x205   : > { %6455 = vmatmul.mubr.msk.bf16.gmra.mrb[44].mxu1 %vm619_vm0, %v7955_v21  ;;  %3323 = vmatprep.mubr.bf16.mxu0 %v11135_v35 }
 0x206   : > { %2328 = vmatprep.mubr.bf16.mxu1 %v11135_v35 }
 0x20c   : > { %6537 = vmatmul.mubr.msk.bf16.gmra.mrb[112].mxu0 %vm619_vm0, %v7964_v24 }
 0x20d   : > { %6456 = vmatmul.mubr.msk.bf16.gmra.mrb[48].mxu1 %vm619_vm0, %v7958_v22  ;;  %3333 = vmatprep.mubr.bf16.mxu0 %v11135_v35 }
 0x20e   : > { %2338 = vmatprep.mubr.bf16.mxu1 %v11135_v35 }
 0x214   : > { %6538 = vmatmul.mubr.msk.bf16.gmra.mrb[116].mxu0 %vm619_vm0, %v7967_v25 }
 0x215   : > { %6457 = vmatmul.mubr.msk.bf16.gmra.mrb[52].mxu1 %vm619_vm0, %v7961_v23  ;;  %3343 = vmatprep.mubr.bf16.mxu0 %v11135_v35 }
 0x216   : > { %2348 = vmatprep.mubr.bf16.mxu1 %v11135_v35 }
 0x21c   : > { %6539 = vmatmul.mubr.msk.bf16.gmra.mrb[120].mxu0 %vm619_vm0, %v7970_v26 }
 0x21d   : > { %6458 = vmatmul.mubr.msk.bf16.gmra.mrb[56].mxu1 %vm619_vm0, %v7964_v24  ;;  %3353 = vmatprep.mubr.bf16.mxu0 %v11135_v35 }
 0x21e   : > { %2358 = vmatprep.mubr.bf16.mxu1 %v11135_v35 }
 0x224   : > { %6540 = vmatmul.mubr.msk.bf16.gmra.mrb[124].mxu0 %vm619_vm0, %v7973_v27 }
 0x225   : > { %6459 = vmatmul.mubr.msk.bf16.gmra.mrb[60].mxu1 %vm619_vm0, %v7967_v25  ;;  %5274 = vmatprep.mubr.bf16.mxu0 %v11167_v28  ;;  %v11173_v28 = vpack.c.bf16 %v8324_v42, %v8319_v36  ;;  %v11174_v42 = vld [vmem:[#allocation23_spill] sm:$0xff] }
 0x226   : > { %3850 = vmatprep.mubr.bf16.mxu1 %v11135_v35  ;;  %v11175_v36 = vpack.c.bf16 %v8322_v41, %v11174_v42  ;;  %v7762_v41 = vld [vmem:[%s11010_s3 + $0xb8] sm:$0xff]  }
 0x227   : > { %v11202_v42 = vld [vmem:[#allocation34_spill] sm:$0xff] }
 0x22c   : > { %5275 = vmatmul.mubr.bf16.vlgmr.msra.gmra.mrb[128].mxu0 %v11168_v43  ;;  %v11178_v43 = vld [vmem:[#allocation25_spill] sm:$0xff] }
 0x22d   : > { %6550 = vmatmul.mubr.msk.bf16.vlgmr.msra.gmra.mrb[64].mxu1 %vm619_vm0, %v7882_v0  ;;  %5282 = vmatprep.mubr.bf16.mxu0 %v11169_v37  ;;  %v7751_v0 = vld [vmem:[%s11010_s3 + $0xd0] sm:$0xff]   ;;  %v11180_v37 = vld [vmem:[#allocation26_spill] sm:$0xff] }
 0x22e   : > { %4166 = vmatpush1.bf16.msra.mxu1 %v7741_v3  ;;  %3860 = vmatprep.mubr.bf16.mxu1 %v11135_v35  ;;  %v7761_v3 = vld [vmem:[%s11010_s3 + $0xf8] sm:$0xff]  }
 0x22f   : > { %4167 = vmatprep.subr.bf16.mxu1 %v7746_v30  ;;  %6951 = vmatpush3.bf16.msra.mxu0 %v7748_v59  ;;  %v11176_v30 = vld [vmem:[#allocation7_spill] sm:$0xff] }
 0x230   : > { %6952 = vmatprep.subr.bf16.mxu0 %v7749_v33  ;;  %v11177_v59 = vld [vmem:[#allocation27_spill] sm:$0xff] }
 0x231   : > { %v11179_v33 = vpack.c.bf16 %v11177_v59, %v11178_v43  ;;  %v11207_v59 = vld [vmem:[#allocation39_spill] sm:$0xff]  ;;  %v11208_v43 = vld [vmem:[#allocation37_spill] sm:$0xff] }
 0x232   : > { %4168 = vmatpush1.bf16.msra.mxu1 %v7744_v47  ;;  %v11181_v47 = vld [vmem:[#allocation24_spill] sm:$0xff] }
 0x233   : > { %6953 = vmatpush3.bf16.msra.mxu0 %v7750_v60  ;;  %v11182_v60 = vpack.c.bf16 %v11180_v37, %v11181_v47  ;;  %v11212_v37 = vld [vmem:[#allocation41_spill] sm:$0xff] }
 0x234   : > { %5283 = vmatmul.mubr.bf16.gmra.mrb[132].mxu0 %v11170_v55  ;;  %6954 = vmatprep.subr.bf16.mxu0 %v7751_v0  ;;  %v11183_v0 = vld [vmem:[#allocation8_spill] sm:$0xff]  ;;  %v11185_v55 = vpack.c.bf16 %v8381_v63, %v8370_v32  ;;  %v11195_v32 = vld [vmem:[#allocation33_spill] sm:$0xff] }
 0x235   : > { %6551 = vmatmul.mubr.msk.bf16.gmra.mrb[68].mxu1 %vm619_vm0, %v7885_v1  ;;  %5290 = vmatprep.mubr.bf16.mxu0 %v11171_v7  ;;  %v7756_v1 = vld [vmem:[%s11010_s3 + $0xa0] sm:$0xff]   ;;  %v11187_v7 = vld [vmem:[#allocation29_spill] sm:$0xff] }
 0x236   : > { %3870 = vmatprep.mubr.bf16.mxu1 %v11135_v35 }
 0x237   : > { %6955 = vmatpush3.bf16.msra.mxu0 %v7752_v34  ;;  %v11184_v34 = vpack.c.bf16 %v8389_v51, %v8375_v39  ;;  %v11192_v39 = vld [vmem:[#allocation10_spill] sm:$0xff]  ;;  %v11193_v51 = vld [vmem:[#allocation32_spill] sm:$0xff] }
 0x238   : > { %6956 = vmatprep.subr.bf16.mxu0 %v7753_v58  ;;  %v11186_v58 = vld [vmem:[#allocation9_spill] sm:$0xff]  ;;  %v11194_v63 = vpack.c.bf16 %v8433_v40, %v11193_v51  ;;  %v11204_v40 = vld [vmem:[#allocation12_spill] sm:$0xff] }
 0x23b   : > { %6957 = vmatpush3.bf16.msra.mxu0 %v7754_v53  ;;  %v11188_v53 = vpack.c.bf16 %v8411_v31, %v11187_v7  ;;  %v11198_v31 = vld [vmem:[#allocation11_spill] sm:$0xff] }
 0x23c   : > { %5291 = vmatmul.mubr.bf16.gmra.mrb[136].mxu0 %v11172_v52  ;;  %6958 = vmatprep.subr.bf16.mxu0 %v7755_v56  ;;  %v11189_v56 = vld [vmem:[#allocation30_spill] sm:$0xff] }
 0x23d   : > { %6552 = vmatmul.mubr.msk.bf16.gmra.mrb[72].mxu1 %vm619_vm0, %v7888_v2  ;;  %5298 = vmatprep.mubr.bf16.mxu0 %v11173_v28  ;;  %v7760_v2 = vld [vmem:[%s11010_s3 + $0xb0] sm:$0xff]  }
 0x23e   : > { %3880 = vmatprep.mubr.bf16.mxu1 %v11135_v35 }
 0x23f   : > { %6959 = vmatpush3.bf16.msra.mxu0 %v7756_v1  ;;  %v11190_v1 = vld [vmem:[#allocation28_spill] sm:$0xff] }
 0x240   : > { %6960 = vmatprep.subr.bf16.mxu0 %v7757_v62  ;;  %v11191_v52 = vpack.c.bf16 %v11189_v56, %v11190_v1  ;;  %v11196_v62 = vld [vmem:[#allocation31_spill] sm:$0xff]  ;;  %v11219_v56 = vld [vmem:[#allocation45_spill] sm:$0xff] }
 0x241   : > { %v11197_v28 = vpack.c.bf16 %v11195_v32, %v11196_v62  ;;  %v11221_v32 = vld [vmem:[#allocation22_spill] sm:$0xff] }
 0x243   : > { %6961 = vmatpush3.bf16.msra.mxu0 %v7758_v50  ;;  %v11199_v50 = vld [vmem:[#allocation35_spill] sm:$0xff] }
 0x244   : > { %5299 = vmatmul.mubr.bf16.gmra.mrb[140].mxu0 %v11175_v36  ;;  %6962 = vmatprep.subr.bf16.mxu0 %v7759_v54  ;;  %v11200_v54 = vpack.c.bf16 %v8455_v46, %v11199_v50  ;;  %v11210_v46 = vld [vmem:[#allocation13_spill] sm:$0xff] }
 0x245   : > { %6553 = vmatmul.mubr.msk.bf16.gmra.mrb[76].mxu1 %vm619_vm0, %v11176_v30  ;;  %5306 = vmatprep.mubr.bf16.mxu0 %v11179_v33  ;;  %v11209_v33 = vpack.c.bf16 %v11207_v59, %v11208_v43  ;;  %v11222_v43 = vld [vmem:[#allocation46_spill] sm:$0xff] }
 0x246   : > { %3890 = vmatprep.mubr.bf16.mxu1 %v11135_v35 }
 0x247   : > { %6963 = vmatpush3.bf16.msra.mxu0 %v7760_v2  ;;  %v11201_v2 = vld [vmem:[#allocation36_spill] sm:$0xff] }
 0x248   : > { %6964 = vmatprep.subr.bf16.mxu0 %v7761_v3  ;;  %v11203_v36 = vpack.c.bf16 %v11201_v2, %v11202_v42  ;;  %v11205_v3 = vld [vmem:[#allocation38_spill] sm:$0xff] }
 0x249   : > { %v11206_v30 = vpack.c.bf16 %v8477_v44, %v11205_v3  ;;  %v8953_v44 = vld [vmem:[%s11011_s4 + $0x2] ss:$4 sm:$0x3] }
 0x24b   : > { %6965 = vmatpush3.bf16.msra.mxu0 %v7762_v41  ;;  %v11211_v41 = vld [vmem:[#allocation43_spill] sm:$0xff] }
 0x24c   : > { %5307 = vmatmul.mubr.bf16.gmra.mrb[144].mxu0 %v11182_v60  ;;  %v11213_v47 = vpack.c.bf16 %v11211_v41, %v11212_v37  ;;  %v6460_v60 = vld [vmem:[%s11011_s4 + $0x1] ss:$4 sm:$0x3] }
 0x24d   : > { %6554 = vmatmul.mubr.msk.bf16.gmra.mrb[80].mxu1 %vm619_vm0, %v11183_v0  ;;  %5314 = vmatprep.mubr.bf16.mxu0 %v11184_v34  ;;  %v11214_v0 = vld [vmem:[#allocation42_spill] sm:$0xff]  ;;  %v11215_v34 = vld [vmem:[#allocation40_spill] sm:$0xff]  ;;  %v8976_v62 = vrot.slane %v6460_v60, %v11221_v32 }
 0x24e   : > { %3900 = vmatprep.mubr.bf16.mxu1 %v11135_v35 }
 0x254   : > { %5315 = vmatmul.mubr.bf16.gmra.mrb[148].mxu0 %v11185_v55  ;;  %v11216_v55 = vpack.c.bf16 %v11214_v0, %v11215_v34 }
 0x255   : > { %6555 = vmatmul.mubr.msk.bf16.gmra.mrb[84].mxu1 %vm619_vm0, %v11186_v58  ;;  %5322 = vmatprep.mubr.bf16.mxu0 %v11188_v53  ;;  %v11217_v58 = vld [vmem:[#allocation21_spill] sm:$0xff]  ;;  %v11218_v53 = vld [vmem:[#allocation47_spill] sm:$0xff] }
 0x256   : > { %3910 = vmatprep.mubr.bf16.mxu1 %v11135_v35  ;;  %v8963_v7 = vrot.slane %v8953_v44, %v11217_v58  ;;  %v11220_v1 = vpack.c.bf16 %v11218_v53, %v11219_v56 }
 0x25c   : > { %5323 = vmatmul.mubr.bf16.gmra.mrb[152].mxu0 %v11191_v52  ;;  %v8971_v52 = vrot.slane %v6460_v60, %v11217_v58  ;;  %v11226_v60 = vld [vmem:[#allocation49_spill] sm:$0xff] }
 0x25d   : > { %6556 = vmatmul.mubr.msk.bf16.gmra.mrb[88].mxu1 %vm619_vm0, %v11192_v39  ;;  %5330 = vmatprep.mubr.bf16.mxu0 %v11194_v63 }
 0x25e   : > { %3920 = vmatprep.mubr.bf16.mxu1 %v11135_v35 }
 0x264   : > { %5331 = vmatmul.mubr.bf16.gmra.mrb[156].mxu0 %v11197_v28 }
 0x265   : > { %6557 = vmatmul.mubr.msk.bf16.gmra.mrb[92].mxu1 %vm619_vm0, %v11198_v31  ;;  %5338 = vmatprep.mubr.bf16.mxu0 %v11200_v54 }
 0x266   : > { %3930 = vmatprep.mubr.bf16.mxu1 %v11135_v35 }
 0x26c   : > { %5339 = vmatmul.mubr.bf16.gmra.mrb[160].mxu0 %v11203_v36 }
 0x26d   : > { %6558 = vmatmul.mubr.msk.bf16.gmra.mrb[96].mxu1 %vm619_vm0, %v11204_v40  ;;  %5346 = vmatprep.mubr.bf16.mxu0 %v11206_v30 }
 0x26e   : > { %3940 = vmatprep.mubr.bf16.mxu1 %v11135_v35 }
 0x274   : > { %5347 = vmatmul.mubr.bf16.gmra.mrb[164].mxu0 %v11209_v33  ;;  %v11223_v33 = vld [vmem:[#allocation44_spill] sm:$0xff] }
 0x275   : > { %6559 = vmatmul.mubr.msk.bf16.gmra.mrb[100].mxu1 %vm619_vm0, %v11210_v46  ;;  %5354 = vmatprep.mubr.bf16.mxu0 %v11213_v47  ;;  %v11224_v46 = vpack.c.bf16 %v11222_v43, %v11223_v33  ;;  %v11225_v47 = vld [vmem:[#allocation51_spill] sm:$0xff] }
 0x276   : > { %3950 = vmatprep.mubr.bf16.mxu1 %v11135_v35  ;;  %v11227_v0 = vpack.c.bf16 %v11225_v47, %v11226_v60  ;;  %v11230_v47 = vld [vmem:[#allocation50_spill] sm:$0xff]  ;;  %v11231_v60 = vld [vmem:[#allocation48_spill] sm:$0xff] }
 0x27c   : > { %5355 = vmatmul.mubr.bf16.gmra.mrb[168].mxu0 %v11216_v55 }
 0x27d   : > { %6560 = vmatmul.mubr.msk.bf16.gmra.mrb[104].mxu1 %vm619_vm0, %v7922_v10  ;;  %5362 = vmatprep.mubr.bf16.mxu0 %v11220_v1 }
 0x27e   : > { %3960 = vmatprep.mubr.bf16.mxu1 %v11135_v35 }
 0x27f   : > { %v3205_v39 = vpop.f32.mrb[64].mxu0  ;;  %v2210_v51 = vpop.f32.mrb[0].mxu1 }
 0x280   : > { %v3441_v63 = vadd.f32 %v8963_v7, %v3205_v39  ;;  %v8978_v28 = vpop.f32.mrb[65].mxu0  ;;  %v2446_v10 = vadd.f32 %v8971_v52, %v2210_v51  ;;  %v2212_v31 = vpop.f32.mrb[1].mxu1 }
 0x281   : > { %v3209_v50 = vpop.f32.mrb[66].mxu0  ;;  %v2214_v54 = vpop.f32.mrb[2].mxu1  ;;  %v2447_v3 = vadd.f32 %v8976_v62, %v2212_v31 }
 0x282   : > { %v3443_v2 = vadd.f32 %v8963_v7, %v3209_v50  ;;  %v8982_v42 = vpop.f32.mrb[67].mxu0  ;;  %v3569_v36 = vmul.f32 0.01, %v3441_v63  ;;  %v2574_v40 = vmul.f32 0.01, %v2446_v10  ;;  %vm3505_vm5 = vcmp.gt.f32.partialorder %v3441_v63, 0.0 }
 0x283   : > { %v2448_v30 = vadd.f32 %v8971_v52, %v2214_v54  ;;  %v2216_v59 = vpop.f32.mrb[3].mxu1  ;;  %vm2510_vm6 = vcmp.gt.f32.partialorder %v2446_v10, 0.0  ;;  %v2575_v54 = vmul.f32 0.01, %v2447_v3  ;;  %vm2511_vm10 = vcmp.gt.f32.partialorder %v2447_v3, 0.0 }
 0x284   : > { %5363 = vmatmul.mubr.bf16.gmra.mrb[172].mxu0 %v11224_v46  ;;  %vm3507_vm7 = vcmp.gt.f32.partialorder %v3443_v2, 0.0  ;;  %v3571_v41 = vmul.f32 0.01, %v3443_v2  ;;  %v2449_v37 = vadd.f32 %v8976_v62, %v2216_v59  ;;  %v8996_v55 = vsel %vm3505_vm5, %v3441_v63, %v3569_v36 }
 0x285   : > { %6561 = vmatmul.mubr.msk.bf16.gmra.mrb[108].mxu1 %vm619_vm0, %v7925_v11  ;;  %5370 = vmatprep.mubr.bf16.mxu0 %v11227_v0  ;;  %vm2512_vm8 = vcmp.gt.f32.partialorder %v2448_v30, 0.0  ;;  %v2576_v34 = vmul.f32 0.01, %v2448_v30  ;;  %11228 = vst [vmem:[#allocation23_spill] sm:$0xff] %v8996_v55  ;;  %v9000_v39 = vsel %vm2510_vm6, %v2446_v10, %v2574_v40  ;;  %v11232_v0 = vpack.c.bf16 %v11230_v47, %v11231_v60  ;;  %v11234_v11 = vld [vmem:[#allocation53_spill] sm:$0xff] }
 0x286   : > { %3970 = vmatprep.mubr.bf16.mxu1 %v11135_v35  ;;  %v8998_v53 = vsel %vm3507_vm7, %v3443_v2, %v3571_v41  ;;  %v2577_v56 = vmul.f32 0.01, %v2449_v37  ;;  %vm2513_vm9 = vcmp.gt.f32.partialorder %v2449_v37, 0.0 }
 0x287   : > { %11229 = vst [vmem:[#allocation7_spill] sm:$0xff] %v8998_v53  ;;  %v3215_v1 = vpop.f32.mrb[68].mxu0  ;;  %v9002_v51 = vsel %vm2512_vm8, %v2448_v30, %v2576_v34 }
 0x288   : > { %v2220_v31 = vpop.f32.mrb[4].mxu1  ;;  %v9006_v50 = vpop.f32.mrb[69].mxu0  ;;  %v3445_v2 = vadd.f32 %v8963_v7, %v3215_v1  ;;  %v9016_v41 = vsel %vm2513_vm9, %v2449_v37, %v2577_v56  ;;  %v9028_v37 = vsel %vm2511_vm10, %v2447_v3, %v2575_v54  ;;  %v7763_v56 = vld [vmem:[%s11010_s3 + $0x140] sm:$0xff]  }
 0x289   : > { %v2222_v36 = vpop.f32.mrb[5].mxu1  ;;  %v3219_v59 = vpop.f32.mrb[70].mxu0  ;;  %v2450_v10 = vadd.f32 %v8971_v52, %v2220_v31  ;;  %7062 = vmatprep.subr.bf16.mxu0 %v7763_v56 }
 0x28a   : > { %v2224_v40 = vpop.f32.mrb[6].mxu1  ;;  %v3447_v30 = vadd.f32 %v8963_v7, %v3219_v59  ;;  %v9013_v43 = vpop.f32.mrb[71].mxu0  ;;  %v3573_v33 = vmul.f32 0.01, %v3445_v2  ;;  %v2451_v46 = vadd.f32 %v8976_v62, %v2222_v36  ;;  %vm3509_vm11 = vcmp.gt.f32.partialorder %v3445_v2, 0.0  ;;  %v11233_v59 = vld [vmem:[#allocation55_spill] sm:$0xff] }
 0x28b   : > { %v2452_v34 = vadd.f32 %v8971_v52, %v2224_v40  ;;  %v2226_v31 = vpop.f32.mrb[7].mxu1  ;;  %v11235_v63 = vpack.c.bf16 %v11233_v59, %v11234_v11  ;;  %v2578_v36 = vmul.f32 0.01, %v2450_v10  ;;  %vm2514_vm15 = vcmp.gt.f32.partialorder %v2450_v10, 0.0 }
 0x28c   : > { %5371 = vmatmul.mubr.bf16.gmra.mrb[176].mxu0 %v11232_v0  ;;  %vm3511_vm12 = vcmp.gt.f32.partialorder %v3447_v30, 0.0  ;;  %v3575_v1 = vmul.f32 0.01, %v3447_v30  ;;  %v2453_v40 = vadd.f32 %v8976_v62, %v2226_v31  ;;  %v9040_v11 = vsel %vm3509_vm11, %v3445_v2, %v3573_v33 }
 0x28d   : > { %6562 = vmatmul.mubr.msk.bf16.gmra.mrb[112].mxu1 %vm619_vm0, %v7928_v12  ;;  %5378 = vmatprep.mubr.bf16.mxu0 %v11235_v63  ;;  %v7765_v12 = vld [vmem:[%s11010_s3 + $0x1c0] sm:$0xff]   ;;  %11236 = vst [vmem:[#allocation27_spill] sm:$0xff] %v9040_v11  ;;  %v2579_v3 = vmul.f32 0.01, %v2451_v46  ;;  %v2580_v54 = vmul.f32 0.01, %v2452_v34 }
 0x28e   : > { %3980 = vmatprep.mubr.bf16.mxu1 %v11135_v35  ;;  %v9042_v63 = vsel %vm3511_vm12, %v3447_v30, %v3575_v1  ;;  %vm2516_vm13 = vcmp.gt.f32.partialorder %v2452_v34, 0.0  ;;  %vm2517_vm14 = vcmp.gt.f32.partialorder %v2453_v40, 0.0  ;;  %v2581_v31 = vmul.f32 0.01, %v2453_v40  ;;  %7174 = vmatprep.subr.bf16.mxu1 %v7765_v12  ;;  %v11238_v12 = vld [vmem:[#allocation52_spill] sm:$0xff] }
 0x28f   : > { %11237 = vst [vmem:[#allocation25_spill] sm:$0xff] %v9042_v63  ;;  %v3225_v60 = vpop.f32.mrb[72].mxu0  ;;  %vm2515_vm1 = vcmp.gt.f32.partialorder %v2451_v46, 0.0  ;;  %v9055_v0 = vsel %vm2516_vm13, %v2452_v34, %v2580_v54  ;;  %v11239_v58 = vpack.c.bf16 %v8563_v29, %v11238_v12  ;;  %v11240_v34 = vpack.c.bf16 %v8587_v57, %v8582_v4 }
 0x290   : > { %v2230_v59 = vpop.f32.mrb[8].mxu1  ;;  %v9046_v47 = vpop.f32.mrb[73].mxu0  ;;  %v3449_v2 = vadd.f32 %v8963_v7, %v3225_v60  ;;  %v9052_v61 = vsel %vm2517_vm14, %v2453_v40, %v2581_v31  ;;  %v9060_v11 = vsel %vm2515_vm1, %v2451_v46, %v2579_v3  ;;  %v9062_v60 = vsel %vm2514_vm15, %v2450_v10, %v2578_v36 }
 0x291   : > { %v2232_v33 = vpop.f32.mrb[9].mxu1  ;;  %v3229_v38 = vpop.f32.mrb[74].mxu0  ;;  %v2454_v63 = vadd.f32 %v8971_v52, %v2230_v59  ;;  %v11243_v46 = vpack.c.bf16 %v8585_v6, %v8577_v8 }
 0x292   : > { %v2234_v30 = vpop.f32.mrb[10].mxu1  ;;  %v3451_v1 = vadd.f32 %v8963_v7, %v3229_v38  ;;  %v9050_v56 = vpop.f32.mrb[75].mxu0  ;;  %v3577_v45 = vmul.f32 0.01, %v3449_v2  ;;  %vm3513_vm2 = vcmp.gt.f32.partialorder %v3449_v2, 0.0  ;;  %v2455_v38 = vadd.f32 %v8976_v62, %v2232_v33 }
 0x293   : > { %v2236_v40 = vpop.f32.mrb[11].mxu1  ;;  %v2456_v29 = vadd.f32 %v8971_v52, %v2234_v30  ;;  %v2582_v59 = vmul.f32 0.01, %v2454_v63  ;;  %vm2518_vm6 = vcmp.gt.f32.partialorder %v2454_v63, 0.0 }
 0x294   : > { %5379 = vmatmul.mubr.bf16.gmra.mrb[180].mxu0 %v11239_v58  ;;  %vm3515_vm3 = vcmp.gt.f32.partialorder %v3451_v1, 0.0  ;;  %v3579_v55 = vmul.f32 0.01, %v3451_v1  ;;  %v2457_v58 = vadd.f32 %v8976_v62, %v2236_v40  ;;  %v9079_v36 = vsel %vm3513_vm2, %v3449_v2, %v3577_v45 }
 0x295   : > { %6563 = vmatmul.mubr.msk.bf16.gmra.mrb[116].mxu1 %vm619_vm0, %v7931_v13  ;;  %5386 = vmatprep.mubr.bf16.mxu0 %v11240_v34  ;;  %11241 = vst [vmem:[#allocation26_spill] sm:$0xff] %v9079_v36  ;;  %v2583_v33 = vmul.f32 0.01, %v2455_v38  ;;  %vm2519_vm5 = vcmp.gt.f32.partialorder %v2455_v38, 0.0  ;;  %v2584_v45 = vmul.f32 0.01, %v2456_v29  ;;  %v9111_v6 = vsel %vm2518_vm6, %v2454_v63, %v2582_v59 }
 0x296   : > { %3990 = vmatprep.mubr.bf16.mxu1 %v11135_v35  ;;  %v9081_v13 = vsel %vm3515_vm3, %v3451_v1, %v3579_v55  ;;  %vm2521_vm4 = vcmp.gt.f32.partialorder %v2457_v58, 0.0  ;;  %v2585_v4 = vmul.f32 0.01, %v2457_v58  ;;  %vm2520_vm7 = vcmp.gt.f32.partialorder %v2456_v29, 0.0 }
 0x297   : > { %11242 = vst [vmem:[#allocation24_spill] sm:$0xff] %v9081_v13  ;;  %v3235_v3 = vpop.f32.mrb[76].mxu0 }
 0x298   : > { %v2240_v54 = vpop.f32.mrb[12].mxu1  ;;  %v9085_v31 = vpop.f32.mrb[77].mxu0  ;;  %v3453_v30 = vadd.f32 %v8963_v7, %v3235_v3  ;;  %v9092_v57 = vsel %vm2521_vm4, %v2457_v58, %v2585_v4  ;;  %v9104_v58 = vsel %vm2519_vm5, %v2455_v38, %v2583_v33 }
 0x299   : > { %v2242_v12 = vpop.f32.mrb[13].mxu1  ;;  %v3239_v40 = vpop.f32.mrb[78].mxu0 }
 0x29a   : > { %v2244_v2 = vpop.f32.mrb[14].mxu1  ;;  %v3455_v55 = vadd.f32 %v8963_v7, %v3239_v40  ;;  %v9089_v1 = vpop.f32.mrb[79].mxu0  ;;  %v3581_v34 = vmul.f32 0.01, %v3453_v30  ;;  %vm3517_vm8 = vcmp.gt.f32.partialorder %v3453_v30, 0.0  ;;  %v2459_v3 = vadd.f32 %v8976_v62, %v2242_v12 }
 0x29b   : > { %v2246_v36 = vpop.f32.mrb[15].mxu1  ;;  %v11244_v40 = vpack.c.bf16 %v8609_v5, %v8604_v48  ;;  %v2460_v48 = vadd.f32 %v8971_v52, %v2244_v2 }
 0x29c   : > { %5387 = vmatmul.mubr.bf16.gmra.mrb[184].mxu0 %v11243_v46  ;;  %vm3519_vm9 = vcmp.gt.f32.partialorder %v3455_v55, 0.0  ;;  %v3583_v10 = vmul.f32 0.01, %v3455_v55  ;;  %v2461_v4 = vadd.f32 %v8976_v62, %v2246_v36  ;;  %v9114_v46 = vsel %vm2520_vm7, %v2456_v29, %v2584_v45 }
 0x29d   : > { %6564 = vmatmul.mubr.msk.bf16.gmra.mrb[120].mxu1 %vm619_vm0, %v7934_v14  ;;  %5394 = vmatprep.mubr.bf16.mxu0 %v11244_v40  ;;  %v9116_v14 = vsel %vm3517_vm8, %v3453_v30, %v3581_v34  ;;  %v2458_v29 = vadd.f32 %v8971_v52, %v2240_v54  ;;  %v2587_v30 = vmul.f32 0.01, %v2459_v3  ;;  %vm2523_vm11 = vcmp.gt.f32.partialorder %v2459_v3, 0.0 }
 0x29e   : > { %4000 = vmatprep.mubr.bf16.mxu1 %v11135_v35  ;;  %11245 = vst [vmem:[#allocation8_spill] sm:$0xff] %v9116_v14  ;;  %v9119_v5 = vsel %vm3519_vm9, %v3455_v55, %v3583_v10  ;;  %vm2525_vm10 = vcmp.gt.f32.partialorder %v2461_v4, 0.0  ;;  %v2589_v12 = vmul.f32 0.01, %v2461_v4  ;;  %v2588_v36 = vmul.f32 0.01, %v2460_v48 }
 0x29f   : > { %11246 = vst [vmem:[#allocation9_spill] sm:$0xff] %v9119_v5  ;;  %v3245_v38 = vpop.f32.mrb[80].mxu0  ;;  %v9136_v14 = vrot.slane %v8953_v44, %v11221_v32  ;;  %vm2524_vm12 = vcmp.gt.f32.partialorder %v2460_v48, 0.0  ;;  %v11247_v54 = vpack.c.bf16 %v8607_v49, %v8599_v9  ;;  %v9147_v44 = vsel %vm2523_vm11, %v2459_v3, %v2587_v30  ;;  %v7767_v49 = vld [vmem:[%s11010_s3 + $0x148] sm:$0xff]  }
 0x2a0   : > { %v2250_v63 = vpop.f32.mrb[16].mxu1  ;;  %v9125_v59 = vpop.f32.mrb[81].mxu0  ;;  %v3457_v45 = vadd.f32 %v8963_v7, %v3245_v38  ;;  %v9132_v8 = vsel %vm2525_vm10, %v2461_v4, %v2589_v12  ;;  %v2586_v38 = vmul.f32 0.01, %v2458_v29  ;;  %v11248_v4 = vpack.c.bf16 %v9016_v41, %v9028_v37 }
 0x2a1   : > { %v2252_v2 = vpop.f32.mrb[17].mxu1  ;;  %v3249_v10 = vpop.f32.mrb[82].mxu0  ;;  %vm2522_vm15 = vcmp.gt.f32.partialorder %v2458_v29, 0.0  ;;  %v9159_v41 = vsel %vm2524_vm12, %v2460_v48, %v2588_v36  ;;  %v9163_v37 = vadd.f32 %v9136_v14, %v8978_v28  ;;  %v9208_v13 = vadd.f32 %v8971_v52, %v2250_v63 }
 0x2a2   : > { %v2254_v55 = vpop.f32.mrb[18].mxu1  ;;  %v3459_v34 = vadd.f32 %v8963_v7, %v3249_v10  ;;  %v9130_v40 = vpop.f32.mrb[83].mxu0  ;;  %v3585_v33 = vmul.f32 0.01, %v3457_v45  ;;  %vm3521_vm13 = vcmp.gt.f32.partialorder %v3457_v45, 0.0  ;;  %v2463_v12 = vadd.f32 %v8976_v62, %v2252_v2 }
 0x2a3   : > { %v2256_v10 = vpop.f32.mrb[19].mxu1  ;;  %v9177_v36 = vsel %vm2522_vm15, %v2458_v29, %v2586_v38  ;;  %v7764_v29 = vld [vmem:[%s11010_s3 + $0x100] sm:$0xff]   ;;  %vm2526_vm6 = vcmp.gt.f32.partialorder %v9208_v13, 0.0 }
 0x2a4   : > { %5395 = vmatmul.mubr.bf16.gmra.mrb[188].mxu0 %v11247_v54  ;;  %vm3523_vm14 = vcmp.gt.f32.partialorder %v3459_v34, 0.0  ;;  %v3587_v5 = vmul.f32 0.01, %v3459_v34  ;;  %v2465_v9 = vadd.f32 %v8976_v62, %v2256_v10  ;;  %v9154_v54 = vsel %vm3521_vm13, %v3457_v45, %v3585_v33  ;;  %v7766_v38 = vld [vmem:[%s11010_s3 + $0x180] sm:$0xff]  }
 0x2a5   : > { %6565 = vmatmul.mubr.msk.bf16.gmra.mrb[124].mxu1 %vm619_vm0, %v7937_v15  ;;  %5435 = vmatprep.mubr.bf16.mxu0 %v11248_v4  ;;  %11249 = vst [vmem:[#allocation29_spill] sm:$0xff] %v9154_v54  ;;  %v9173_v33 = vadd.f32 %v9136_v14, %v8982_v42  ;;  %v2591_v28 = vmul.f32 0.01, %v2463_v12  ;;  %vm2527_vm1 = vcmp.gt.f32.partialorder %v2463_v12, 0.0  ;;  %v2464_v42 = vadd.f32 %v8971_v52, %v2254_v55 }
 0x2a6   : > { %4197 = vmatprep.mubr.bf16.mxu1 %v11135_v35  ;;  %v9156_v15 = vsel %vm3523_vm14, %v3459_v34, %v3587_v5  ;;  %v2593_v34 = vmul.f32 0.01, %v2465_v9  ;;  %vm2529_vm2 = vcmp.gt.f32.partialorder %v2465_v9, 0.0  ;;  %v9196_v54 = vadd.f32 %v9136_v14, %v9006_v50 }
 0x2a7   : > { %11250 = vst [vmem:[#allocation30_spill] sm:$0xff] %v9156_v15  ;;  %v3255_v32 = vpop.f32.mrb[84].mxu0  ;;  %v11252_v55 = vpack.c.bf16 %v9002_v51, %v9000_v39  ;;  %v7773_v15 = vld [vmem:[%s11010_s3 + $0x1c8] sm:$0xff]   ;;  %v11253_v39 = vpack.c.bf16 %v9052_v61, %v9060_v11  ;;  %v9219_v51 = vmul.f32 0.01, %v9173_v33  ;;  %v9224_v63 = vsel %vm2527_vm1, %v2463_v12, %v2591_v28 }
 0x2a8   : > { %v9167_v30 = vpop.f32.mrb[20].mxu1  ;;  %v9169_v2 = vpop.f32.mrb[85].mxu0  ;;  %v3461_v5 = vadd.f32 %v8963_v7, %v3255_v32  ;;  %11251 = vst [vmem:[#allocation28_spill] sm:$0xff] %v9196_v54  ;;  %v2592_v26 = vmul.f32 0.01, %v2464_v42  ;;  %v7775_v12 = vld [vmem:[%s11010_s3 + $0x188] sm:$0xff]  }
 0x2a9   : > { %v2262_v45 = vpop.f32.mrb[21].mxu1  ;;  %v3259_v48 = vpop.f32.mrb[86].mxu0  ;;  %vm2528_vm5 = vcmp.gt.f32.partialorder %v2464_v42, 0.0 }
 0x2aa   : > { %v2264_v10 = vpop.f32.mrb[22].mxu1  ;;  %v3463_v4 = vadd.f32 %v8963_v7, %v3259_v48  ;;  %v9180_v3 = vpop.f32.mrb[87].mxu0  ;;  %v3589_v32 = vmul.f32 0.01, %v3461_v5  ;;  %v9192_v48 = vmul.f32 0.01, %v9163_v37  ;;  %v9211_v53 = vadd.f32 %v8976_v62, %v2262_v45 }
 0x2ab   : > { %vm3525_vm3 = vcmp.gt.f32.partialorder %v3461_v5, 0.0  ;;  %v2266_v27 = vpop.f32.mrb[23].mxu1  ;;  %v9227_v45 = vsel %vm2529_vm2, %v2465_v9, %v2593_v34  ;;  %v9243_v9 = vmul.f32 0.01, %v9196_v54  ;;  %v9264_v28 = vadd.f32 %v8971_v52, %v2264_v10  ;;  %v7783_v10 = vld [vmem:[%s11010_s3 + $0x1d0] sm:$0xff]  }
 0x2ac   : > { %5436 = vmatmul.mubr.bf16.vlgmr.msra.gmra.mrb[192].mxu0 %v11252_v55  ;;  %vm3527_vm4 = vcmp.gt.f32.partialorder %v3463_v4, 0.0  ;;  %v3591_v50 = vmul.f32 0.01, %v3463_v4  ;;  %v2469_v55 = vadd.f32 %v8976_v62, %v2266_v27  ;;  %v7768_v27 = vld [vmem:[%s11010_s3 + $0x108] sm:$0xff]   ;;  %vm2531_vm7 = vcmp.gt.f32.partialorder %v9211_v53, 0.0 }
 0x2ad   : > { %6590 = vmatmul.mubr.msk.bf16.vlgmr.msra.gmra.mrb[64].mxu1 %vm619_vm0, %v7940_v16  ;;  %5443 = vmatprep.mubr.bf16.mxu0 %v11253_v39  ;;  %v9230_v16 = vsel %vm3525_vm3, %v3461_v5, %v3589_v32  ;;  %11256 = vst [vmem:[#allocation33_spill] sm:$0xff] %v9243_v9  ;;  %v9247_v5 = vadd.f32 %v9136_v14, %v9013_v43  ;;  %v7769_v32 = vld [vmem:[%s11010_s3 + $0x150] sm:$0xff]   ;;  %v2595_v39 = vmul.f32 0.01, %v9211_v53  ;;  %vm2532_vm11 = vcmp.gt.f32.partialorder %v9264_v28, 0.0 }
 0x2ae   : > { %4207 = vmatprep.mubr.bf16.mxu1 %v11135_v35  ;;  %11254 = vst [vmem:[#allocation10_spill] sm:$0xff] %v9230_v16  ;;  %v9232_v25 = vsel %vm3527_vm4, %v3463_v4, %v3591_v50  ;;  %7063 = vmatpush3.bf16.msra.mxu0 %v7764_v29  ;;  %v2590_v29 = vmul.f32 0.01, %v9208_v13  ;;  %vm2533_vm8 = vcmp.gt.f32.partialorder %v2469_v55, 0.0  ;;  %v9272_v9 = vsel %vm2528_vm5, %v2464_v42, %v2592_v26 }
 0x2af   : > { %11255 = vst [vmem:[#allocation32_spill] sm:$0xff] %v9232_v25  ;;  %v3265_v61 = vpop.f32.mrb[88].mxu0  ;;  %7175 = vmatpush3.bf16.msra.mxu1 %v7766_v38  ;;  %7064 = vmatprep.subr.bf16.mxu0 %v7767_v49  ;;  %v2597_v49 = vmul.f32 0.01, %v2469_v55  ;;  %v9285_v54 = vadd.f32 %v9136_v14, %v9046_v47  ;;  %v9289_v26 = vadd.f32 %v9136_v14, %v9050_v56  ;;  %v7784_v47 = vld [vmem:[%s11010_s3 + $0x190] sm:$0xff]  }
 0x2b0   : > { %v9251_v34 = vpop.f32.mrb[24].mxu1  ;;  %v9253_v4 = vpop.f32.mrb[89].mxu0  ;;  %7176 = vmatprep.subr.bf16.mxu1 %v7773_v15  ;;  %v3465_v43 = vadd.f32 %v8963_v7, %v3265_v61  ;;  %v7770_v61 = vld [vmem:[%s11010_s3 + $0x110] sm:$0xff]   ;;  %v9293_v42 = vadd.f32 %v9136_v14, %v9085_v31  ;;  %v2466_v56 = vadd.f32 %v8971_v52, %v9167_v30 }
 0x2b1   : > { %v2272_v38 = vpop.f32.mrb[25].mxu1  ;;  %v3269_v50 = vpop.f32.mrb[90].mxu0 }
 0x2b2   : > { %v9266_v11 = vpop.f32.mrb[26].mxu1  ;;  %v3467_v15 = vadd.f32 %v8963_v7, %v3269_v50  ;;  %v9269_v16 = vpop.f32.mrb[91].mxu0  ;;  %vm3529_vm9 = vcmp.gt.f32.partialorder %v3465_v43, 0.0  ;;  %v3593_v25 = vmul.f32 0.01, %v3465_v43  ;;  %7065 = vmatpush3.bf16.msra.mxu0 %v7768_v27  ;;  %v11258_v27 = vpack.c.bf16 %v9055_v0, %v9062_v60 }
 0x2b3   : > { %7177 = vmatpush3.bf16.msra.mxu1 %v7775_v12  ;;  %v9281_v50 = vmul.f32 0.01, %v9247_v5  ;;  %7066 = vmatprep.subr.bf16.mxu0 %v7769_v32  ;;  %v7771_v12 = vld [vmem:[%s11010_s3 + $0x158] sm:$0xff]   ;;  %v2276_v31 = vpop.f32.mrb[27].mxu1  ;;  %v11259_v0 = vpack.c.bf16 %v9092_v57, %v9104_v58  ;;  %v9314_v60 = vsel %vm2526_vm6, %v9208_v13, %v2590_v29  ;;  %v9328_v57 = vsel %vm2533_vm8, %v2469_v55, %v2597_v49 }
 0x2b4   : > { %5444 = vmatmul.mubr.bf16.gmra.mrb[196].mxu0 %v11258_v27  ;;  %vm3531_vm10 = vcmp.gt.f32.partialorder %v3467_v15, 0.0  ;;  %v9317_v32 = vsel %vm3529_vm9, %v3465_v43, %v3593_v25  ;;  %v2596_v58 = vmul.f32 0.01, %v9264_v28  ;;  %v2473_v25 = vadd.f32 %v8976_v62, %v2276_v31  ;;  %v7772_v27 = vld [vmem:[%s11010_s3 + $0x118] sm:$0xff]   ;;  %7178 = vmatprep.subr.bf16.mxu1 %v7783_v10 }
 0x2b5   : > { %11257 = vst [vmem:[#allocation31_spill] sm:$0xff] %v9281_v50  ;;  %v3595_v50 = vmul.f32 0.01, %v3467_v15  ;;  %6591 = vmatmul.mubr.msk.bf16.gmra.mrb[68].mxu1 %vm619_vm0, %v7943_v17  ;;  %5451 = vmatprep.mubr.bf16.mxu0 %v11259_v0  ;;  %11260 = vst [vmem:[#allocation11_spill] sm:$0xff] %v9317_v32  ;;  %v9325_v17 = vsel %vm2531_vm7, %v9211_v53, %v2595_v39  ;;  %v9340_v53 = vmul.f32 0.01, %v9285_v54 }
 0x2b6   : > { %4217 = vmatprep.mubr.bf16.mxu1 %v11135_v35  ;;  %7067 = vmatpush3.bf16.msra.mxu0 %v7770_v61  ;;  %v9344_v55 = vadd.f32 %v8976_v62, %v2272_v38  ;;  %v7774_v61 = vld [vmem:[%s11010_s3 + $0x160] sm:$0xff]   ;;  %v9356_v10 = vmul.f32 0.01, %v9289_v26  ;;  %v9362_v39 = vmul.f32 0.01, %v9293_v42  ;;  %vm2530_vm12 = vcmp.gt.f32.partialorder %v2466_v56, 0.0 }
 0x2b7   : > { %v9331_v13 = vsel %vm3531_vm10, %v3467_v15, %v3595_v50  ;;  %v3275_v29 = vpop.f32.mrb[92].mxu0  ;;  %11262 = vst [vmem:[#allocation36_spill] sm:$0xff] %v9340_v53  ;;  %7068 = vmatprep.subr.bf16.mxu0 %v7771_v12  ;;  %7179 = vmatpush3.bf16.msra.mxu1 %v7784_v47  ;;  %v2594_v50 = vmul.f32 0.01, %v2466_v56  ;;  %v9371_v47 = vadd.f32 %v9136_v14, %v9089_v1  ;;  %v2601_v32 = vmul.f32 0.01, %v2473_v25 }
 0x2b8   : > { %11261 = vst [vmem:[#allocation35_spill] sm:$0xff] %v9331_v13  ;;  %v9348_v49 = vpop.f32.mrb[28].mxu1  ;;  %v9350_v15 = vpop.f32.mrb[93].mxu0  ;;  %11263 = vst [vmem:[#allocation34_spill] sm:$0xff] %v9356_v10  ;;  %v3469_v38 = vadd.f32 %v8963_v7, %v3275_v29  ;;  %v9376_v29 = vsel %vm2532_vm11, %v9264_v28, %v2596_v58  ;;  %v2599_v10 = vmul.f32 0.01, %v9344_v55  ;;  %v11265_v1 = vpack.c.bf16 %v9114_v46, %v9111_v6 }
 0x2b9   : > { %v9359_v31 = vpop.f32.mrb[29].mxu1  ;;  %v3279_v0 = vpop.f32.mrb[94].mxu0  ;;  %11264 = vst [vmem:[#allocation12_spill] sm:$0xff] %v9362_v39  ;;  %v7776_v39 = vld [vmem:[%s11010_s3 + $0x120] sm:$0xff]   ;;  %vm2537_vm13 = vcmp.gt.f32.partialorder %v2473_v25, 0.0  ;;  %v7777_v28 = vld [vmem:[%s11010_s3 + $0x168] sm:$0xff]   ;;  %v9394_v58 = vadd.f32 %v9136_v14, %v9130_v40  ;;  %v11266_v53 = vpack.c.bf16 %v9132_v8, %v9147_v44  ;;  %v9402_v6 = vsel %vm2530_vm12, %v2466_v56, %v2594_v50 }
 0x2ba   : > { %v9364_v43 = vpop.f32.mrb[30].mxu1  ;;  %v3471_v12 = vadd.f32 %v8963_v7, %v3279_v0  ;;  %v9367_v30 = vpop.f32.mrb[95].mxu0  ;;  %v3597_v13 = vmul.f32 0.01, %v3469_v38  ;;  %7069 = vmatpush3.bf16.msra.mxu0 %v7772_v27  ;;  %v9383_v0 = vadd.f32 %v9136_v14, %v9125_v59  ;;  %vm3533_vm14 = vcmp.gt.f32.partialorder %v3469_v38, 0.0  ;;  %v7785_v46 = vld [vmem:[%s11010_s3 + $0x1d8] sm:$0xff]  }
 0x2bb   : > { %7070 = vmatprep.subr.bf16.mxu0 %v7774_v61  ;;  %v2286_v27 = vpop.f32.mrb[31].mxu1  ;;  %v7786_v40 = vld [vmem:[%s11010_s3 + $0x198] sm:$0xff]   ;;  %v2470_v61 = vadd.f32 %v8971_v52, %v9251_v34  ;;  %vm2535_vm1 = vcmp.gt.f32.partialorder %v9344_v55, 0.0  ;;  %v9419_v44 = vmul.f32 0.01, %v9371_v47  ;;  %v9427_v34 = vsel %vm2537_vm13, %v2473_v25, %v2601_v32  ;;  %7180 = vmatprep.subr.bf16.mxu1 %v7785_v46 }
 0x2bc   : > { %5452 = vmatmul.mubr.bf16.gmra.mrb[200].mxu0 %v11265_v1  ;;  %vm3535_vm15 = vcmp.gt.f32.partialorder %v3471_v12, 0.0  ;;  %v3599_v59 = vmul.f32 0.01, %v3471_v12  ;;  %v9422_v56 = vsel %vm3533_vm14, %v3469_v38, %v3597_v13  ;;  %v9433_v1 = vmul.f32 0.01, %v9383_v0  ;;  %v7779_v38 = vld [vmem:[%s11010_s3 + $0x170] sm:$0xff]   ;;  %7181 = vmatpush3.bf16.msra.mxu1 %v7786_v40 }
 0x2bd   : > { %6592 = vmatmul.mubr.msk.bf16.gmra.mrb[72].mxu1 %vm619_vm0, %v7946_v18  ;;  %5459 = vmatprep.mubr.bf16.mxu0 %v11266_v53  ;;  %v2472_v18 = vadd.f32 %v8971_v52, %v9266_v11  ;;  %11267 = vst [vmem:[#allocation38_spill] sm:$0xff] %v9419_v44  ;;  %11268 = vst [vmem:[#allocation39_spill] sm:$0xff] %v9422_v56  ;;  %v7778_v11 = vld [vmem:[%s11010_s3 + $0x128] sm:$0xff]   ;;  %v9437_v8 = vadd.f32 %v9136_v14, %v9169_v2  ;;  %v9453_v2 = vmul.f32 0.01, %v9394_v58 }
 0x2be   : > { %4227 = vmatprep.mubr.bf16.mxu1 %v11135_v35  ;;  %v9424_v53 = vsel %vm3535_vm15, %v3471_v12, %v3599_v59  ;;  %7071 = vmatpush3.bf16.msra.mxu0 %v7776_v39  ;;  %11270 = vst [vmem:[#allocation13_spill] sm:$0xff] %v9433_v1  ;;  %v9441_v13 = vadd.f32 %v9136_v14, %v9180_v3  ;;  %v2598_v32 = vmul.f32 0.01, %v2470_v61  ;;  %vm2534_vm2 = vcmp.gt.f32.partialorder %v2470_v61, 0.0 }
 0x2bf   : > { %11269 = vst [vmem:[#allocation37_spill] sm:$0xff] %v9424_v53  ;;  %v3285_v50 = vpop.f32.mrb[96].mxu0  ;;  %7072 = vmatprep.subr.bf16.mxu0 %v7777_v28  ;;  %11271 = vst [vmem:[#allocation43_spill] sm:$0xff] %v9453_v2  ;;  %v9457_v3 = vadd.f32 %v9136_v14, %v9253_v4  ;;  %v9465_v28 = vsel %vm2535_vm1, %v9344_v55, %v2599_v10  ;;  %v2600_v56 = vmul.f32 0.01, %v2472_v18  ;;  %vm2536_vm3 = vcmp.gt.f32.partialorder %v2472_v18, 0.0 }
 0x2c0   : > { %v9445_v25 = vpop.f32.mrb[32].mxu1  ;;  %v9447_v39 = vpop.f32.mrb[97].mxu0  ;;  %v3473_v12 = vadd.f32 %v8963_v7, %v3285_v50  ;;  %v2477_v50 = vadd.f32 %v8976_v62, %v2286_v27  ;;  %v7780_v55 = vld [vmem:[%s11010_s3 + $0x130] sm:$0xff]   ;;  %v9479_v10 = vmul.f32 0.01, %v9437_v8  ;;  %v9486_v44 = vadd.f32 %v9136_v14, %v9269_v16 }
 0x2c1   : > { %v9460_v59 = vpop.f32.mrb[33].mxu1  ;;  %v3289_v46 = vpop.f32.mrb[98].mxu0  ;;  %v11275_v27 = vpack.c.bf16 %v9159_v41, %v9177_v36  ;;  %v2474_v4 = vadd.f32 %v8971_v52, %v9348_v49  ;;  %v11276_v41 = vpack.c.bf16 %v9227_v45, %v9224_v63  ;;  %v9504_v36 = vmul.f32 0.01, %v9457_v3 }
 0x2c2   : > { %v9467_v40 = vpop.f32.mrb[34].mxu1  ;;  %v3475_v53 = vadd.f32 %v8963_v7, %v3289_v46  ;;  %v9470_v2 = vpop.f32.mrb[99].mxu0  ;;  %v3601_v1 = vmul.f32 0.01, %v3473_v12  ;;  %7073 = vmatpush3.bf16.msra.mxu0 %v7778_v11  ;;  %11272 = vst [vmem:[#allocation41_spill] sm:$0xff] %v9479_v10  ;;  %11274 = vst [vmem:[#allocation40_spill] sm:$0xff] %v9486_v44  ;;  %v9510_v49 = vsel %vm2534_vm2, %v2470_v61, %v2598_v32 }
 0x2c3   : > { %v9482_v46 = vmul.f32 0.01, %v9441_v13  ;;  %vm3537_vm4 = vcmp.gt.f32.partialorder %v3473_v12, 0.0  ;;  %7074 = vmatprep.subr.bf16.mxu0 %v7779_v38  ;;  %v7781_v11 = vld [vmem:[%s11010_s3 + $0x178] sm:$0xff]   ;;  %v2296_v16 = vpop.f32.mrb[35].mxu1  ;;  %11277 = vst [vmem:[#allocation47_spill] sm:$0xff] %v9504_v36  ;;  %v2476_v38 = vadd.f32 %v8971_v52, %v9364_v43 }
 0x2c4   : > { %5460 = vmatmul.mubr.bf16.gmra.mrb[204].mxu0 %v11275_v27  ;;  %vm3539_vm5 = vcmp.gt.f32.partialorder %v3475_v53, 0.0  ;;  %v3603_v10 = vmul.f32 0.01, %v3475_v53  ;;  %v2605_v27 = vmul.f32 0.01, %v2477_v50  ;;  %v7782_v43 = vld [vmem:[%s11010_s3 + $0x138] sm:$0xff]  }
 0x2c5   : > { %11273 = vst [vmem:[#allocation42_spill] sm:$0xff] %v9482_v46  ;;  %v2475_v46 = vadd.f32 %v8976_v62, %v9359_v31  ;;  %6593 = vmatmul.mubr.msk.bf16.gmra.mrb[76].mxu1 %vm619_vm0, %v7949_v19  ;;  %5467 = vmatprep.mubr.bf16.mxu0 %v11276_v41  ;;  %v9513_v31 = vsel %vm2536_vm3, %v2472_v18, %v2600_v56  ;;  %v9526_v61 = vmul.f32 0.01, %v9486_v44  ;;  %vm2541_vm6 = vcmp.gt.f32.partialorder %v2477_v50, 0.0 }
 0x2c6   : > { %4237 = vmatprep.mubr.bf16.mxu1 %v11135_v35  ;;  %v9516_v19 = vsel %vm3537_vm4, %v3473_v12, %v3601_v1  ;;  %v9518_v63 = vsel %vm3539_vm5, %v3475_v53, %v3603_v10  ;;  %7075 = vmatpush3.bf16.msra.mxu0 %v7780_v55  ;;  %v2602_v1 = vmul.f32 0.01, %v2474_v4  ;;  %vm2538_vm7 = vcmp.gt.f32.partialorder %v2474_v4, 0.0 }
 0x2c7   : > { %11278 = vst [vmem:[#allocation45_spill] sm:$0xff] %v9516_v19  ;;  %11279 = vst [vmem:[#allocation46_spill] sm:$0xff] %v9518_v63  ;;  %v3295_v45 = vpop.f32.mrb[100].mxu0  ;;  %7076 = vmatprep.subr.bf16.mxu0 %v7781_v11  ;;  %v2603_v32 = vmul.f32 0.01, %v2475_v46  ;;  %vm2539_vm8 = vcmp.gt.f32.partialorder %v2475_v46, 0.0  ;;  %v2481_v19 = vadd.f32 %v8976_v62, %v2296_v16  ;;  %v9544_v63 = vsel %vm2541_vm6, %v2477_v50, %v2605_v27 }
 0x2c8   : > { %11280 = vst [vmem:[#allocation44_spill] sm:$0xff] %v9526_v61  ;;  %v9530_v56 = vpop.f32.mrb[36].mxu1  ;;  %v9532_v53 = vpop.f32.mrb[101].mxu0  ;;  %v3477_v12 = vadd.f32 %v8963_v7, %v3295_v45  ;;  %v2604_v41 = vmul.f32 0.01, %v2476_v38  ;;  %vm2540_vm9 = vcmp.gt.f32.partialorder %v2476_v38, 0.0  ;;  %v9548_v45 = vadd.f32 %v9136_v14, %v9350_v15 }
 0x2c9   : > { %v9535_v55 = vpop.f32.mrb[37].mxu1  ;;  %v3299_v10 = vpop.f32.mrb[102].mxu0  ;;  %v9552_v44 = vadd.f32 %v9136_v14, %v9367_v30  ;;  %v11282_v16 = vpack.c.bf16 %v9272_v9, %v9314_v60  ;;  %v2479_v50 = vadd.f32 %v8976_v62, %v9460_v59  ;;  %v11283_v30 = vpack.c.bf16 %v9328_v57, %v9325_v17  ;;  %v7787_v9 = vld [vmem:[%s11010_s3 + $0x1e0] sm:$0xff]  }
 0x2ca   : > { %v9537_v61 = vpop.f32.mrb[38].mxu1  ;;  %v3479_v36 = vadd.f32 %v8963_v7, %v3299_v10  ;;  %v9540_v18 = vpop.f32.mrb[103].mxu0  ;;  %v3605_v11 = vmul.f32 0.01, %v3477_v12  ;;  %7077 = vmatpush3.bf16.msra.mxu0 %v7782_v43  ;;  %v9556_v10 = vadd.f32 %v8971_v52, %v9445_v25  ;;  %vm3541_vm10 = vcmp.gt.f32.partialorder %v3477_v12, 0.0  ;;  %v7788_v60 = vld [vmem:[%s11010_s3 + $0x1a0] sm:$0xff]   ;;  %7182 = vmatprep.subr.bf16.mxu1 %v7787_v9 }
 0x2cb   : > { %11281 = vst [vmem:[#allocation51_spill] sm:$0xff] %v9552_v44  ;;  %v2306_v15 = vpop.f32.mrb[39].mxu1  ;;  %v9569_v25 = vsel %vm2539_vm8, %v2475_v46, %v2603_v32  ;;  %v2480_v59 = vadd.f32 %v8971_v52, %v9467_v40  ;;  %v9583_v17 = vsel %vm2538_vm7, %v2474_v4, %v2602_v1  ;;  %v9586_v57 = vsel %vm2540_vm9, %v2476_v38, %v2604_v41 }
 0x2cc   : > { %5468 = vmatmul.mubr.bf16.gmra.mrb[208].mxu0 %v11282_v16  ;;  %vm3543_vm11 = vcmp.gt.f32.partialorder %v3479_v36, 0.0  ;;  %v3607_v27 = vmul.f32 0.01, %v3479_v36  ;;  %v2609_v46 = vmul.f32 0.01, %v2481_v19  ;;  %v9589_v43 = vsel %vm3541_vm10, %v3477_v12, %v3605_v11  ;;  %7183 = vmatpush3.bf16.msra.mxu1 %v7788_v60 }
 0x2cd   : > { %6594 = vmatmul.mubr.msk.bf16.gmra.mrb[80].mxu1 %vm619_vm0, %v7952_v20  ;;  %5475 = vmatprep.mubr.bf16.mxu0 %v11283_v30  ;;  %11284 = vst [vmem:[#allocation49_spill] sm:$0xff] %v9589_v43  ;;  %v9596_v30 = vmul.f32 0.01, %v9548_v45  ;;  %vm2545_vm12 = vcmp.gt.f32.partialorder %v2481_v19, 0.0  ;;  %v9603_v1 = vmul.f32 0.01, %v9552_v44  ;;  %v9609_v9 = vadd.f32 %v9136_v14, %v9447_v39 }
 0x2ce   : > { %4247 = vmatprep.mubr.bf16.mxu1 %v11135_v35  ;;  %v9591_v32 = vsel %vm3543_vm11, %v3479_v36, %v3607_v27  ;;  %v2607_v36 = vmul.f32 0.01, %v2479_v50  ;;  %vm2542_vm13 = vcmp.gt.f32.partialorder %v9556_v10, 0.0  ;;  %vm2543_vm14 = vcmp.gt.f32.partialorder %v2479_v50, 0.0 }
 0x2cf   : > { %11285 = vst [vmem:[#allocation50_spill] sm:$0xff] %v9591_v32  ;;  %v3305_v16 = vpop.f32.mrb[104].mxu0  ;;  %11286 = vst [vmem:[#allocation48_spill] sm:$0xff] %v9596_v30  ;;  %v2606_v60 = vmul.f32 0.01, %v9556_v10  ;;  %vm2544_vm15 = vcmp.gt.f32.partialorder %v2480_v59, 0.0  ;;  %v9624_v39 = vadd.f32 %v8971_v52, %v9530_v56  ;;  %v2483_v30 = vadd.f32 %v8976_v62, %v9535_v55 }
 0x2d0   : > { %v2310_v38 = vpop.f32.mrb[40].mxu1  ;;  %v9600_v41 = vpop.f32.mrb[105].mxu0  ;;  %11287 = vst [vmem:[#allocation55_spill] sm:$0xff] %v9603_v1  ;;  %v3481_v12 = vadd.f32 %v8963_v7, %v3305_v16  ;;  %v2608_v43 = vmul.f32 0.01, %v2480_v59  ;;  %v9616_v16 = vsel %vm2545_vm12, %v2481_v19, %v2609_v46  ;;  %v9620_v1 = vadd.f32 %v9136_v14, %v9470_v2 }
 0x2d1   : > { %v2312_v11 = vpop.f32.mrb[41].mxu1  ;;  %v3309_v27 = vpop.f32.mrb[106].mxu0  ;;  %v11290_v2 = vpack.c.bf16 %v9427_v34, %v9465_v28  ;;  %v9637_v56 = vsel %vm2543_vm14, %v2479_v50, %v2607_v36  ;;  %v9640_v44 = vmul.f32 0.01, %v9609_v9  ;;  %v9652_v34 = vadd.f32 %v8971_v52, %v9537_v61 }
 0x2d2   : > { %v2314_v4 = vpop.f32.mrb[42].mxu1  ;;  %v3483_v40 = vadd.f32 %v8963_v7, %v3309_v27  ;;  %v9612_v20 = vpop.f32.mrb[107].mxu0  ;;  %v3609_v32 = vmul.f32 0.01, %v3481_v12  ;;  %11288 = vst [vmem:[#allocation53_spill] sm:$0xff] %v9620_v1  ;;  %vm3545_vm1 = vcmp.gt.f32.partialorder %v3481_v12, 0.0  ;;  %v11289_v27 = vpack.c.bf16 %v9376_v29, %v9402_v6 }
 0x2d3   : > { %v2316_v46 = vpop.f32.mrb[43].mxu1  ;;  %11291 = vst [vmem:[#allocation54_spill] sm:$0xff] %v9640_v44  ;;  %v9644_v29 = vadd.f32 %v9136_v14, %v9532_v53  ;;  %v2485_v6 = vadd.f32 %v8976_v62, %v2306_v15  ;;  %v9659_v36 = vsel %vm2544_vm15, %v2480_v59, %v2608_v43  ;;  %v9662_v53 = vmul.f32 0.01, %v9620_v1 }
 0x2d4   : > { %5476 = vmatmul.mubr.bf16.gmra.mrb[212].mxu0 %v11289_v27  ;;  %vm3547_vm2 = vcmp.gt.f32.partialorder %v3483_v40, 0.0  ;;  %v3611_v19 = vmul.f32 0.01, %v3483_v40  ;;  %v9654_v28 = vsel %vm3545_vm1, %v3481_v12, %v3609_v32  ;;  %v9665_v15 = vmul.f32 0.01, %v9624_v39 }
 0x2d5   : > { %6595 = vmatmul.mubr.msk.bf16.gmra.mrb[84].mxu1 %vm619_vm0, %v7955_v21  ;;  %5483 = vmatprep.mubr.bf16.mxu0 %v11290_v2  ;;  %11292 = vst [vmem:[#allocation52_spill] sm:$0xff] %v9644_v29  ;;  %11293 = vst [vmem:[#allocation56_spill] sm:$0xff] %v9654_v28  ;;  %v9669_v27 = vadd.f32 %v9136_v14, %v9540_v18  ;;  %vm2547_vm3 = vcmp.gt.f32.partialorder %v2483_v30, 0.0  ;;  %v2611_v12 = vmul.f32 0.01, %v2483_v30  ;;  %vm2546_vm4 = vcmp.gt.f32.partialorder %v9624_v39, 0.0 }
 0x2d6   : > { %4257 = vmatprep.mubr.bf16.mxu1 %v11135_v35  ;;  %v9656_v55 = vsel %vm3547_vm2, %v3483_v40, %v3611_v19  ;;  %11295 = vst [vmem:[#allocation58_spill] sm:$0xff] %v9662_v53  ;;  %v9681_v2 = vsel %vm2542_vm13, %v9556_v10, %v2606_v60  ;;  %v2613_v18 = vmul.f32 0.01, %v2485_v6  ;;  %v9685_v61 = vadd.f32 %v8971_v52, %v2310_v38 }
 0x2d7   : > { %11294 = vst [vmem:[#allocation57_spill] sm:$0xff] %v9656_v55  ;;  %v3315_v50 = vpop.f32.mrb[108].mxu0  ;;  %v9693_v53 = vmul.f32 0.01, %v9644_v29  ;;  %vm2548_vm5 = vcmp.gt.f32.partialorder %v9652_v34, 0.0  ;;  %vm2549_vm6 = vcmp.gt.f32.partialorder %v2485_v6, 0.0  ;;  %v9701_v44 = vadd.f32 %v8976_v62, %v2312_v11 }
 0x2d8   : > { %v2320_v32 = vpop.f32.mrb[44].mxu1  ;;  %v9673_v40 = vpop.f32.mrb[109].mxu0  ;;  %v3485_v59 = vadd.f32 %v8963_v7, %v3315_v50  ;;  %v2612_v60 = vmul.f32 0.01, %v9652_v34  ;;  %v9698_v38 = vmul.f32 0.01, %v9669_v27  ;;  %v9708_v50 = vadd.f32 %v9136_v14, %v9600_v41 }
 0x2d9   : > { %v9676_v43 = vpop.f32.mrb[45].mxu1  ;;  %v3319_v19 = vpop.f32.mrb[110].mxu0  ;;  %11296 = vst [vmem:[#allocation59_spill] sm:$0xff] %v9693_v53  ;;  %v9711_v53 = vadd.f32 %v8971_v52, %v2314_v4  ;;  %v11300_v11 = vpack.c.bf16 %v9544_v63, %v9569_v25  ;;  %vm3506_vm9 = vcmp.gt.f32.partialorder %v9163_v37, 0.0  ;;  %v9726_v4 = vmul.f32 0.01, %v9685_v61 }
 0x2da   : > { %v2324_v21 = vpop.f32.mrb[46].mxu1  ;;  %v3487_v28 = vadd.f32 %v8963_v7, %v3319_v19  ;;  %v9688_v55 = vpop.f32.mrb[111].mxu0  ;;  %v3613_v10 = vmul.f32 0.01, %v3485_v59  ;;  %11297 = vst [vmem:[#allocation60_spill] sm:$0xff] %v9698_v38  ;;  %vm3549_vm7 = vcmp.gt.f32.partialorder %v3485_v59, 0.0  ;;  %v11298_v19 = vpack.c.bf16 %v9513_v31, %v9510_v49 }
 0x2db   : > { %11299 = vst [vmem:[#allocation61_spill] sm:$0xff] %v9708_v50  ;;  %v2326_v1 = vpop.f32.mrb[47].mxu1  ;;  %v7789_v49 = vld [vmem:[%s11010_s3 + $0x1e8] sm:$0xff]   ;;  %v2489_v41 = vadd.f32 %v8976_v62, %v2316_v46  ;;  %v9734_v63 = vsel %vm2549_vm6, %v2485_v6, %v2613_v18  ;;  %v9738_v25 = vadd.f32 %v9136_v14, %v9612_v20  ;;  %vm2551_vm10 = vcmp.gt.f32.partialorder %v9701_v44, 0.0 }
 0x2dc   : > { %5484 = vmatmul.mubr.bf16.gmra.mrb[216].mxu0 %v11298_v19  ;;  %vm3551_vm8 = vcmp.gt.f32.partialorder %v3487_v28, 0.0  ;;  %v3615_v29 = vmul.f32 0.01, %v3487_v28  ;;  %v7790_v31 = vld [vmem:[%s11010_s3 + $0x1a8] sm:$0xff]   ;;  %v9741_v19 = vsel %vm3549_vm7, %v3485_v59, %v3613_v10  ;;  %7184 = vmatprep.subr.bf16.mxu1 %v7789_v49  ;;  %v9750_v6 = vadd.f32 %v8971_v52, %v2320_v32 }
 0x2dd   : > { %6596 = vmatmul.mubr.msk.bf16.gmra.mrb[88].mxu1 %vm619_vm0, %v7958_v22  ;;  %5491 = vmatprep.mubr.bf16.mxu0 %v11300_v11  ;;  %v9731_v22 = vsel %vm2547_vm3, %v2483_v30, %v2611_v12  ;;  %11301 = vst [vmem:[#allocation62_spill] sm:$0xff] %v9738_v25  ;;  %11302 = vst [vmem:[#allocation63_spill] sm:$0xff] %v9741_v19  ;;  %v2615_v30 = vmul.f32 0.01, %v9701_v44  ;;  %vm3508_vm11 = vcmp.gt.f32.partialorder %v9173_v33, 0.0  ;;  %vm2550_vm12 = vcmp.gt.f32.partialorder %v9685_v61, 0.0 }
 0x2de   : > { %4267 = vmatprep.mubr.bf16.mxu1 %v11135_v35  ;;  %v9743_v11 = vsel %vm3551_vm8, %v3487_v28, %v3615_v29  ;;  %7185 = vmatpush3.bf16.msra.mxu1 %v7790_v31  ;;  %v9755_v29 = vmul.f32 0.01, %v9708_v50  ;;  %v2616_v28 = vmul.f32 0.01, %v9711_v53  ;;  %vm2552_vm13 = vcmp.gt.f32.partialorder %v9711_v53, 0.0 }
 0x2df   : > { %11303 = vst [vmem:[#allocation64_spill] sm:$0xff] %v9743_v11  ;;  %v3325_v38 = vpop.f32.mrb[112].mxu0  ;;  %vm2553_vm14 = vcmp.gt.f32.partialorder %v2489_v41, 0.0  ;;  %v2617_v32 = vmul.f32 0.01, %v2489_v41 }
 0x2e0   : > { %v2330_v12 = vpop.f32.mrb[48].mxu1  ;;  %v3327_v59 = vpop.f32.mrb[113].mxu0  ;;  %11304 = vst [vmem:[#allocation65_spill] sm:$0xff] %v9755_v29  ;;  %v3489_v18 = vadd.f32 %v8963_v7, %v3325_v38  ;;  %v9766_v19 = vmul.f32 0.01, %v9738_v25  ;;  %v9770_v38 = vadd.f32 %v9136_v14, %v9673_v40  ;;  %v9775_v29 = vsel %vm2548_vm5, %v9652_v34, %v2612_v60 }
 0x2e1   : > { %v2332_v10 = vpop.f32.mrb[49].mxu1  ;;  %v3329_v49 = vpop.f32.mrb[114].mxu0  ;;  %v9778_v50 = vmul.f32 0.01, %v9750_v6  ;;  %v9785_v25 = vadd.f32 %v8971_v52, %v2324_v21  ;;  %v11306_v40 = vpack.c.bf16 %v9586_v57, %v9583_v17  ;;  %v9802_v21 = vsel %vm2546_vm4, %v9624_v39, %v9665_v15 }
 0x2e2   : > { %v2334_v20 = vpop.f32.mrb[50].mxu1  ;;  %v3491_v31 = vadd.f32 %v8963_v7, %v3329_v49  ;;  %v9763_v46 = vpop.f32.mrb[115].mxu0  ;;  %11305 = vst [vmem:[#allocation66_spill] sm:$0xff] %v9766_v19  ;;  %v3617_v11 = vmul.f32 0.01, %v3489_v18  ;;  %v9782_v49 = vadd.f32 %v8976_v62, %v9676_v43  ;;  %vm3553_vm15 = vcmp.gt.f32.partialorder %v3489_v18, 0.0 }
 0x2e3   : > { %v9791_v19 = vadd.f32 %v8976_v62, %v2326_v1  ;;  %v2336_v60 = vpop.f32.mrb[51].mxu1  ;;  %v11307_v43 = vpack.c.bf16 %v9616_v16, %v9637_v56  ;;  %v9806_v17 = vadd.f32 %v9136_v14, %v9688_v55  ;;  %v9817_v1 = vsel %vm2553_vm14, %v2489_v41, %v2617_v32 }
 0x2e4   : > { %5492 = vmatmul.mubr.bf16.gmra.mrb[220].mxu0 %v11306_v40  ;;  %vm3555_vm1 = vcmp.gt.f32.partialorder %v3491_v31, 0.0  ;;  %v3619_v34 = vmul.f32 0.01, %v3491_v31  ;;  %v9820_v16 = vadd.f32 %v8971_v52, %v2330_v12  ;;  %v9822_v39 = vsel %vm3553_vm15, %v3489_v18, %v3617_v11 }
 0x2e5   : > { %6597 = vmatmul.mubr.msk.bf16.gmra.mrb[92].mxu1 %vm619_vm0, %v7961_v23  ;;  %5499 = vmatprep.mubr.bf16.mxu0 %v11307_v43  ;;  %11308 = vst [vmem:[#allocation67_spill] sm:$0xff] %v9806_v17  ;;  %v9814_v23 = vsel %vm2551_vm10, %v9701_v44, %v2615_v30  ;;  %11309 = vst [vmem:[#allocation68_spill] sm:$0xff] %v9822_v39  ;;  %vm2555_vm2 = vcmp.gt.f32.partialorder %v9782_v49, 0.0  ;;  %v2619_v40 = vmul.f32 0.01, %v9782_v49  ;;  %vm2557_vm3 = vcmp.gt.f32.partialorder %v9791_v19, 0.0 }
 0x2e6   : > { %4277 = vmatprep.mubr.bf16.mxu1 %v11135_v35  ;;  %v9824_v56 = vsel %vm3555_vm1, %v3491_v31, %v3619_v34  ;;  %v9831_v44 = vadd.f32 %v8976_v62, %v2332_v10  ;;  %v9836_v11 = vmul.f32 0.01, %v9770_v38  ;;  %v9839_v18 = vmul.f32 0.01, %v9785_v25 }
 0x2e7   : > { %11310 = vst [vmem:[#allocation69_spill] sm:$0xff] %v9824_v56  ;;  %v3335_v55 = vpop.f32.mrb[116].mxu0  ;;  %v9846_v10 = vsel %vm3506_vm9, %v9163_v37, %v9192_v48  ;;  %v2621_v43 = vmul.f32 0.01, %v9791_v19  ;;  %v9851_v41 = vadd.f32 %v9136_v14, %v3327_v59  ;;  %vm2554_vm4 = vcmp.gt.f32.partialorder %v9750_v6, 0.0 }
 0x2e8   : > { %v2340_v30 = vpop.f32.mrb[52].mxu1  ;;  %v3337_v12 = vpop.f32.mrb[117].mxu0  ;;  %11311 = vst [vmem:[#allocation70_spill] sm:$0xff] %v9836_v11  ;;  %v3493_v32 = vadd.f32 %v8963_v7, %v3335_v55  ;;  %11312 = vst [vmem:[#allocation71_spill] sm:$0xff] %v9846_v10  ;;  %vm2556_vm5 = vcmp.gt.f32.partialorder %v9785_v25, 0.0  ;;  %v9865_v59 = vsel %vm2552_vm13, %v9711_v53, %v2616_v28  ;;  %v9874_v11 = vadd.f32 %v8976_v62, %v2336_v60 }
 0x2e9   : > { %v2342_v31 = vpop.f32.mrb[53].mxu1  ;;  %v3339_v34 = vpop.f32.mrb[118].mxu0  ;;  %v9857_v55 = vmul.f32 0.01, %v9806_v17  ;;  %v9860_v37 = vmul.f32 0.01, %v9820_v16  ;;  %v11315_v53 = vpack.c.bf16 %v9734_v63, %v9731_v22  ;;  %v9928_v60 = vsel %vm2557_vm3, %v9791_v19, %v2621_v43 }
 0x2ea   : > { %v2344_v15 = vpop.f32.mrb[54].mxu1  ;;  %v3495_v57 = vadd.f32 %v8963_v7, %v3339_v34  ;;  %v3341_v39 = vpop.f32.mrb[119].mxu0  ;;  %v3621_v48 = vmul.f32 0.01, %v3493_v32  ;;  %v9868_v56 = vmul.f32 0.01, %v9831_v44  ;;  %v9871_v34 = vadd.f32 %v8971_v52, %v2334_v20 }
 0x2eb   : > { %11313 = vst [vmem:[#allocation72_spill] sm:$0xff] %v9857_v55  ;;  %vm3557_vm6 = vcmp.gt.f32.partialorder %v3493_v32, 0.0  ;;  %v11314_v55 = vpack.c.bf16 %v9659_v36, %v9681_v2  ;;  %v2346_v17 = vpop.f32.mrb[55].mxu1  ;;  %v9888_v20 = vsel %vm2550_vm12, %v9685_v61, %v9726_v4  ;;  %v9894_v36 = vsel %vm3508_vm11, %v9173_v33, %v9219_v51  ;;  %v7792_v2 = vld [vmem:[%s11010_s3 + $0x1b0] sm:$0xff]  }
 0x2ec   : > { %vm3559_vm7 = vcmp.gt.f32.partialorder %v3495_v57, 0.0  ;;  %v3623_v10 = vmul.f32 0.01, %v3495_v57  ;;  %11316 = vst [vmem:[#allocation73_spill] sm:$0xff] %v9894_v36  ;;  %v9903_v22 = vmul.f32 0.01, %v9851_v41  ;;  %v9907_v61 = vadd.f32 %v9136_v14, %v9763_v46 }
 0x2ed   : > { %5500 = vmatmul.mubr.bf16.gmra.mrb[224].mxu0 %v11314_v55  ;;  %6598 = vmatmul.mubr.msk.bf16.gmra.mrb[96].mxu1 %vm619_vm0, %v7964_v24  ;;  %v7791_v24 = vld [vmem:[%s11010_s3 + $0x1f0] sm:$0xff]   ;;  %v9910_v4 = vadd.f32 %v8971_v52, %v2340_v30  ;;  %vm2559_vm8 = vcmp.gt.f32.partialorder %v9831_v44, 0.0  ;;  %v9917_v51 = vsel %vm3557_vm6, %v3493_v32, %v3621_v48  ;;  %v9920_v63 = vadd.f32 %v8976_v62, %v2342_v31  ;;  %v11325_v36 = vld [vmem:[#allocation14_spill] sm:$0xff] }
 0x2ee   : > { %5507 = vmatprep.mubr.bf16.mxu0 %v11315_v53  ;;  %11317 = vst [vmem:[#allocation74_spill] sm:$0xff] %v9903_v22  ;;  %4287 = vmatprep.mubr.bf16.mxu1 %v11135_v35  ;;  %11318 = vst [vmem:[#allocation75_spill] sm:$0xff] %v9917_v51  ;;  %v9923_v28 = vsel %vm3559_vm7, %v3495_v57, %v3623_v10  ;;  %v9931_v30 = vmul.f32 0.01, %v9871_v34  ;;  %vm2561_vm9 = vcmp.gt.f32.partialorder %v9874_v11, 0.0  ;;  %vm2558_vm10 = vcmp.gt.f32.partialorder %v9820_v16, 0.0 }
 0x2ef   : > { %11319 = vst [vmem:[#allocation76_spill] sm:$0xff] %v9923_v28  ;;  %v3345_v46 = vpop.f32.mrb[120].mxu0  ;;  %7186 = vmatprep.subr.bf16.mxu1 %v7791_v24  ;;  %v9935_v32 = vadd.f32 %v9136_v14, %v3337_v12  ;;  %v9940_v55 = vmul.f32 0.01, %v9874_v11  ;;  %v9943_v19 = vadd.f32 %v8971_v52, %v2344_v15  ;;  %v9949_v12 = vsel %vm2555_vm2, %v9782_v49, %v2619_v40 }
 0x2f0   : > { %v2350_v57 = vpop.f32.mrb[56].mxu1  ;;  %v3347_v10 = vpop.f32.mrb[121].mxu0  ;;  %7187 = vmatpush3.bf16.msra.mxu1 %v7792_v2  ;;  %v3497_v43 = vadd.f32 %v8963_v7, %v3345_v46  ;;  %v9953_v24 = vmul.f32 0.01, %v9907_v61  ;;  %v9956_v2 = vadd.f32 %v8976_v62, %v2346_v17  ;;  %vm2560_vm11 = vcmp.gt.f32.partialorder %v9871_v34, 0.0 }
 0x2f1   : > { %11320 = vst [vmem:[#allocation77_spill] sm:$0xff] %v9935_v32  ;;  %v2352_v48 = vpop.f32.mrb[57].mxu1  ;;  %v3349_v53 = vpop.f32.mrb[122].mxu0  ;;  %v9963_v49 = vmul.f32 0.01, %v9910_v4  ;;  %v9969_v51 = vadd.f32 %v9136_v14, %v3341_v39  ;;  %v9987_v39 = vadd.f32 %v9136_v14, %v3347_v10  ;;  %vm2563_vm14 = vcmp.gt.f32.partialorder %v9920_v63, 0.0 }
 0x2f2   : > { %11321 = vst [vmem:[#allocation78_spill] sm:$0xff] %v9953_v24  ;;  %v2354_v31 = vpop.f32.mrb[58].mxu1  ;;  %v3499_v15 = vadd.f32 %v8963_v7, %v3349_v53  ;;  %v3351_v33 = vpop.f32.mrb[123].mxu0  ;;  %v9966_v40 = vmul.f32 0.01, %v9920_v63  ;;  %v9975_v53 = vadd.f32 %v8971_v52, %v2350_v57  ;;  %vm3561_vm12 = vcmp.gt.f32.partialorder %v3497_v43, 0.0 }
 0x2f3   : > { %v3625_v17 = vmul.f32 0.01, %v3497_v43  ;;  %v9972_v28 = vmul.f32 0.01, %v9935_v32  ;;  %v9978_v46 = vadd.f32 %v8976_v62, %v2352_v48  ;;  %v11323_v24 = vpack.c.bf16 %v9775_v29, %v9802_v21  ;;  %11324 = vst [vmem:[#allocation80_spill] sm:$0xff] %v9987_v39 }
 0x2f4   : > { %v9984_v22 = vmul.f32 0.01, %v9943_v19  ;;  %vm3563_vm13 = vcmp.gt.f32.partialorder %v3499_v15, 0.0  ;;  %v3627_v32 = vmul.f32 0.01, %v3499_v15  ;;  %v11326_v57 = vpack.c.bf16 %v9817_v1, %v9814_v23 }
 0x2f5   : > { %11322 = vst [vmem:[#allocation79_spill] sm:$0xff] %v9972_v28  ;;  %5508 = vmatmul.mubr.bf16.gmra.mrb[228].mxu0 %v11323_v24  ;;  %v2356_v28 = vpop.f32.mrb[59].mxu1  ;;  %6599 = vmatmul.mubr.msk.bf16.gmra.mrb[100].mxu1 %vm619_vm0, %v11325_v36  ;;  %vm2565_vm15 = vcmp.gt.f32.partialorder %v9956_v2, 0.0  ;;  %v9997_v29 = vmul.f32 0.01, %v9956_v2  ;;  %v10000_v21 = vadd.f32 %v8971_v52, %v2354_v31  ;;  %v10007_v36 = vsel %vm2554_vm4, %v9750_v6, %v9778_v50 }
 0x2f6   : > { %5515 = vmatprep.mubr.bf16.mxu0 %v11326_v57  ;;  %4297 = vmatprep.mubr.bf16.mxu1 %v11135_v35  ;;  %v10013_v23 = vsel %vm2556_vm5, %v9785_v25, %v9839_v18  ;;  %vm2562_vm1 = vcmp.gt.f32.partialorder %v9910_v4, 0.0  ;;  %vm2564_vm2 = vcmp.gt.f32.partialorder %v9943_v19, 0.0  ;;  %v10018_v1 = vmul.f32 0.01, %v9969_v51 }
 0x2f7   : > { %v10021_v31 = vsel %vm3561_vm12, %v3497_v43, %v3625_v17  ;;  %v10024_v10 = vsel %vm3563_vm13, %v3499_v15, %v3627_v32  ;;  %v3355_v50 = vpop.f32.mrb[124].mxu0  ;;  %v10029_v25 = vmul.f32 0.01, %v9975_v53  ;;  %vm2567_vm3 = vcmp.gt.f32.partialorder %v9978_v46, 0.0 }
 0x2f8   : > { %11327 = vst [vmem:[#allocation14_spill] sm:$0xff] %v10018_v1  ;;  %11328 = vst [vmem:[#allocation81_spill] sm:$0xff] %v10021_v31  ;;  %v10035_v48 = vadd.f32 %v8976_v62, %v2356_v28  ;;  %v2360_v43 = vpop.f32.mrb[60].mxu1  ;;  %v10037_v24 = vpop.f32.mrb[125].mxu0  ;;  %v10041_v32 = vmul.f32 0.01, %v9978_v46  ;;  %v3501_v57 = vadd.f32 %v8963_v7, %v3355_v50  ;;  %v10052_v28 = vadd.f32 %v9136_v14, %v3351_v33 }
 0x2f9   : > { %11329 = vst [vmem:[#allocation82_spill] sm:$0xff] %v10024_v10  ;;  %v10044_v15 = vmul.f32 0.01, %v9987_v39  ;;  %v10047_v17 = vadd.f32 %v8971_v52, %v2360_v43  ;;  %v2362_v18 = vpop.f32.mrb[61].mxu1  ;;  %v3359_v6 = vpop.f32.mrb[126].mxu0  ;;  %v10061_v43 = vsel %vm2559_vm8, %v9831_v44, %v9868_v56  ;;  %v11332_v33 = vld [vmem:[#allocation28_spill] sm:$0xff]  ;;  %v11333_v44 = vpack.c.bf16 %v9865_v59, %v9888_v20 }
 0x2fa   : > { %v2364_v31 = vpop.f32.mrb[62].mxu1  ;;  %v3503_v10 = vadd.f32 %v8963_v7, %v3359_v6  ;;  %v10055_v1 = vpop.f32.mrb[127].mxu0  ;;  %v10064_v50 = vmul.f32 0.01, %v10000_v21  ;;  %v10067_v39 = vadd.f32 %v8976_v62, %v2362_v18  ;;  %v10073_v7 = vsel %vm2561_vm9, %v9874_v11, %v9940_v55  ;;  %v11334_v18 = vld [vmem:[#allocation15_spill] sm:$0xff]  ;;  %v7794_v20 = vld [vmem:[%s11010_s3 + $0x1b8] sm:$0xff]  }
 0x2fb   : > { %11330 = vst [vmem:[#allocation83_spill] sm:$0xff] %v10044_v15  ;;  %11331 = vst [vmem:[#allocation84_spill] sm:$0xff] %v10055_v1  ;;  %v3629_v15 = vmul.f32 0.01, %v3501_v57  ;;  %vm2569_vm12 = vcmp.gt.f32.partialorder %v10035_v48, 0.0  ;;  %vm2570_vm13 = vcmp.gt.f32.partialorder %v10047_v17, 0.0  ;;  %v10088_v11 = vadd.f32 %v8971_v52, %v2364_v31 }
 0x2fc   : > { %v2633_v56 = vmul.f32 0.01, %v10035_v48  ;;  %vm3565_vm5 = vcmp.gt.f32.partialorder %v3501_v57, 0.0  ;;  %vm3567_vm8 = vcmp.gt.f32.partialorder %v3503_v10, 0.0  ;;  %v3631_v55 = vmul.f32 0.01, %v3503_v10 }
 0x2fd   : > { %5516 = vmatmul.mubr.bf16.gmra.mrb[232].mxu0 %v11333_v44  ;;  %v2366_v6 = vpop.f32.mrb[63].mxu1  ;;  %6600 = vmatmul.mubr.msk.bf16.gmra.mrb[104].mxu1 %vm619_vm0, %v11334_v18  ;;  %v11335_v1 = vpack.c.bf16 %v9928_v60, %v9949_v12  ;;  %v10099_v59 = vsel %vm2558_vm10, %v9820_v16, %v9860_v37  ;;  %v7793_v52 = vld [vmem:[%s11010_s3 + $0x1f8] sm:$0xff]   ;;  %v10108_v31 = vmul.f32 0.01, %v10047_v17  ;;  %v2727_v12 = vpack.c.bf16 %v10073_v7, %v10061_v43  ;;  %v11338_v7 = vld [vmem:[#allocation51_spill] sm:$0xff] }
 0x2fe   : > { %v2509_v60 = vadd.f32 %v8976_v62, %v2366_v6  ;;  %4307 = vmatprep.mubr.bf16.mxu1 %v11135_v35  ;;  %v10118_v16 = vsel %vm2560_vm11, %v9871_v34, %v9931_v30  ;;  %vm3522_vm10 = vcmp.gt.f32.partialorder %v9383_v0, 0.0  ;;  %vm3524_vm6 = vcmp.gt.f32.partialorder %v9394_v58, 0.0  ;;  %7188 = vmatprep.subr.bf16.mxu1 %v7793_v52 }
 0x2ff   : > { %5523 = vmatprep.mubr.bf16.mxu0 %v11335_v1  ;;  %v10125_v62 = vsel %vm3565_vm5, %v3501_v57, %v3629_v15  ;;  %vm2571_vm7 = vcmp.gt.f32.partialorder %v10067_v39, 0.0  ;;  %v10129_v37 = vsel %vm3567_vm8, %v3503_v10, %v3631_v55  ;;  %v6854_v1 = vpop.f32.mrb[128].mxu0  ;;  %v2635_v30 = vmul.f32 0.01, %v10067_v39  ;;  %7189 = vmatpush3.bf16.msra.mxu1 %v7794_v20  ;;  %v11337_v10 = vld [vmem:[#allocation40_spill] sm:$0xff] }
 0x300   : > { %11336 = vst [vmem:[#allocation28_spill] sm:$0xff] %v10125_v62  ;;  %vm2572_vm11 = vcmp.gt.f32.partialorder %v10088_v11, 0.0  ;;  %v2636_v43 = vmul.f32 0.01, %v10088_v11  ;;  %v6855_v57 = vpop.f32.mrb[129].mxu0  ;;  %vm3530_vm5 = vcmp.gt.f32.partialorder %v9457_v3, 0.0  ;;  %v10148_v18 = vsel %vm2563_vm14, %v9920_v63, %v9966_v40 }
 0x301   : > { %v2637_v44 = vmul.f32 0.01, %v2509_v60  ;;  %v10142_v55 = vadd.f32 %v6855_v57, %v6854_v1  ;;  %v6857_v6 = vpop.f32.mrb[130].mxu0  ;;  %v10154_v52 = vsel %vm2565_vm15, %v9956_v2, %v9997_v29  ;;  %vm2573_vm8 = vcmp.gt.f32.partialorder %v2509_v60, 0.0  ;;  %v11339_v2 = vld [vmem:[#allocation53_spill] sm:$0xff]  ;;  %v11340_v40 = vld [vmem:[#allocation52_spill] sm:$0xff] }
 0x302   : > { %v6858_v20 = vpop.f32.mrb[131].mxu0  ;;  %v10162_v1 = vsel %vm2562_vm1, %v9910_v4, %v9963_v49  ;;  %v10168_v63 = vsel %vm2564_vm2, %v9943_v19, %v9984_v22  ;;  %vm3538_vm14 = vcmp.gt.f32.partialorder %v9609_v9, 0.0  ;;  %vm3540_vm15 = vcmp.gt.f32.partialorder %v11339_v2, 0.0  ;;  %v11341_v19 = vld [vmem:[#allocation61_spill] sm:$0xff]  ;;  %v11342_v57 = vld [vmem:[#allocation62_spill] sm:$0xff]  ;;  %v11364_v4 = vld [vmem:[#allocation84_spill] sm:$0xff] }
 0x303   : > { %vm3542_vm4 = vcmp.gt.f32.partialorder %v11340_v40, 0.0  ;;  %vm3544_vm9 = vcmp.gt.f32.partialorder %v9669_v27, 0.0  ;;  %v10174_v29 = vadd.f32 %v6858_v20, %v6857_v6  ;;  %v10182_v49 = vsel %vm2567_vm3, %v9978_v46, %v10041_v32 }
 0x304   : > { %v10187_v22 = vsel %vm2569_vm12, %v10035_v48, %v2633_v56  ;;  %v10193_v6 = vadd.f32 %v9136_v14, %v10037_v24  ;;  %v11343_v20 = vpack.c.bf16 %v10013_v23, %v10007_v36  ;;  %vm11344_vm3 = vcmp.gt.f32.partialorder %v9975_v53, 0.0  ;;  %v11346_v24 = vld [vmem:[#allocation67_spill] sm:$0xff]  ;;  %v11347_v23 = vld [vmem:[#allocation16_spill] sm:$0xff] }
 0x305   : > { %v10204_v48 = vsel %vm11344_vm3, %v9975_v53, %v10029_v25  ;;  %vm11345_vm12 = vcmp.gt.f32.partialorder %v10000_v21, 0.0  ;;  %vm3550_vm2 = vcmp.gt.f32.partialorder %v9770_v38, 0.0  ;;  %vm3552_vm1 = vcmp.gt.f32.partialorder %v11346_v24, 0.0  ;;  %6601 = vmatmul.mubr.msk.bf16.gmra.mrb[108].mxu1 %vm619_vm0, %v11347_v23  ;;  %v11357_v53 = vld [vmem:[#allocation80_spill] sm:$0xff] }
 0x306   : > { %5524 = vmatmul.mubr.bf16.gmra.mrb[236].mxu0 %v11343_v20  ;;  %v10210_v32 = vsel %vm11345_vm12, %v10000_v21, %v10064_v50  ;;  %v10215_v36 = vmul.f32 0.01, %v10052_v28  ;;  %v10224_v25 = vsel %vm2571_vm7, %v10067_v39, %v2635_v30  ;;  %v10227_v21 = vsel %vm2573_vm8, %v2509_v60, %v2637_v44  ;;  %4317 = vmatprep.mubr.bf16.mxu1 %v11135_v35  ;;  %v11348_v60 = vld [vmem:[#allocation71_spill] sm:$0xff]  ;;  %v11350_v44 = vld [vmem:[#allocation77_spill] sm:$0xff] }
 0x307   : > { %5531 = vmatprep.mubr.bf16.mxu0 %v2727_v12  ;;  %vm3554_vm3 = vcmp.gt.f32.partialorder %v9851_v41, 0.0  ;;  %v10238_v56 = vsel %vm2570_vm13, %v10047_v17, %v10108_v31  ;;  %v10243_v39 = vsel %vm2572_vm11, %v10088_v11, %v2636_v43  ;;  %v11349_v12 = vld [vmem:[#allocation73_spill] sm:$0xff]  ;;  %v6860_v20 = vpop.f32.mrb[132].mxu0  ;;  %vm11352_vm13 = vcmp.gt.f32.partialorder %v11332_v33, 0.0  ;;  %v11353_v31 = vld [vmem:[#allocation31_spill] sm:$0xff]  ;;  %v11355_v43 = vld [vmem:[#allocation36_spill] sm:$0xff] }
 0x308   : > { %v11351_v50 = vld [vmem:[#allocation33_spill] sm:$0xff]  ;;  %vm11354_vm11 = vcmp.gt.f32.partialorder %v9247_v5, 0.0  ;;  %vm11356_vm8 = vcmp.gt.f32.partialorder %v9285_v54, 0.0  ;;  %vm3562_vm7 = vcmp.gt.f32.partialorder %v11357_v53, 0.0  ;;  %vm3564_vm12 = vcmp.gt.f32.partialorder %v10052_v28, 0.0  ;;  %v6861_v23 = vpop.f32.mrb[133].mxu0 }
 0x309   : > { %v10255_v17 = vsel %vm11352_vm13, %v11332_v33, %v11351_v50  ;;  %v10261_v11 = vsel %vm11354_vm11, %v9247_v5, %v11353_v31  ;;  %v10267_v30 = vsel %vm11356_vm8, %v9285_v54, %v11355_v43  ;;  %v11358_v50 = vld [vmem:[#allocation34_spill] sm:$0xff]  ;;  %vm11359_vm13 = vcmp.gt.f32.partialorder %v9289_v26, 0.0  ;;  %v11360_v31 = vld [vmem:[#allocation12_spill] sm:$0xff]  ;;  %v6863_v34 = vpop.f32.mrb[134].mxu0 }
 0x30a   : > { %v10277_v5 = vsel %vm11359_vm13, %v9289_v26, %v11358_v50  ;;  %vm11361_vm11 = vcmp.gt.f32.partialorder %v9293_v42, 0.0  ;;  %v11362_v43 = vld [vmem:[#allocation38_spill] sm:$0xff]  ;;  %vm11363_vm8 = vcmp.gt.f32.partialorder %v9371_v47, 0.0  ;;  %v3504_v33 = vadd.f32 %v9136_v14, %v11364_v4  ;;  %v11367_v4 = vld [vmem:[#allocation41_spill] sm:$0xff] }
 0x30b   : > { %v10283_v54 = vsel %vm11361_vm11, %v9293_v42, %v11360_v31  ;;  %v10289_v46 = vsel %vm11363_vm8, %v9371_v47, %v11362_v43  ;;  %v10293_v15 = vadd.f32 %v6861_v23, %v6860_v20  ;;  %v3702_v26 = vpack.c.bf16 %v10277_v5, %v10267_v30  ;;  %v6864_v42 = vpop.f32.mrb[135].mxu0  ;;  %v11365_v31 = vld [vmem:[#allocation13_spill] sm:$0xff]  ;;  %v11366_v47 = vld [vmem:[#allocation43_spill] sm:$0xff]  ;;  %v11369_v23 = vld [vmem:[#allocation42_spill] sm:$0xff] }
 0x30c   : > { %v3704_v50 = vpack.c.bf16 %v10289_v46, %v10283_v54  ;;  %v10303_v62 = vsel %vm3522_vm10, %v9383_v0, %v11365_v31  ;;  %v10309_v14 = vsel %vm3524_vm6, %v9394_v58, %v11366_v47  ;;  %vm11368_vm13 = vcmp.gt.f32.partialorder %v9437_v8, 0.0  ;;  %v11372_v47 = vld [vmem:[#allocation47_spill] sm:$0xff]  ;;  %v11390_v31 = vld [vmem:[#allocation72_spill] sm:$0xff]  ;;  %v11391_v58 = vld [vmem:[#allocation74_spill] sm:$0xff] }
 0x30d   : > { %v10315_v20 = vsel %vm11368_vm13, %v9437_v8, %v11367_v4  ;;  %vm11370_vm11 = vcmp.gt.f32.partialorder %v9441_v13, 0.0  ;;  %vm3566_vm10 = vcmp.gt.f32.partialorder %v10193_v6, 0.0  ;;  %v10324_v0 = vadd.f32 %v6864_v42, %v6863_v34  ;;  %v11373_v4 = vld [vmem:[#allocation44_spill] sm:$0xff] }
 0x30e   : > { %v10321_v43 = vsel %vm11370_vm11, %v9441_v13, %v11369_v23  ;;  %v11371_v8 = vpack.c.bf16 %v10118_v16, %v10099_v59  ;;  %v10337_v13 = vsel %vm3530_vm5, %v9457_v3, %v11372_v47  ;;  %vm11374_vm6 = vcmp.gt.f32.partialorder %v11337_v10, 0.0  ;;  %v11375_v42 = vld [vmem:[#allocation48_spill] sm:$0xff]  ;;  %v11377_v59 = vld [vmem:[#allocation55_spill] sm:$0xff] }
 0x30f   : > { %v10343_v34 = vsel %vm11374_vm6, %v11337_v10, %v11373_v4  ;;  %vm11376_vm8 = vcmp.gt.f32.partialorder %v9548_v45, 0.0  ;;  %vm11378_vm13 = vcmp.gt.f32.partialorder %v11338_v7, 0.0  ;;  %v3630_v3 = vmul.f32 0.01, %v10193_v6 }
 0x310   : > { %5532 = vmatmul.mubr.bf16.gmra.mrb[240].mxu0 %v11371_v8  ;;  %v10349_v23 = vsel %vm11376_vm8, %v9548_v45, %v11375_v42  ;;  %v10355_v16 = vsel %vm11378_vm13, %v11338_v7, %v11377_v59  ;;  %vm3568_vm5 = vcmp.gt.f32.partialorder %v3504_v33, 0.0  ;;  %v11379_v8 = vld [vmem:[#allocation17_spill] sm:$0xff]  ;;  %v11380_v10 = vpack.c.bf16 %v10154_v52, %v10148_v18  ;;  %v11381_v7 = vld [vmem:[#allocation54_spill] sm:$0xff]  ;;  %v11383_v52 = vld [vmem:[#allocation59_spill] sm:$0xff] }
 0x311   : > { %6602 = vmatmul.mubr.msk.bf16.gmra.mrb[112].mxu1 %vm619_vm0, %v11379_v8  ;;  %v10372_v4 = vsel %vm3538_vm14, %v9609_v9, %v11381_v7  ;;  %v11382_v42 = vld [vmem:[#allocation58_spill] sm:$0xff]  ;;  %v10384_v59 = vsel %vm3542_vm4, %v11340_v40, %v11383_v52  ;;  %v11384_v8 = vld [vmem:[#allocation60_spill] sm:$0xff]  ;;  %v6866_v9 = vpop.f32.mrb[136].mxu0  ;;  %vm11386_vm14 = vcmp.gt.f32.partialorder %v11341_v19, 0.0  ;;  %vm11388_vm4 = vcmp.gt.f32.partialorder %v11342_v57, 0.0 }
 0x312   : > { %5539 = vmatprep.mubr.bf16.mxu0 %v11380_v10  ;;  %4327 = vmatprep.mubr.bf16.mxu1 %v11135_v35  ;;  %v10378_v18 = vsel %vm3540_vm15, %v11339_v2, %v11382_v42  ;;  %v10390_v10 = vsel %vm3544_vm9, %v9669_v27, %v11384_v8  ;;  %v11385_v42 = vld [vmem:[#allocation65_spill] sm:$0xff]  ;;  %v11387_v40 = vld [vmem:[#allocation66_spill] sm:$0xff]  ;;  %v3632_v27 = vmul.f32 0.01, %v3504_v33  ;;  %v6867_v8 = vpop.f32.mrb[137].mxu0  ;;  %v10430_v7 = vsel %vm3554_vm3, %v9851_v41, %v11391_v58 }
 0x313   : > { %v10400_v47 = vsel %vm11386_vm14, %v11341_v19, %v11385_v42  ;;  %v10406_v52 = vsel %vm11388_vm4, %v11342_v57, %v11387_v40  ;;  %v11389_v45 = vld [vmem:[#allocation70_spill] sm:$0xff]  ;;  %v10420_v19 = vsel %vm3552_vm1, %v11346_v24, %v11390_v31  ;;  %v10422_v42 = vadd.f32 %v6867_v8, %v6866_v9  ;;  %v6869_v57 = vpop.f32.mrb[138].mxu0  ;;  %v11394_v9 = vld [vmem:[#allocation79_spill] sm:$0xff] }
 0x314   : > { %v10414_v2 = vsel %vm3550_vm2, %v9770_v38, %v11389_v45  ;;  %v11392_v38 = vld [vmem:[#allocation78_spill] sm:$0xff]  ;;  %vm11393_vm9 = vcmp.gt.f32.partialorder %v9907_v61, 0.0  ;;  %v6870_v24 = vpop.f32.mrb[139].mxu0  ;;  %vm11395_vm15 = vcmp.gt.f32.partialorder %v11350_v44, 0.0  ;;  %vm11397_vm1 = vcmp.gt.f32.partialorder %v9969_v51, 0.0 }
 0x315   : > { %v10436_v45 = vsel %vm11393_vm9, %v9907_v61, %v11392_v38  ;;  %v10444_v8 = vsel %vm11395_vm15, %v11350_v44, %v11394_v9  ;;  %v11396_v40 = vld [vmem:[#allocation14_spill] sm:$0xff]  ;;  %v10452_v58 = vadd.f32 %v6870_v24, %v6869_v57  ;;  %v11398_v38 = vld [vmem:[#allocation83_spill] sm:$0xff]  ;;  %v10466_v44 = vsel %vm3564_vm12, %v10052_v28, %v10215_v36 }
 0x316   : > { %v10450_v41 = vsel %vm11397_vm1, %v9969_v51, %v11396_v40  ;;  %v10460_v31 = vsel %vm3562_vm7, %v11357_v53, %v11398_v38  ;;  %v11399_v51 = vpack.c.bf16 %v10168_v63, %v10162_v1  ;;  %v10476_v40 = vsel %vm3566_vm10, %v10193_v6, %v3630_v3  ;;  %v11400_v24 = vld [vmem:[#allocation18_spill] sm:$0xff]  ;;  %v11403_v38 = vld [vmem:[#allocation19_spill] sm:$0xff] }
 0x317   : > { %v10479_v53 = vsel %vm3568_vm5, %v3504_v33, %v3632_v27  ;;  %v11401_v28 = vpack.c.bf16 %v10187_v22, %v10182_v49  ;;  %v6872_v63 = vpop.f32.mrb[140].mxu0  ;;  %v11402_v27 = vpack.c.bf16 %v10210_v32, %v10204_v48  ;;  %v11404_v49 = vpack.c.bf16 %v10227_v21, %v10224_v25  ;;  %v11406_v32 = vld [vmem:[#allocation20_spill] sm:$0xff] }
 0x318   : > { %5540 = vmatmul.mubr.bf16.gmra.mrb[244].mxu0 %v11399_v51  ;;  %v6873_v36 = vpop.f32.mrb[141].mxu0  ;;  %v11405_v48 = vpack.c.bf16 %v10243_v39, %v10238_v56  ;;  %v11407_v25 = vpack.c.bf16 %v11349_v12, %v11348_v60  ;;  %v11411_v56 = vpack.c.bf16 %v10261_v11, %v10255_v17 }
 0x319   : > { %6603 = vmatmul.mubr.msk.bf16.gmra.mrb[116].mxu1 %vm619_vm0, %v11400_v24  ;;  %5547 = vmatprep.mubr.bf16.mxu0 %v11401_v28  ;;  %v10489_v9 = vadd.f32 %v6873_v36, %v6872_v63  ;;  %v6875_v6 = vpop.f32.mrb[142].mxu0 }
 0x31a   : > { %4337 = vmatprep.mubr.bf16.mxu1 %v11135_v35  ;;  %v6876_v3 = vpop.f32.mrb[143].mxu0 }
 0x31b   : > { %v10491_v33 = vadd.f32 %v6876_v3, %v6875_v6 }
 0x31f   : > { %v6878_v22 = vpop.f32.mrb[144].mxu0 }
 0x320   : > { %5548 = vmatmul.mubr.bf16.gmra.mrb[248].mxu0 %v11402_v27  ;;  %v6879_v51 = vpop.f32.mrb[145].mxu0 }
 0x321   : > { %6604 = vmatmul.mubr.msk.bf16.gmra.mrb[120].mxu1 %vm619_vm0, %v11403_v38  ;;  %5555 = vmatprep.mubr.bf16.mxu0 %v11404_v49  ;;  %v10502_v24 = vadd.f32 %v6879_v51, %v6878_v22  ;;  %v6881_v28 = vpop.f32.mrb[146].mxu0  ;;  %v11408_v49 = vld [vmem:[#allocation7_spill] sm:$0xff] }
 0x322   : > { %4347 = vmatprep.mubr.bf16.mxu1 %v11135_v35  ;;  %v6882_v63 = vpop.f32.mrb[147].mxu0  ;;  %v11409_v22 = vld [vmem:[#allocation23_spill] sm:$0xff] }
 0x323   : > { %v10504_v36 = vadd.f32 %v6882_v63, %v6881_v28  ;;  %v11410_v51 = vpack.c.bf16 %v11408_v49, %v11409_v22  ;;  %v11415_v22 = vld [vmem:[#allocation24_spill] sm:$0xff] }
 0x327   : > { %v6884_v35 = vpop.f32.mrb[148].mxu0 }
 0x328   : > { %5556 = vmatmul.mubr.bf16.gmra.mrb[252].mxu0 %v11405_v48  ;;  %v6885_v21 = vpop.f32.mrb[149].mxu0 }
 0x329   : > { %6605 = vmatmul.mubr.msk.bf16.gmra.mrb[124].mxu1 %vm619_vm0, %v11406_v32  ;;  %5596 = vmatprep.mubr.bf16.mxu0 %v11407_v25  ;;  %v10514_v6 = vadd.f32 %v6885_v21, %v6884_v35  ;;  %v6887_v3 = vpop.f32.mrb[150].mxu0  ;;  %v11412_v32 = vld [vmem:[#allocation25_spill] sm:$0xff]  ;;  %v11413_v25 = vld [vmem:[#allocation27_spill] sm:$0xff] }
 0x32a   : > { %v6888_v27 = vpop.f32.mrb[151].mxu0  ;;  %v11414_v35 = vpack.c.bf16 %v11412_v32, %v11413_v25  ;;  %v11419_v32 = vld [vmem:[#allocation8_spill] sm:$0xff] }
 0x32b   : > { %v10516_v38 = vadd.f32 %v6888_v27, %v6887_v3 }
 0x32f   : > { %v6890_v39 = vpop.f32.mrb[152].mxu0 }
 0x330   : > { %5597 = vmatmul.mubr.bf16.vlgmr.msra.gmra.mrb[0].mxu0 %v11410_v51  ;;  %v6891_v28 = vpop.f32.mrb[153].mxu0  ;;  %v11416_v51 = vld [vmem:[#allocation26_spill] sm:$0xff] }
 0x331   : > { %5604 = vmatprep.mubr.bf16.mxu0 %v11411_v56  ;;  %v10524_v60 = vadd.f32 %v6891_v28, %v6890_v39  ;;  %v6893_v12 = vpop.f32.mrb[154].mxu0  ;;  %v11417_v56 = vpack.c.bf16 %v11415_v22, %v11416_v51  ;;  %v11423_v22 = vld [vmem:[#allocation29_spill] sm:$0xff] }
 0x332   : > { %v6894_v63 = vpop.f32.mrb[155].mxu0 }
 0x333   : > { %v10526_v48 = vadd.f32 %v6894_v63, %v6893_v12  ;;  %v11418_v63 = vld [vmem:[#allocation9_spill] sm:$0xff] }
 0x334   : > { %v11420_v25 = vpack.c.bf16 %v11418_v63, %v11419_v32  ;;  %v11426_v63 = vld [vmem:[#allocation32_spill] sm:$0xff]  ;;  %v11427_v32 = vld [vmem:[#allocation10_spill] sm:$0xff] }
 0x337   : > { %v6896_v21 = vpop.f32.mrb[156].mxu0 }
 0x338   : > { %5605 = vmatmul.mubr.bf16.gmra.mrb[4].mxu0 %v11414_v35  ;;  %v6897_v3 = vpop.f32.mrb[157].mxu0  ;;  %v11421_v35 = vpack.c.bf16 %v10309_v14, %v10303_v62 }
 0x339   : > { %5612 = vmatprep.mubr.bf16.mxu0 %v3702_v26  ;;  %v10534_v17 = vadd.f32 %v6897_v3, %v6896_v21  ;;  %v6899_v11 = vpop.f32.mrb[158].mxu0 }
 0x33a   : > { %v6900_v27 = vpop.f32.mrb[159].mxu0 }
 0x33b   : > { %v10536_v49 = vadd.f32 %v6900_v27, %v6899_v11  ;;  %v11422_v27 = vld [vmem:[#allocation30_spill] sm:$0xff] }
 0x33c   : > { %v11424_v51 = vpack.c.bf16 %v11422_v27, %v11423_v22  ;;  %v11430_v27 = vld [vmem:[#allocation35_spill] sm:$0xff] }
 0x33d   : > { %v11431_v22 = vld [vmem:[#allocation11_spill] sm:$0xff] }
 0x33f   : > { %v6902_v39 = vpop.f32.mrb[160].mxu0 }
 0x340   : > { %5613 = vmatmul.mubr.bf16.gmra.mrb[8].mxu0 %v11417_v56  ;;  %v6903_v28 = vpop.f32.mrb[161].mxu0  ;;  %v11425_v56 = vpack.c.bf16 %v10321_v43, %v10315_v20 }
 0x341   : > { %5620 = vmatprep.mubr.bf16.mxu0 %v3704_v50  ;;  %v10544_v30 = vadd.f32 %v6903_v28, %v6902_v39  ;;  %v6905_v5 = vpop.f32.mrb[162].mxu0 }
 0x342   : > { %v6906_v26 = vpop.f32.mrb[163].mxu0 }
 0x343   : > { %v10546_v12 = vadd.f32 %v6906_v26, %v6905_v5 }
 0x347   : > { %v6908_v21 = vpop.f32.mrb[164].mxu0 }
 0x348   : > { %5621 = vmatmul.mubr.bf16.gmra.mrb[12].mxu0 %v11420_v25  ;;  %v6909_v3 = vpop.f32.mrb[165].mxu0  ;;  %v11428_v25 = vpack.c.bf16 %v11426_v63, %v11427_v32  ;;  %v11434_v63 = vld [vmem:[#allocation37_spill] sm:$0xff]  ;;  %v11435_v32 = vld [vmem:[#allocation39_spill] sm:$0xff] }
 0x349   : > { %5628 = vmatprep.mubr.bf16.mxu0 %v11421_v35  ;;  %v10554_v46 = vadd.f32 %v6909_v3, %v6908_v21  ;;  %v6911_v54 = vpop.f32.mrb[166].mxu0  ;;  %v11429_v35 = vpack.c.bf16 %v10343_v34, %v10337_v13 }
 0x34a   : > { %v6912_v50 = vpop.f32.mrb[167].mxu0 }
 0x34b   : > { %v10556_v11 = vadd.f32 %v6912_v50, %v6911_v54 }
 0x34f   : > { %v6914_v39 = vpop.f32.mrb[168].mxu0 }
 0x350   : > { %5629 = vmatmul.mubr.bf16.gmra.mrb[16].mxu0 %v11424_v51  ;;  %v6915_v28 = vpop.f32.mrb[169].mxu0  ;;  %v11432_v51 = vpack.c.bf16 %v11430_v27, %v11431_v22  ;;  %v11438_v27 = vld [vmem:[#allocation46_spill] sm:$0xff]  ;;  %v11439_v22 = vld [vmem:[#allocation45_spill] sm:$0xff] }
 0x351   : > { %5636 = vmatprep.mubr.bf16.mxu0 %v11425_v56  ;;  %v10564_v62 = vadd.f32 %v6915_v28, %v6914_v39  ;;  %v6917_v14 = vpop.f32.mrb[170].mxu0  ;;  %v11433_v56 = vpack.c.bf16 %v10355_v16, %v10349_v23 }
 0x352   : > { %v6918_v5 = vpop.f32.mrb[171].mxu0 }
 0x353   : > { %v10566_v26 = vadd.f32 %v6918_v5, %v6917_v14 }
 0x357   : > { %v6920_v21 = vpop.f32.mrb[172].mxu0 }
 0x358   : > { %5637 = vmatmul.mubr.bf16.gmra.mrb[20].mxu0 %v11428_v25  ;;  %v6921_v3 = vpop.f32.mrb[173].mxu0  ;;  %v11436_v25 = vpack.c.bf16 %v11434_v63, %v11435_v32  ;;  %v11442_v63 = vld [vmem:[#allocation50_spill] sm:$0xff]  ;;  %v11443_v32 = vld [vmem:[#allocation49_spill] sm:$0xff] }
 0x359   : > { %5644 = vmatprep.mubr.bf16.mxu0 %v11429_v35  ;;  %v10574_v20 = vadd.f32 %v6921_v3, %v6920_v21  ;;  %v6923_v43 = vpop.f32.mrb[174].mxu0  ;;  %v11437_v35 = vpack.c.bf16 %v10378_v18, %v10372_v4 }
 0x35a   : > { %v6924_v54 = vpop.f32.mrb[175].mxu0 }
 0x35b   : > { %v10576_v50 = vadd.f32 %v6924_v54, %v6923_v43 }
 0x35f   : > { %v6926_v39 = vpop.f32.mrb[176].mxu0 }
 0x360   : > { %5645 = vmatmul.mubr.bf16.gmra.mrb[24].mxu0 %v11432_v51  ;;  %v6927_v28 = vpop.f32.mrb[177].mxu0  ;;  %v11440_v51 = vpack.c.bf16 %v11438_v27, %v11439_v22  ;;  %v11447_v22 = vld [vmem:[#allocation57_spill] sm:$0xff] }
 0x361   : > { %5652 = vmatprep.mubr.bf16.mxu0 %v11433_v56  ;;  %v10584_v13 = vadd.f32 %v6927_v28, %v6926_v39  ;;  %v6929_v34 = vpop.f32.mrb[178].mxu0  ;;  %v11441_v56 = vpack.c.bf16 %v10390_v10, %v10384_v59 }
 0x362   : > { %v6930_v14 = vpop.f32.mrb[179].mxu0 }
 0x363   : > { %v10586_v5 = vadd.f32 %v6930_v14, %v6929_v34 }
 0x367   : > { %v6932_v21 = vpop.f32.mrb[180].mxu0 }
 0x368   : > { %5653 = vmatmul.mubr.bf16.gmra.mrb[28].mxu0 %v11436_v25  ;;  %v6933_v3 = vpop.f32.mrb[181].mxu0  ;;  %v11444_v25 = vpack.c.bf16 %v11442_v63, %v11443_v32 }
 0x369   : > { %5660 = vmatprep.mubr.bf16.mxu0 %v11437_v35  ;;  %v10594_v23 = vadd.f32 %v6933_v3, %v6932_v21  ;;  %v6935_v16 = vpop.f32.mrb[182].mxu0  ;;  %v11445_v35 = vpack.c.bf16 %v10406_v52, %v10400_v47  ;;  %v11450_v47 = vpack.c.bf16 %v10420_v19, %v10414_v2  ;;  %v11451_v52 = vld [vmem:[#allocation21_spill] sm:$0xff] }
 0x36a   : > { %v6936_v43 = vpop.f32.mrb[183].mxu0 }
 0x36b   : > { %v10596_v54 = vadd.f32 %v6936_v43, %v6935_v16  ;;  %v6606_v43 = vld [vmem:[%s11011_s4 + $0x3] ss:$4 sm:$0x3] }
 0x36f   : > { %v6938_v39 = vpop.f32.mrb[184].mxu0 }
 0x370   : > { %5661 = vmatmul.mubr.bf16.gmra.mrb[32].mxu0 %v11440_v51  ;;  %v6939_v28 = vpop.f32.mrb[185].mxu0  ;;  %v11448_v51 = vld [vmem:[#allocation56_spill] sm:$0xff] }
 0x371   : > { %5668 = vmatprep.mubr.bf16.mxu0 %v11441_v56  ;;  %v10604_v4 = vadd.f32 %v6939_v28, %v6938_v39  ;;  %v6941_v18 = vpop.f32.mrb[186].mxu0  ;;  %v11449_v56 = vpack.c.bf16 %v11447_v22, %v11448_v51  ;;  %v10628_v39 = vrot.slane %v6606_v43, %v11451_v52  ;;  %v10631_v28 = vld [vmem:[%s7902_s7] ss:$0 sm:$0xff] }
 0x372   : > { %v6942_v34 = vpop.f32.mrb[187].mxu0  ;;  %v5280_v51 = vadd.f32 %v10174_v29, %v10631_v28  ;;  %v11457_v29 = vpack.c.bf16 %v10436_v45, %v10430_v7 }
 0x373   : > { %v10606_v14 = vadd.f32 %v6942_v34, %v6941_v18  ;;  %v11452_v18 = vld [vmem:[#allocation22_spill] sm:$0xff] }
 0x374   : > { %v10634_v34 = vrot.slane %v6606_v43, %v11452_v18 }
 0x377   : > { %v6944_v21 = vpop.f32.mrb[188].mxu0 }
 0x378   : > { %5669 = vmatmul.mubr.bf16.gmra.mrb[36].mxu0 %v11444_v25  ;;  %v6945_v59 = vpop.f32.mrb[189].mxu0 }
 0x379   : > { %5676 = vmatprep.mubr.bf16.mxu0 %v11445_v35  ;;  %v10614_v10 = vadd.f32 %v6945_v59, %v6944_v21  ;;  %v6947_v3 = vpop.f32.mrb[190].mxu0  ;;  %v5277_v35 = vadd.f32 %v10142_v55, %v10631_v28 }
 0x37a   : > { %v6948_v16 = vpop.f32.mrb[191].mxu0 }
 0x37b   : > { %v10619_v27 = vadd.f32 %v6948_v16, %v6947_v3 }
 0x37d   : > { %11446 = vst [vmem:[#allocation15_spill] sm:$0xff] %v10619_v27 }
 0x37f   : > { %v6966_v63 = vpop.f32.mrb[192].mxu0 }
 0x380   : > { %5677 = vmatmul.mubr.bf16.gmra.mrb[40].mxu0 %v11449_v56  ;;  %v4199_v32 = vpop.f32.mrb[64].mxu1  ;;  %v6967_v25 = vpop.f32.mrb[193].mxu0 }
 0x381   : > { %5684 = vmatprep.mubr.bf16.mxu0 %v11450_v47  ;;  %v4435_v21 = vadd.f32 %v10628_v39, %v4199_v32  ;;  %v4201_v59 = vpop.f32.mrb[65].mxu1  ;;  %v6968_v3 = vadd.f32 %v6967_v25, %v6966_v63  ;;  %v6969_v2 = vpop.f32.mrb[194].mxu0  ;;  %v11454_v63 = vld [vmem:[#allocation64_spill] sm:$0xff]  ;;  %v11455_v25 = vld [vmem:[#allocation63_spill] sm:$0xff] }
 0x382   : > { %v4436_v19 = vadd.f32 %v10634_v34, %v4201_v59  ;;  %v4203_v16 = vpop.f32.mrb[66].mxu1  ;;  %v6970_v22 = vpop.f32.mrb[195].mxu0  ;;  %v11456_v1 = vpack.c.bf16 %v11454_v63, %v11455_v25 }
 0x383   : > { %v4563_v43 = vmul.f32 0.01, %v4435_v21  ;;  %v10642_v56 = vadd.f32 %v6968_v3, %v5277_v35  ;;  %v4437_v47 = vadd.f32 %v10628_v39, %v4203_v16  ;;  %v4205_v52 = vpop.f32.mrb[67].mxu1  ;;  %vm4499_vm0 = vcmp.gt.f32.partialorder %v4435_v21, 0.0 }
 0x384   : > { %v4564_v55 = vmul.f32 0.01, %v4436_v19  ;;  %v4438_v18 = vadd.f32 %v10634_v34, %v4205_v52  ;;  %v6971_v32 = vadd.f32 %v6970_v22, %v6969_v2  ;;  %vm4500_vm2 = vcmp.gt.f32.partialorder %v4436_v19, 0.0 }
 0x385   : > { %11453 = vst [vmem:[#allocation40_spill] sm:$0xff] %v10642_v56  ;;  %vm4501_vm3 = vcmp.gt.f32.partialorder %v4437_v47, 0.0  ;;  %v4565_v59 = vmul.f32 0.01, %v4437_v47  ;;  %v4627_v16 = vsel %vm4499_vm0, %v4435_v21, %v4563_v43 }
 0x386   : > { %vm4502_vm12 = vcmp.gt.f32.partialorder %v4438_v18, 0.0  ;;  %v4566_v35 = vmul.f32 0.01, %v4438_v18  ;;  %v10652_v3 = vadd.f32 %v6971_v32, %v5280_v51  ;;  %v4628_v56 = vsel %vm4500_vm2, %v4436_v19, %v4564_v55 }
 0x387   : > { %v4629_v57 = vsel %vm4501_vm3, %v4437_v47, %v4565_v59  ;;  %v6972_v61 = vpop.f32.mrb[196].mxu0 }
 0x388   : > { %5685 = vmatmul.mubr.bf16.gmra.mrb[44].mxu0 %v11456_v1  ;;  %v4691_v52 = vpack.c.bf16 %v4629_v57, %v4627_v16  ;;  %v4209_v2 = vpop.f32.mrb[68].mxu1  ;;  %v6973_v22 = vpop.f32.mrb[197].mxu0  ;;  %v4630_v63 = vsel %vm4502_vm12, %v4438_v18, %v4566_v35  ;;  %v5285_v1 = vadd.f32 %v10293_v15, %v10631_v28  ;;  %v5288_v57 = vadd.f32 %v10324_v0, %v10631_v28 }
 0x389   : > { %5692 = vmatprep.mubr.bf16.mxu0 %v11457_v29  ;;  %v4439_v25 = vadd.f32 %v10628_v39, %v4209_v2  ;;  %v4211_v27 = vpop.f32.mrb[69].mxu1  ;;  %v6974_v7 = vadd.f32 %v6973_v22, %v6972_v61  ;;  %v6975_v45 = vpop.f32.mrb[198].mxu0  ;;  %v4692_v29 = vpack.c.bf16 %v4630_v63, %v4628_v56  ;;  %v11458_v56 = vld [vmem:[#allocation69_spill] sm:$0xff]  ;;  %v11461_v35 = vpack.c.bf16 %v10450_v41, %v10444_v8 }
 0x38a   : > { %v4440_v51 = vadd.f32 %v10634_v34, %v4211_v27  ;;  %v4213_v32 = vpop.f32.mrb[70].mxu1  ;;  %v6976_v21 = vpop.f32.mrb[199].mxu0  ;;  %v11459_v27 = vld [vmem:[#allocation68_spill] sm:$0xff] }
 0x38b   : > { %v4567_v43 = vmul.f32 0.01, %v4439_v25  ;;  %v10660_v47 = vadd.f32 %v6974_v7, %v5285_v1  ;;  %v4441_v19 = vadd.f32 %v10628_v39, %v4213_v32  ;;  %v4215_v55 = vpop.f32.mrb[71].mxu1  ;;  %5757 = vmatprep.mubr.bf16.mxu1 %v4692_v29  ;;  %vm4503_vm7 = vcmp.gt.f32.partialorder %v4439_v25, 0.0 }
 0x38c   : > { %v4568_v15 = vmul.f32 0.01, %v4440_v51  ;;  %v4442_v61 = vadd.f32 %v10634_v34, %v4215_v55  ;;  %v6977_v18 = vadd.f32 %v6976_v21, %v6975_v45  ;;  %5758 = vmatmul.mubr.bf16.vlgmr.msra.gmra.mrb[128].mxu1 %v4691_v52  ;;  %v11460_v59 = vpack.c.bf16 %v11458_v56, %v11459_v27 }
 0x38d   : > { %vm4504_vm11 = vcmp.gt.f32.partialorder %v4440_v51, 0.0  ;;  %vm4505_vm10 = vcmp.gt.f32.partialorder %v4441_v19, 0.0  ;;  %v4569_v0 = vmul.f32 0.01, %v4441_v19  ;;  %v4631_v63 = vsel %vm4503_vm7, %v4439_v25, %v4567_v43 }
 0x38e   : > { %vm4506_vm6 = vcmp.gt.f32.partialorder %v4442_v61, 0.0  ;;  %v4570_v16 = vmul.f32 0.01, %v4442_v61  ;;  %v10670_v2 = vadd.f32 %v6977_v18, %v5288_v57  ;;  %v4632_v45 = vsel %vm4504_vm11, %v4440_v51, %v4568_v15 }
 0x38f   : > { %v6978_v22 = vpop.f32.mrb[200].mxu0  ;;  %v4633_v1 = vsel %vm4505_vm10, %v4441_v19, %v4569_v0  ;;  %v5293_v21 = vadd.f32 %v10422_v42, %v10631_v28  ;;  %v5296_v25 = vadd.f32 %v10452_v58, %v10631_v28 }
 0x390   : > { %5693 = vmatmul.mubr.bf16.gmra.mrb[48].mxu0 %v11460_v59  ;;  %v4219_v7 = vpop.f32.mrb[72].mxu1  ;;  %v6979_v52 = vpop.f32.mrb[201].mxu0  ;;  %v4634_v29 = vsel %vm4506_vm6, %v4442_v61, %v4570_v16  ;;  %v4693_v32 = vpack.c.bf16 %v4633_v1, %v4631_v63  ;;  %v11463_v16 = vld [vmem:[#allocation75_spill] sm:$0xff]  ;;  %v11465_v63 = vpack.c.bf16 %v10466_v44, %v10460_v31 }
 0x391   : > { %5700 = vmatprep.mubr.bf16.mxu0 %v11461_v35  ;;  %v4443_v55 = vadd.f32 %v10628_v39, %v4219_v7  ;;  %v4221_v56 = vpop.f32.mrb[73].mxu1  ;;  %v6980_v8 = vadd.f32 %v6979_v52, %v6978_v22  ;;  %v6981_v41 = vpop.f32.mrb[202].mxu0  ;;  %v4694_v27 = vpack.c.bf16 %v4634_v29, %v4632_v45  ;;  %v11462_v35 = vld [vmem:[#allocation76_spill] sm:$0xff] }
 0x392   : > { %v4444_v57 = vadd.f32 %v10634_v34, %v4221_v56  ;;  %v4223_v18 = vpop.f32.mrb[74].mxu1  ;;  %v6982_v59 = vpop.f32.mrb[203].mxu0  ;;  %v11464_v22 = vpack.c.bf16 %v11462_v35, %v11463_v16 }
 0x393   : > { %v4571_v43 = vmul.f32 0.01, %v4443_v55  ;;  %v10678_v51 = vadd.f32 %v6980_v8, %v5293_v21  ;;  %v4445_v19 = vadd.f32 %v10628_v39, %v4223_v18  ;;  %v4225_v15 = vpop.f32.mrb[75].mxu1  ;;  %5765 = vmatprep.mubr.bf16.mxu1 %v4694_v27  ;;  %vm4507_vm8 = vcmp.gt.f32.partialorder %v4443_v55, 0.0 }
 0x394   : > { %v4572_v42 = vmul.f32 0.01, %v4444_v57  ;;  %v4446_v61 = vadd.f32 %v10634_v34, %v4225_v15  ;;  %v6983_v0 = vadd.f32 %v6982_v59, %v6981_v41  ;;  %5766 = vmatmul.mubr.bf16.gmra.mrb[132].mxu1 %v4693_v32  ;;  %vm4508_vm13 = vcmp.gt.f32.partialorder %v4444_v57, 0.0 }
 0x395   : > { %vm4509_vm5 = vcmp.gt.f32.partialorder %v4445_v19, 0.0  ;;  %v4573_v58 = vmul.f32 0.01, %v4445_v19  ;;  %v4635_v45 = vsel %vm4507_vm8, %v4443_v55, %v4571_v43  ;;  %v5301_v27 = vadd.f32 %v10489_v9, %v10631_v28 }
 0x396   : > { %vm4510_vm14 = vcmp.gt.f32.partialorder %v4446_v61, 0.0  ;;  %v4574_v1 = vmul.f32 0.01, %v4446_v61  ;;  %v10688_v7 = vadd.f32 %v6983_v0, %v5296_v25  ;;  %v4636_v56 = vsel %vm4508_vm13, %v4444_v57, %v4572_v42 }
 0x397   : > { %v6984_v52 = vpop.f32.mrb[204].mxu0  ;;  %v4637_v29 = vsel %vm4509_vm5, %v4445_v19, %v4573_v58  ;;  %v5304_v55 = vadd.f32 %v10491_v33, %v10631_v28  ;;  %v11467_v58 = vld [vmem:[#allocation81_spill] sm:$0xff] }
 0x398   : > { %5701 = vmatmul.mubr.bf16.gmra.mrb[52].mxu0 %v11464_v22  ;;  %v4229_v21 = vpop.f32.mrb[76].mxu1  ;;  %v6985_v32 = vpop.f32.mrb[205].mxu0  ;;  %v4638_v8 = vsel %vm4510_vm14, %v4446_v61, %v4574_v1  ;;  %v4695_v41 = vpack.c.bf16 %v4637_v29, %v4635_v45  ;;  %v11466_v22 = vld [vmem:[#allocation82_spill] sm:$0xff]  ;;  %v11469_v1 = vpack.c.bf16 %v10479_v53, %v10476_v40 }
 0x399   : > { %5708 = vmatprep.mubr.bf16.mxu0 %v11465_v63  ;;  %v4447_v18 = vadd.f32 %v10628_v39, %v4229_v21  ;;  %v4231_v59 = vpop.f32.mrb[77].mxu1  ;;  %v6986_v31 = vadd.f32 %v6985_v32, %v6984_v52  ;;  %v6987_v44 = vpop.f32.mrb[206].mxu0  ;;  %v4696_v15 = vpack.c.bf16 %v4638_v8, %v4636_v56  ;;  %v11468_v63 = vpack.c.bf16 %v11466_v22, %v11467_v58  ;;  %v11470_v22 = vld [vmem:[#allocation28_spill] sm:$0xff] }
 0x39a   : > { %v4448_v25 = vadd.f32 %v10634_v34, %v4231_v59  ;;  %v4233_v0 = vpop.f32.mrb[78].mxu1  ;;  %v6988_v35 = vpop.f32.mrb[207].mxu0  ;;  %v11471_v58 = vpack.c.bf16 %v10129_v37, %v11470_v22 }
 0x39b   : > { %v4575_v43 = vmul.f32 0.01, %v4447_v18  ;;  %v10696_v57 = vadd.f32 %v6986_v31, %v5301_v27  ;;  %v4449_v19 = vadd.f32 %v10628_v39, %v4233_v0  ;;  %v4235_v42 = vpop.f32.mrb[79].mxu1  ;;  %5773 = vmatprep.mubr.bf16.mxu1 %v4696_v15  ;;  %vm4511_vm4 = vcmp.gt.f32.partialorder %v4447_v18, 0.0 }
 0x39c   : > { %v4576_v9 = vmul.f32 0.01, %v4448_v25  ;;  %v4450_v61 = vadd.f32 %v10634_v34, %v4235_v42  ;;  %v6989_v16 = vadd.f32 %v6988_v35, %v6987_v44  ;;  %5774 = vmatmul.mubr.bf16.gmra.mrb[136].mxu1 %v4695_v41  ;;  %vm4512_vm9 = vcmp.gt.f32.partialorder %v4448_v25, 0.0 }
 0x39d   : > { %vm4513_vm15 = vcmp.gt.f32.partialorder %v4449_v19, 0.0  ;;  %v4577_v33 = vmul.f32 0.01, %v4449_v19  ;;  %v4639_v21 = vsel %vm4511_vm4, %v4447_v18, %v4575_v43  ;;  %v5309_v31 = vadd.f32 %v10502_v24, %v10631_v28 }
 0x39e   : > { %vm4514_vm1 = vcmp.gt.f32.partialorder %v4450_v61, 0.0  ;;  %v4578_v52 = vmul.f32 0.01, %v4450_v61  ;;  %v10706_v45 = vadd.f32 %v6989_v16, %v5304_v55  ;;  %v4640_v41 = vsel %vm4512_vm9, %v4448_v25, %v4576_v9 }
 0x39f   : > { %v6990_v29 = vpop.f32.mrb[208].mxu0  ;;  %v4641_v32 = vsel %vm4513_vm15, %v4449_v19, %v4577_v33  ;;  %v5312_v18 = vadd.f32 %v10504_v36, %v10631_v28 }
 0x3a0   : > { %5709 = vmatmul.mubr.bf16.gmra.mrb[56].mxu0 %v11468_v63  ;;  %v4239_v56 = vpop.f32.mrb[80].mxu1  ;;  %v6991_v8 = vpop.f32.mrb[209].mxu0  ;;  %v4642_v27 = vsel %vm4514_vm1, %v4450_v61, %v4578_v52  ;;  %v4697_v59 = vpack.c.bf16 %v4641_v32, %v4639_v21 }
 0x3a1   : > { %5716 = vmatprep.mubr.bf16.mxu0 %v11469_v1  ;;  %v4451_v44 = vadd.f32 %v10628_v39, %v4239_v56  ;;  %v4241_v15 = vpop.f32.mrb[81].mxu1  ;;  %v6992_v40 = vadd.f32 %v6991_v8, %v6990_v29  ;;  %v6993_v53 = vpop.f32.mrb[210].mxu0  ;;  %v4698_v0 = vpack.c.bf16 %v4642_v27, %v4640_v41  ;;  %v5317_v27 = vadd.f32 %v10514_v6, %v10631_v28 }
 0x3a2   : > { %v4452_v35 = vadd.f32 %v10634_v34, %v4241_v15  ;;  %v4243_v55 = vpop.f32.mrb[82].mxu1  ;;  %v6994_v42 = vpop.f32.mrb[211].mxu0 }
 0x3a3   : > { %v4579_v43 = vmul.f32 0.01, %v4451_v44  ;;  %v10714_v25 = vadd.f32 %v6992_v40, %v5309_v31  ;;  %v4453_v19 = vadd.f32 %v10628_v39, %v4243_v55  ;;  %v4245_v9 = vpop.f32.mrb[83].mxu1  ;;  %5781 = vmatprep.mubr.bf16.mxu1 %v4698_v0  ;;  %vm4515_vm0 = vcmp.gt.f32.partialorder %v4451_v44, 0.0 }
 0x3a4   : > { %v4580_v24 = vmul.f32 0.01, %v4452_v35  ;;  %v4454_v61 = vadd.f32 %v10634_v34, %v4245_v9  ;;  %v6995_v16 = vadd.f32 %v6994_v42, %v6993_v53  ;;  %5782 = vmatmul.mubr.bf16.gmra.mrb[140].mxu1 %v4697_v59  ;;  %vm4516_vm2 = vcmp.gt.f32.partialorder %v4452_v35, 0.0 }
 0x3a5   : > { %vm4517_vm3 = vcmp.gt.f32.partialorder %v4453_v19, 0.0  ;;  %v4581_v36 = vmul.f32 0.01, %v4453_v19  ;;  %v4643_v52 = vsel %vm4515_vm0, %v4451_v44, %v4579_v43  ;;  %v5320_v44 = vadd.f32 %v10516_v38, %v10631_v28 }
 0x3a6   : > { %vm4518_vm12 = vcmp.gt.f32.partialorder %v4454_v61, 0.0  ;;  %v4582_v63 = vmul.f32 0.01, %v4454_v61  ;;  %v10721_v33 = vadd.f32 %v6995_v16, %v5312_v18  ;;  %v4644_v56 = vsel %vm4516_vm2, %v4452_v35, %v4580_v24 }
 0x3a7   : > { %v6996_v1 = vpop.f32.mrb[212].mxu0  ;;  %v4645_v29 = vsel %vm4517_vm3, %v4453_v19, %v4581_v36 }
 0x3a8   : > { %5717 = vmatmul.mubr.bf16.gmra.mrb[60].mxu0 %v11471_v58  ;;  %v4249_v21 = vpop.f32.mrb[84].mxu1  ;;  %v6997_v32 = vpop.f32.mrb[213].mxu0  ;;  %v4646_v8 = vsel %vm4518_vm12, %v4454_v61, %v4582_v63  ;;  %v4699_v41 = vpack.c.bf16 %v4645_v29, %v4643_v52 }
 0x3a9   : > { %v4455_v37 = vadd.f32 %v10628_v39, %v4249_v21  ;;  %v4251_v59 = vpop.f32.mrb[85].mxu1  ;;  %v6998_v31 = vadd.f32 %v6997_v32, %v6996_v1  ;;  %v6999_v15 = vpop.f32.mrb[214].mxu0  ;;  %v4700_v40 = vpack.c.bf16 %v4646_v8, %v4644_v56  ;;  %v5325_v21 = vadd.f32 %v10524_v60, %v10631_v28 }
 0x3aa   : > { %v4456_v53 = vadd.f32 %v10634_v34, %v4251_v59  ;;  %v4253_v0 = vpop.f32.mrb[86].mxu1  ;;  %v7000_v55 = vpop.f32.mrb[215].mxu0 }
 0x3ab   : > { %v4583_v42 = vmul.f32 0.01, %v4455_v37  ;;  %v10729_v35 = vadd.f32 %v6998_v31, %v5317_v27  ;;  %v4457_v18 = vadd.f32 %v10628_v39, %v4253_v0  ;;  %v4255_v43 = vpop.f32.mrb[87].mxu1  ;;  %5789 = vmatprep.mubr.bf16.mxu1 %v4700_v40  ;;  %vm4519_vm7 = vcmp.gt.f32.partialorder %v4455_v37, 0.0 }
 0x3ac   : > { %v4584_v6 = vmul.f32 0.01, %v4456_v53  ;;  %v4458_v19 = vadd.f32 %v10634_v34, %v4255_v43  ;;  %v7001_v9 = vadd.f32 %v7000_v55, %v6999_v15  ;;  %5790 = vmatmul.mubr.bf16.gmra.mrb[144].mxu1 %v4699_v41  ;;  %vm4520_vm11 = vcmp.gt.f32.partialorder %v4456_v53, 0.0 }
 0x3ad   : > { %vm4521_vm10 = vcmp.gt.f32.partialorder %v4457_v18, 0.0  ;;  %v4585_v24 = vmul.f32 0.01, %v4457_v18  ;;  %v4647_v22 = vsel %vm4519_vm7, %v4455_v37, %v4583_v42  ;;  %v5328_v37 = vadd.f32 %v10526_v48, %v10631_v28 }
 0x3ae   : > { %vm4522_vm6 = vcmp.gt.f32.partialorder %v4458_v19, 0.0  ;;  %v4586_v61 = vmul.f32 0.01, %v4458_v19  ;;  %v10733_v16 = vadd.f32 %v7001_v9, %v5320_v44  ;;  %v4648_v1 = vsel %vm4520_vm11, %v4456_v53, %v4584_v6 }
 0x3af   : > { %v7002_v38 = vpop.f32.mrb[216].mxu0  ;;  %v4649_v58 = vsel %vm4521_vm10, %v4457_v18, %v4585_v24 }
 0x3b0   : > { %v4259_v36 = vpop.f32.mrb[88].mxu1  ;;  %v7003_v63 = vpop.f32.mrb[217].mxu0  ;;  %v4650_v52 = vsel %vm4522_vm6, %v4458_v19, %v4586_v61  ;;  %v4701_v29 = vpack.c.bf16 %v4649_v58, %v4647_v22 }
 0x3b1   : > { %v4459_v32 = vadd.f32 %v10628_v39, %v4259_v36  ;;  %v4261_v56 = vpop.f32.mrb[89].mxu1  ;;  %v7004_v8 = vadd.f32 %v7003_v63, %v7002_v38  ;;  %v7005_v41 = vpop.f32.mrb[218].mxu0  ;;  %v4702_v27 = vpack.c.bf16 %v4650_v52, %v4648_v1  ;;  %v5333_v36 = vadd.f32 %v10534_v17, %v10631_v28 }
 0x3b2   : > { %v4460_v59 = vadd.f32 %v10634_v34, %v4261_v56  ;;  %v4263_v31 = vpop.f32.mrb[90].mxu1  ;;  %v7006_v15 = vpop.f32.mrb[219].mxu0 }
 0x3b3   : > { %v4587_v40 = vmul.f32 0.01, %v4459_v32  ;;  %v10741_v53 = vadd.f32 %v7004_v8, %v5325_v21  ;;  %v4461_v0 = vadd.f32 %v10628_v39, %v4263_v31  ;;  %v4265_v55 = vpop.f32.mrb[91].mxu1  ;;  %5797 = vmatprep.mubr.bf16.mxu1 %v4702_v27  ;;  %vm4523_vm8 = vcmp.gt.f32.partialorder %v4459_v32, 0.0 }
 0x3b4   : > { %v4588_v60 = vmul.f32 0.01, %v4460_v59  ;;  %v4462_v44 = vadd.f32 %v10634_v34, %v4265_v55  ;;  %v7007_v42 = vadd.f32 %v7006_v15, %v7005_v41  ;;  %5798 = vmatmul.mubr.bf16.gmra.mrb[148].mxu1 %v4701_v29  ;;  %vm4524_vm13 = vcmp.gt.f32.partialorder %v4460_v59, 0.0 }
 0x3b5   : > { %vm4525_vm5 = vcmp.gt.f32.partialorder %v4461_v0, 0.0  ;;  %v4589_v18 = vmul.f32 0.01, %v4461_v0  ;;  %v4651_v19 = vsel %vm4523_vm8, %v4459_v32, %v4587_v40  ;;  %v5336_v32 = vadd.f32 %v10536_v49, %v10631_v28 }
 0x3b6   : > { %vm4526_vm14 = vcmp.gt.f32.partialorder %v4462_v44, 0.0  ;;  %v4590_v43 = vmul.f32 0.01, %v4462_v44  ;;  %v10745_v6 = vadd.f32 %v7007_v42, %v5328_v37  ;;  %v4652_v38 = vsel %vm4524_vm13, %v4460_v59, %v4588_v60 }
 0x3b7   : > { %v7008_v48 = vpop.f32.mrb[220].mxu0  ;;  %v4653_v9 = vsel %vm4525_vm5, %v4461_v0, %v4589_v18 }
 0x3b8   : > { %v4269_v24 = vpop.f32.mrb[92].mxu1  ;;  %v7009_v61 = vpop.f32.mrb[221].mxu0  ;;  %v4654_v22 = vsel %vm4526_vm14, %v4462_v44, %v4590_v43  ;;  %v4703_v58 = vpack.c.bf16 %v4653_v9, %v4651_v19 }
 0x3b9   : > { %v4463_v63 = vadd.f32 %v10628_v39, %v4269_v24  ;;  %v4271_v1 = vpop.f32.mrb[93].mxu1  ;;  %v7010_v52 = vadd.f32 %v7009_v61, %v7008_v48  ;;  %v7011_v29 = vpop.f32.mrb[222].mxu0  ;;  %v4704_v21 = vpack.c.bf16 %v4654_v22, %v4652_v38  ;;  %v5341_v24 = vadd.f32 %v10544_v30, %v10631_v28 }
 0x3ba   : > { %v4464_v56 = vadd.f32 %v10634_v34, %v4271_v1  ;;  %v4273_v8 = vpop.f32.mrb[94].mxu1  ;;  %v7012_v41 = vpop.f32.mrb[223].mxu0 }
 0x3bb   : > { %v4591_v27 = vmul.f32 0.01, %v4463_v63  ;;  %v10753_v59 = vadd.f32 %v7010_v52, %v5333_v36  ;;  %v4465_v31 = vadd.f32 %v10628_v39, %v4273_v8  ;;  %v4275_v15 = vpop.f32.mrb[95].mxu1  ;;  %5805 = vmatprep.mubr.bf16.mxu1 %v4704_v21  ;;  %vm4527_vm4 = vcmp.gt.f32.partialorder %v4463_v63, 0.0 }
 0x3bc   : > { %v4592_v17 = vmul.f32 0.01, %v4464_v56  ;;  %v4466_v37 = vadd.f32 %v10634_v34, %v4275_v15  ;;  %v7013_v40 = vadd.f32 %v7012_v41, %v7011_v29  ;;  %5806 = vmatmul.mubr.bf16.gmra.mrb[152].mxu1 %v4703_v58  ;;  %vm4528_vm9 = vcmp.gt.f32.partialorder %v4464_v56, 0.0 }
 0x3bd   : > { %vm4529_vm15 = vcmp.gt.f32.partialorder %v4465_v31, 0.0  ;;  %v4593_v0 = vmul.f32 0.01, %v4465_v31  ;;  %v4655_v44 = vsel %vm4527_vm4, %v4463_v63, %v4591_v27  ;;  %v5344_v63 = vadd.f32 %v10546_v12, %v10631_v28 }
 0x3be   : > { %vm4530_vm1 = vcmp.gt.f32.partialorder %v4466_v37, 0.0  ;;  %v4594_v55 = vmul.f32 0.01, %v4466_v37  ;;  %v10757_v60 = vadd.f32 %v7013_v40, %v5336_v32  ;;  %v4656_v48 = vsel %vm4528_vm9, %v4464_v56, %v4592_v17 }
 0x3bf   : > { %v4657_v42 = vsel %vm4529_vm15, %v4465_v31, %v4593_v0 }
 0x3c0   : > { %v7014_v49 = vpop.f32.mrb[224].mxu0  ;;  %v4279_v18 = vpop.f32.mrb[96].mxu1  ;;  %v4658_v19 = vsel %vm4530_vm1, %v4466_v37, %v4594_v55  ;;  %v4705_v9 = vpack.c.bf16 %v4657_v42, %v4655_v44 }
 0x3c1   : > { %v7015_v43 = vpop.f32.mrb[225].mxu0  ;;  %v4467_v61 = vadd.f32 %v10628_v39, %v4279_v18  ;;  %v4281_v38 = vpop.f32.mrb[97].mxu1  ;;  %v4706_v36 = vpack.c.bf16 %v4658_v19, %v4656_v48  ;;  %v5349_v18 = vadd.f32 %v10554_v46, %v10631_v28 }
 0x3c2   : > { %v7016_v22 = vadd.f32 %v7015_v43, %v7014_v49  ;;  %v7017_v58 = vpop.f32.mrb[226].mxu0  ;;  %v4468_v1 = vadd.f32 %v10634_v34, %v4281_v38  ;;  %v4283_v52 = vpop.f32.mrb[98].mxu1 }
 0x3c3   : > { %v7018_v29 = vpop.f32.mrb[227].mxu0  ;;  %v4595_v21 = vmul.f32 0.01, %v4467_v61  ;;  %v4469_v8 = vadd.f32 %v10628_v39, %v4283_v52  ;;  %v4285_v41 = vpop.f32.mrb[99].mxu1  ;;  %5813 = vmatprep.mubr.bf16.mxu1 %v4706_v36  ;;  %vm4531_vm0 = vcmp.gt.f32.partialorder %v4467_v61, 0.0 }
 0x3c4   : > { %v10765_v56 = vadd.f32 %v7016_v22, %v5341_v24  ;;  %v4596_v30 = vmul.f32 0.01, %v4468_v1  ;;  %v4470_v32 = vadd.f32 %v10634_v34, %v4285_v41  ;;  %v7019_v27 = vadd.f32 %v7018_v29, %v7017_v58  ;;  %5814 = vmatmul.mubr.bf16.gmra.mrb[156].mxu1 %v4705_v9 }
 0x3c5   : > { %vm4532_vm2 = vcmp.gt.f32.partialorder %v4468_v1, 0.0  ;;  %vm4533_vm3 = vcmp.gt.f32.partialorder %v4469_v8, 0.0  ;;  %v4597_v31 = vmul.f32 0.01, %v4469_v8  ;;  %v4659_v37 = vsel %vm4531_vm0, %v4467_v61, %v4595_v21 }
 0x3c6   : > { %vm4534_vm12 = vcmp.gt.f32.partialorder %v4470_v32, 0.0  ;;  %v4598_v15 = vmul.f32 0.01, %v4470_v32  ;;  %v10769_v17 = vadd.f32 %v7019_v27, %v5344_v63  ;;  %v4660_v49 = vsel %vm4532_vm2, %v4468_v1, %v4596_v30 }
 0x3c7   : > { %v4661_v40 = vsel %vm4533_vm3, %v4469_v8, %v4597_v31  ;;  %v5352_v61 = vadd.f32 %v10556_v11, %v10631_v28 }
 0x3c8   : > { %v7020_v12 = vpop.f32.mrb[228].mxu0  ;;  %v4289_v0 = vpop.f32.mrb[100].mxu1  ;;  %v4662_v44 = vsel %vm4534_vm12, %v4470_v32, %v4598_v15  ;;  %v4707_v42 = vpack.c.bf16 %v4661_v40, %v4659_v37 }
 0x3c9   : > { %v7021_v55 = vpop.f32.mrb[229].mxu0  ;;  %v4471_v43 = vadd.f32 %v10628_v39, %v4289_v0  ;;  %v4291_v48 = vpop.f32.mrb[101].mxu1  ;;  %v4708_v24 = vpack.c.bf16 %v4662_v44, %v4660_v49  ;;  %v5357_v0 = vadd.f32 %v10564_v62, %v10631_v28 }
 0x3ca   : > { %v7022_v19 = vadd.f32 %v7021_v55, %v7020_v12  ;;  %v7023_v9 = vpop.f32.mrb[230].mxu0  ;;  %v4472_v38 = vadd.f32 %v10634_v34, %v4291_v48  ;;  %v4293_v22 = vpop.f32.mrb[102].mxu1 }
 0x3cb   : > { %v7024_v58 = vpop.f32.mrb[231].mxu0  ;;  %v4599_v36 = vmul.f32 0.01, %v4471_v43  ;;  %v4473_v52 = vadd.f32 %v10628_v39, %v4293_v22  ;;  %v4295_v29 = vpop.f32.mrb[103].mxu1  ;;  %5821 = vmatprep.mubr.bf16.mxu1 %v4708_v24  ;;  %vm4535_vm7 = vcmp.gt.f32.partialorder %v4471_v43, 0.0 }
 0x3cc   : > { %v10777_v1 = vadd.f32 %v7022_v19, %v5349_v18  ;;  %v4600_v46 = vmul.f32 0.01, %v4472_v38  ;;  %v4474_v63 = vadd.f32 %v10634_v34, %v4295_v29  ;;  %v7025_v21 = vadd.f32 %v7024_v58, %v7023_v9  ;;  %5822 = vmatmul.mubr.bf16.gmra.mrb[160].mxu1 %v4707_v42 }
 0x3cd   : > { %vm4536_vm11 = vcmp.gt.f32.partialorder %v4472_v38, 0.0  ;;  %vm4537_vm10 = vcmp.gt.f32.partialorder %v4473_v52, 0.0  ;;  %v4601_v8 = vmul.f32 0.01, %v4473_v52  ;;  %v4663_v32 = vsel %vm4535_vm7, %v4471_v43, %v4599_v36 }
 0x3ce   : > { %vm4538_vm6 = vcmp.gt.f32.partialorder %v4474_v63, 0.0  ;;  %v4602_v41 = vmul.f32 0.01, %v4474_v63  ;;  %v10781_v30 = vadd.f32 %v7025_v21, %v5352_v61  ;;  %v4664_v12 = vsel %vm4536_vm11, %v4472_v38, %v4600_v46 }
 0x3cf   : > { %v4665_v27 = vsel %vm4537_vm10, %v4473_v52, %v4601_v8  ;;  %v5360_v43 = vadd.f32 %v10566_v26, %v10631_v28 }
 0x3d0   : > { %v7026_v11 = vpop.f32.mrb[232].mxu0  ;;  %v4299_v31 = vpop.f32.mrb[104].mxu1  ;;  %v4666_v37 = vsel %vm4538_vm6, %v4474_v63, %v4602_v41  ;;  %v4709_v40 = vpack.c.bf16 %v4665_v27, %v4663_v32 }
 0x3d1   : > { %v7027_v15 = vpop.f32.mrb[233].mxu0  ;;  %v4475_v55 = vadd.f32 %v10628_v39, %v4299_v31  ;;  %v4301_v49 = vpop.f32.mrb[105].mxu1  ;;  %v4710_v18 = vpack.c.bf16 %v4666_v37, %v4664_v12  ;;  %v5365_v31 = vadd.f32 %v10574_v20, %v10631_v28 }
 0x3d2   : > { %v7028_v44 = vadd.f32 %v7027_v15, %v7026_v11  ;;  %v7029_v42 = vpop.f32.mrb[234].mxu0  ;;  %v4476_v48 = vadd.f32 %v10634_v34, %v4301_v49  ;;  %v4303_v19 = vpop.f32.mrb[106].mxu1 }
 0x3d3   : > { %v7030_v9 = vpop.f32.mrb[235].mxu0  ;;  %v4603_v24 = vmul.f32 0.01, %v4475_v55  ;;  %v4477_v22 = vadd.f32 %v10628_v39, %v4303_v19  ;;  %v4305_v58 = vpop.f32.mrb[107].mxu1  ;;  %5829 = vmatprep.mubr.bf16.mxu1 %v4710_v18  ;;  %vm4539_vm8 = vcmp.gt.f32.partialorder %v4475_v55, 0.0 }
 0x3d4   : > { %v10789_v38 = vadd.f32 %v7028_v44, %v5357_v0  ;;  %v4604_v62 = vmul.f32 0.01, %v4476_v48  ;;  %v4478_v61 = vadd.f32 %v10634_v34, %v4305_v58  ;;  %v7031_v36 = vadd.f32 %v7030_v9, %v7029_v42  ;;  %5830 = vmatmul.mubr.bf16.gmra.mrb[164].mxu1 %v4709_v40 }
 0x3d5   : > { %vm4540_vm13 = vcmp.gt.f32.partialorder %v4476_v48, 0.0  ;;  %vm4541_vm5 = vcmp.gt.f32.partialorder %v4477_v22, 0.0  ;;  %v4605_v52 = vmul.f32 0.01, %v4477_v22  ;;  %v4667_v63 = vsel %vm4539_vm8, %v4475_v55, %v4603_v24 }
 0x3d6   : > { %vm4542_vm14 = vcmp.gt.f32.partialorder %v4478_v61, 0.0  ;;  %v4606_v29 = vmul.f32 0.01, %v4478_v61  ;;  %v10793_v46 = vadd.f32 %v7031_v36, %v5360_v43  ;;  %v4668_v11 = vsel %vm4540_vm13, %v4476_v48, %v4604_v62 }
 0x3d7   : > { %v4669_v21 = vsel %vm4541_vm5, %v4477_v22, %v4605_v52  ;;  %v5368_v55 = vadd.f32 %v10576_v50, %v10631_v28 }
 0x3d8   : > { %v4309_v8 = vpop.f32.mrb[108].mxu1  ;;  %v4670_v32 = vsel %vm4542_vm14, %v4478_v61, %v4606_v29  ;;  %v4711_v27 = vpack.c.bf16 %v4669_v21, %v4667_v63 }
 0x3d9   : > { %v7032_v26 = vpop.f32.mrb[236].mxu0  ;;  %v4479_v15 = vadd.f32 %v10628_v39, %v4309_v8  ;;  %v4311_v12 = vpop.f32.mrb[109].mxu1  ;;  %v4712_v0 = vpack.c.bf16 %v4670_v32, %v4668_v11  ;;  %v5373_v8 = vadd.f32 %v10584_v13, %v10631_v28 }
 0x3da   : > { %v7033_v41 = vpop.f32.mrb[237].mxu0  ;;  %v4480_v49 = vadd.f32 %v10634_v34, %v4311_v12  ;;  %v4313_v44 = vpop.f32.mrb[110].mxu1 }
 0x3db   : > { %v7034_v37 = vadd.f32 %v7033_v41, %v7032_v26  ;;  %v7035_v40 = vpop.f32.mrb[238].mxu0  ;;  %v4607_v18 = vmul.f32 0.01, %v4479_v15  ;;  %v4481_v19 = vadd.f32 %v10628_v39, %v4313_v44  ;;  %v4315_v9 = vpop.f32.mrb[111].mxu1  ;;  %5837 = vmatprep.mubr.bf16.mxu1 %v4712_v0  ;;  %vm4543_vm4 = vcmp.gt.f32.partialorder %v4479_v15, 0.0 }
 0x3dc   : > { %v7036_v42 = vpop.f32.mrb[239].mxu0  ;;  %v4608_v20 = vmul.f32 0.01, %v4480_v49  ;;  %v4482_v43 = vadd.f32 %v10634_v34, %v4315_v9  ;;  %5838 = vmatmul.mubr.bf16.gmra.mrb[168].mxu1 %v4711_v27  ;;  %vm4544_vm9 = vcmp.gt.f32.partialorder %v4480_v49, 0.0 }
 0x3dd   : > { %v10801_v48 = vadd.f32 %v7034_v37, %v5365_v31  ;;  %v7037_v24 = vadd.f32 %v7036_v42, %v7035_v40  ;;  %vm4545_vm15 = vcmp.gt.f32.partialorder %v4481_v19, 0.0  ;;  %v4609_v22 = vmul.f32 0.01, %v4481_v19 }
 0x3de   : > { %vm4546_vm1 = vcmp.gt.f32.partialorder %v4482_v43, 0.0  ;;  %v4610_v58 = vmul.f32 0.01, %v4482_v43  ;;  %v4671_v61 = vsel %vm4543_vm4, %v4479_v15, %v4607_v18  ;;  %v4672_v26 = vsel %vm4544_vm9, %v4480_v49, %v4608_v20 }
 0x3df   : > { %v10805_v62 = vadd.f32 %v7037_v24, %v5368_v55  ;;  %v4673_v36 = vsel %vm4545_vm15, %v4481_v19, %v4609_v22  ;;  %v5376_v15 = vadd.f32 %v10586_v5, %v10631_v28 }
 0x3e0   : > { %v4674_v63 = vsel %vm4546_vm1, %v4482_v43, %v4610_v58  ;;  %v4713_v21 = vpack.c.bf16 %v4673_v36, %v4671_v61 }
 0x3e1   : > { %v4714_v31 = vpack.c.bf16 %v4674_v63, %v4672_v26 }
 0x3e3   : > { %v7038_v50 = vpop.f32.mrb[240].mxu0  ;;  %5845 = vmatprep.mubr.bf16.mxu1 %v4714_v31 }
 0x3e4   : > { %v4319_v52 = vpop.f32.mrb[112].mxu1  ;;  %v7039_v29 = vpop.f32.mrb[241].mxu0  ;;  %5846 = vmatmul.mubr.bf16.gmra.mrb[172].mxu1 %v4713_v21 }
 0x3e5   : > { %v4483_v41 = vadd.f32 %v10628_v39, %v4319_v52  ;;  %v4321_v11 = vpop.f32.mrb[113].mxu1  ;;  %v7040_v32 = vadd.f32 %v7039_v29, %v7038_v50  ;;  %v7041_v27 = vpop.f32.mrb[242].mxu0  ;;  %v5381_v52 = vadd.f32 %v10594_v23, %v10631_v28 }
 0x3e6   : > { %v4484_v12 = vadd.f32 %v10634_v34, %v4321_v11  ;;  %v4323_v37 = vpop.f32.mrb[114].mxu1  ;;  %v7042_v40 = vpop.f32.mrb[243].mxu0 }
 0x3e7   : > { %v4611_v0 = vmul.f32 0.01, %v4483_v41  ;;  %v10813_v49 = vadd.f32 %v7040_v32, %v5373_v8  ;;  %v4485_v44 = vadd.f32 %v10628_v39, %v4323_v37  ;;  %v4325_v42 = vpop.f32.mrb[115].mxu1  ;;  %vm4547_vm0 = vcmp.gt.f32.partialorder %v4483_v41, 0.0 }
 0x3e8   : > { %v4612_v13 = vmul.f32 0.01, %v4484_v12  ;;  %v4486_v55 = vadd.f32 %v10634_v34, %v4325_v42  ;;  %v7043_v18 = vadd.f32 %v7042_v40, %v7041_v27  ;;  %vm4548_vm2 = vcmp.gt.f32.partialorder %v4484_v12, 0.0 }
 0x3e9   : > { %vm4549_vm3 = vcmp.gt.f32.partialorder %v4485_v44, 0.0  ;;  %v4613_v19 = vmul.f32 0.01, %v4485_v44  ;;  %v4675_v43 = vsel %vm4547_vm0, %v4483_v41, %v4611_v0  ;;  %v5384_v41 = vadd.f32 %v10596_v54, %v10631_v28 }
 0x3ea   : > { %vm4550_vm12 = vcmp.gt.f32.partialorder %v4486_v55, 0.0  ;;  %v4614_v9 = vmul.f32 0.01, %v4486_v55  ;;  %v10817_v20 = vadd.f32 %v7043_v18, %v5376_v15  ;;  %v4676_v50 = vsel %vm4548_vm2, %v4484_v12, %v4612_v13 }
 0x3eb   : > { %v7044_v5 = vpop.f32.mrb[244].mxu0  ;;  %v4677_v24 = vsel %vm4549_vm3, %v4485_v44, %v4613_v19 }
 0x3ec   : > { %v4329_v22 = vpop.f32.mrb[116].mxu1  ;;  %v7045_v58 = vpop.f32.mrb[245].mxu0  ;;  %v4678_v61 = vsel %vm4550_vm12, %v4486_v55, %v4614_v9  ;;  %v4715_v36 = vpack.c.bf16 %v4677_v24, %v4675_v43 }
 0x3ed   : > { %v4487_v29 = vadd.f32 %v10628_v39, %v4329_v22  ;;  %v4331_v26 = vpop.f32.mrb[117].mxu1  ;;  %v7046_v63 = vadd.f32 %v7045_v58, %v7044_v5  ;;  %v7047_v21 = vpop.f32.mrb[246].mxu0  ;;  %v4716_v8 = vpack.c.bf16 %v4678_v61, %v4676_v50  ;;  %v5389_v22 = vadd.f32 %v10604_v4, %v10631_v28 }
 0x3ee   : > { %v4488_v11 = vadd.f32 %v10634_v34, %v4331_v26  ;;  %v4333_v32 = vpop.f32.mrb[118].mxu1  ;;  %v7048_v27 = vpop.f32.mrb[247].mxu0 }
 0x3ef   : > { %v4615_v31 = vmul.f32 0.01, %v4487_v29  ;;  %v10825_v12 = vadd.f32 %v7046_v63, %v5381_v52  ;;  %v4489_v37 = vadd.f32 %v10628_v39, %v4333_v32  ;;  %v4335_v40 = vpop.f32.mrb[119].mxu1  ;;  %5853 = vmatprep.mubr.bf16.mxu1 %v4716_v8  ;;  %vm4551_vm7 = vcmp.gt.f32.partialorder %v4487_v29, 0.0 }
 0x3f0   : > { %v4616_v23 = vmul.f32 0.01, %v4488_v11  ;;  %v4490_v15 = vadd.f32 %v10634_v34, %v4335_v40  ;;  %v7049_v0 = vadd.f32 %v7048_v27, %v7047_v21  ;;  %5854 = vmatmul.mubr.bf16.gmra.mrb[176].mxu1 %v4715_v36  ;;  %vm4552_vm11 = vcmp.gt.f32.partialorder %v4488_v11, 0.0 }
 0x3f1   : > { %vm4553_vm10 = vcmp.gt.f32.partialorder %v4489_v37, 0.0  ;;  %v4617_v44 = vmul.f32 0.01, %v4489_v37  ;;  %v4679_v55 = vsel %vm4551_vm7, %v4487_v29, %v4615_v31  ;;  %v5392_v29 = vadd.f32 %v10606_v14, %v10631_v28 }
 0x3f2   : > { %vm4554_vm6 = vcmp.gt.f32.partialorder %v4490_v15, 0.0  ;;  %v4618_v42 = vmul.f32 0.01, %v4490_v15  ;;  %v10829_v13 = vadd.f32 %v7049_v0, %v5384_v41  ;;  %v4680_v5 = vsel %vm4552_vm11, %v4488_v11, %v4616_v23 }
 0x3f3   : > { %v7050_v54 = vpop.f32.mrb[248].mxu0  ;;  %v4681_v18 = vsel %vm4553_vm10, %v4489_v37, %v4617_v44 }
 0x3f4   : > { %v4339_v19 = vpop.f32.mrb[120].mxu1  ;;  %v7051_v9 = vpop.f32.mrb[249].mxu0  ;;  %v4682_v43 = vsel %vm4554_vm6, %v4490_v15, %v4618_v42  ;;  %v4717_v24 = vpack.c.bf16 %v4681_v18, %v4679_v55  ;;  %v7795_v18 = vld [vmem:[%s7902_s7] ss:$0 sm:$0xff] }
 0x3f5   : > { %v4491_v58 = vadd.f32 %v10628_v39, %v4339_v19  ;;  %v4341_v50 = vpop.f32.mrb[121].mxu1  ;;  %v7052_v61 = vadd.f32 %v7051_v9, %v7050_v54  ;;  %v7053_v36 = vpop.f32.mrb[250].mxu0  ;;  %v4718_v52 = vpack.c.bf16 %v4682_v43, %v4680_v5  ;;  %v5397_v19 = vadd.f32 %v7795_v18, %v10614_v10 }
 0x3f6   : > { %v4492_v26 = vadd.f32 %v10634_v34, %v4341_v50  ;;  %v4343_v63 = vpop.f32.mrb[122].mxu1  ;;  %v7054_v21 = vpop.f32.mrb[251].mxu0 }
 0x3f7   : > { %v4619_v8 = vmul.f32 0.01, %v4491_v58  ;;  %v10837_v11 = vadd.f32 %v7052_v61, %v5389_v22  ;;  %v4493_v32 = vadd.f32 %v10628_v39, %v4343_v63  ;;  %v4345_v27 = vpop.f32.mrb[123].mxu1  ;;  %5861 = vmatprep.mubr.bf16.mxu1 %v4718_v52  ;;  %vm4555_vm8 = vcmp.gt.f32.partialorder %v4491_v58, 0.0 }
 0x3f8   : > { %v4620_v4 = vmul.f32 0.01, %v4492_v26  ;;  %v4494_v41 = vadd.f32 %v10634_v34, %v4345_v27  ;;  %v7055_v31 = vadd.f32 %v7054_v21, %v7053_v36  ;;  %5862 = vmatmul.mubr.bf16.gmra.mrb[180].mxu1 %v4717_v24  ;;  %vm4556_vm13 = vcmp.gt.f32.partialorder %v4492_v26, 0.0 }
 0x3f9   : > { %vm4557_vm5 = vcmp.gt.f32.partialorder %v4493_v32, 0.0  ;;  %v4621_v37 = vmul.f32 0.01, %v4493_v32  ;;  %v4683_v23 = vsel %vm4555_vm8, %v4491_v58, %v4619_v8  ;;  %v11472_v58 = vld [vmem:[#allocation15_spill] sm:$0xff] }
 0x3fa   : > { %vm4558_vm14 = vcmp.gt.f32.partialorder %v4494_v41, 0.0  ;;  %v4622_v40 = vmul.f32 0.01, %v4494_v41  ;;  %v10841_v14 = vadd.f32 %v7055_v31, %v5392_v29  ;;  %v4684_v42 = vsel %vm4556_vm13, %v4492_v26, %v4620_v4 }
 0x3fb   : > { %v7056_v28 = vpop.f32.mrb[252].mxu0  ;;  %v4685_v15 = vsel %vm4557_vm5, %v4493_v32, %v4621_v37  ;;  %v5400_v52 = vadd.f32 %v7795_v18, %v11472_v58 }
 0x3fc   : > { %v4349_v0 = vpop.f32.mrb[124].mxu1  ;;  %v7057_v44 = vpop.f32.mrb[253].mxu0  ;;  %v4686_v54 = vsel %vm4558_vm14, %v4494_v41, %v4622_v40  ;;  %v4719_v55 = vpack.c.bf16 %v4685_v15, %v4683_v23 }
 0x3fd   : > { %v4495_v9 = vadd.f32 %v10628_v39, %v4349_v0  ;;  %v4351_v5 = vpop.f32.mrb[125].mxu1  ;;  %v7058_v43 = vadd.f32 %v7057_v44, %v7056_v28  ;;  %v7059_v24 = vpop.f32.mrb[254].mxu0  ;;  %v4720_v22 = vpack.c.bf16 %v4686_v54, %v4684_v42  ;;  %v11473_v54 = vld [vmem:[#allocation40_spill] sm:$0xff] }
 0x3fe   : > { %v4496_v50 = vadd.f32 %v10634_v34, %v4351_v5  ;;  %v4353_v61 = vpop.f32.mrb[126].mxu1  ;;  %v7060_v36 = vpop.f32.mrb[255].mxu0 }
 0x3ff   : > { %v4623_v63 = vmul.f32 0.01, %v4495_v9  ;;  %v10848_v21 = vadd.f32 %v7058_v43, %v5397_v19  ;;  %v4497_v26 = vadd.f32 %v10628_v39, %v4353_v61  ;;  %v4355_v29 = vpop.f32.mrb[127].mxu1  ;;  %5869 = vmatprep.mubr.bf16.mxu1 %v4720_v22  ;;  %vm4559_vm4 = vcmp.gt.f32.partialorder %v4495_v9, 0.0 }
 0x400   : > { %v4624_v10 = vmul.f32 0.01, %v4496_v50  ;;  %v4498_v8 = vadd.f32 %v10634_v34, %v4355_v29  ;;  %v7061_v32 = vadd.f32 %v7060_v36, %v7059_v24  ;;  %5870 = vmatmul.mubr.bf16.gmra.mrb[184].mxu1 %v4719_v55  ;;  %vm4560_vm9 = vcmp.gt.f32.partialorder %v4496_v50, 0.0 }
 0x401   : > { %vm4561_vm15 = vcmp.gt.f32.partialorder %v4497_v26, 0.0  ;;  %v4625_v27 = vmul.f32 0.01, %v4497_v26  ;;  %v4687_v37 = vsel %vm4559_vm4, %v4495_v9, %v4623_v63 }
 0x402   : > { %vm4562_vm1 = vcmp.gt.f32.partialorder %v4498_v8, 0.0  ;;  %v4626_v4 = vmul.f32 0.01, %v4498_v8  ;;  %v10852_v41 = vadd.f32 %v7061_v32, %v5400_v52  ;;  %v4688_v39 = vsel %vm4560_vm9, %v4496_v50, %v4624_v10 }
 0x403   : > { %v7078_v31 = vpop.f32.mrb[0].mxu0  ;;  %v4689_v40 = vsel %vm4561_vm15, %v4497_v26, %v4625_v27 }
 0x404   : > { %v7079_v28 = vpop.f32.mrb[1].mxu0  ;;  %v4690_v23 = vsel %vm4562_vm1, %v4498_v8, %v4626_v4  ;;  %v4721_v15 = vpack.c.bf16 %v4689_v40, %v4687_v37 }
 0x405   : > { %v7080_v0 = vadd.f32 %v7079_v28, %v7078_v31  ;;  %v7081_v44 = vpop.f32.mrb[2].mxu0  ;;  %v4722_v42 = vpack.c.bf16 %v4690_v23, %v4688_v39 }
 0x406   : > { %v7082_v34 = vpop.f32.mrb[3].mxu0 }
 0x407   : > { %v10855_v55 = vadd.f32 %v7080_v0, %v11473_v54  ;;  %v7083_v18 = vadd.f32 %v7082_v34, %v7081_v44  ;;  %5877 = vmatprep.mubr.bf16.mxu1 %v4722_v42 }
 0x408   : > { %5878 = vmatmul.mubr.bf16.gmra.mrb[188].mxu1 %v4721_v15 }
 0x409   : > { %v10858_v19 = vadd.f32 %v7083_v18, %v10652_v3 }
 0x40b   : > { %v7084_v5 = vpop.f32.mrb[4].mxu0 }
 0x40c   : > { %v7085_v9 = vpop.f32.mrb[5].mxu0 }
 0x40d   : > { %v7086_v43 = vadd.f32 %v7085_v9, %v7084_v5  ;;  %v7087_v24 = vpop.f32.mrb[6].mxu0 }
 0x40e   : > { %v7088_v22 = vpop.f32.mrb[7].mxu0 }
 0x40f   : > { %v10861_v50 = vadd.f32 %v7086_v43, %v10660_v47  ;;  %v7089_v61 = vadd.f32 %v7088_v22, %v7087_v24 }
 0x411   : > { %v10864_v36 = vadd.f32 %v7089_v61, %v10670_v2 }
 0x413   : > { %v7090_v58 = vpop.f32.mrb[8].mxu0 }
 0x414   : > { %v7091_v52 = vpop.f32.mrb[9].mxu0 }
 0x415   : > { %v7092_v63 = vadd.f32 %v7091_v52, %v7090_v58  ;;  %v7093_v26 = vpop.f32.mrb[10].mxu0 }
 0x416   : > { %v7094_v29 = vpop.f32.mrb[11].mxu0 }
 0x417   : > { %v10867_v3 = vadd.f32 %v7092_v63, %v10678_v51  ;;  %v7095_v10 = vadd.f32 %v7094_v29, %v7093_v26 }
 0x419   : > { %v10870_v8 = vadd.f32 %v7095_v10, %v10688_v7 }
 0x41b   : > { %v7096_v32 = vpop.f32.mrb[12].mxu0 }
 0x41c   : > { %v7097_v27 = vpop.f32.mrb[13].mxu0 }
 0x41d   : > { %v7098_v47 = vadd.f32 %v7097_v27, %v7096_v32  ;;  %v7099_v4 = vpop.f32.mrb[14].mxu0 }
 0x41e   : > { %v7100_v31 = vpop.f32.mrb[15].mxu0 }
 0x41f   : > { %v10873_v2 = vadd.f32 %v7098_v47, %v10696_v57  ;;  %v7101_v37 = vadd.f32 %v7100_v31, %v7099_v4 }
 0x421   : > { %v10876_v40 = vadd.f32 %v7101_v37, %v10706_v45 }
 0x423   : > { %v7102_v28 = vpop.f32.mrb[16].mxu0 }
 0x424   : > { %v7103_v39 = vpop.f32.mrb[17].mxu0 }
 0x425   : > { %v7104_v51 = vadd.f32 %v7103_v39, %v7102_v28  ;;  %v7105_v23 = vpop.f32.mrb[18].mxu0 }
 0x426   : > { %v7106_v15 = vpop.f32.mrb[19].mxu0 }
 0x427   : > { %v10879_v7 = vadd.f32 %v7104_v51, %v10714_v25  ;;  %v7107_v0 = vadd.f32 %v7106_v15, %v7105_v23 }
 0x429   : > { %v10882_v44 = vadd.f32 %v7107_v0, %v10721_v33 }
 0x42b   : > { %v7108_v42 = vpop.f32.mrb[20].mxu0 }
 0x42c   : > { %v7109_v34 = vpop.f32.mrb[21].mxu0 }
 0x42d   : > { %v7110_v57 = vadd.f32 %v7109_v34, %v7108_v42  ;;  %v7111_v54 = vpop.f32.mrb[22].mxu0 }
 0x42e   : > { %v7112_v18 = vpop.f32.mrb[23].mxu0 }
 0x42f   : > { %v10885_v45 = vadd.f32 %v7110_v57, %v10729_v35  ;;  %v7113_v5 = vadd.f32 %v7112_v18, %v7111_v54 }
 0x431   : > { %v10888_v9 = vadd.f32 %v7113_v5, %v10733_v16 }
 0x433   : > { %v7114_v43 = vpop.f32.mrb[24].mxu0 }
 0x434   : > { %v7115_v24 = vpop.f32.mrb[25].mxu0 }
 0x435   : > { %v7116_v25 = vadd.f32 %v7115_v24, %v7114_v43  ;;  %v7117_v22 = vpop.f32.mrb[26].mxu0 }
 0x436   : > { %v7118_v61 = vpop.f32.mrb[27].mxu0 }
 0x437   : > { %v10891_v33 = vadd.f32 %v7116_v25, %v10741_v53  ;;  %v7119_v58 = vadd.f32 %v7118_v61, %v7117_v22 }
 0x439   : > { %v10894_v52 = vadd.f32 %v7119_v58, %v10745_v6 }
 0x43b   : > { %v7120_v63 = vpop.f32.mrb[28].mxu0 }
 0x43c   : > { %v7121_v26 = vpop.f32.mrb[29].mxu0 }
 0x43d   : > { %v7122_v35 = vadd.f32 %v7121_v26, %v7120_v63  ;;  %v7123_v29 = vpop.f32.mrb[30].mxu0 }
 0x43e   : > { %v7124_v10 = vpop.f32.mrb[31].mxu0 }
 0x43f   : > { %v10897_v16 = vadd.f32 %v7122_v35, %v10753_v59  ;;  %v7125_v32 = vadd.f32 %v7124_v10, %v7123_v29 }
 0x441   : > { %v10900_v27 = vadd.f32 %v7125_v32, %v10757_v60 }
 0x443   : > { %v7126_v47 = vpop.f32.mrb[32].mxu0 }
 0x444   : > { %v7127_v4 = vpop.f32.mrb[33].mxu0 }
 0x445   : > { %v7128_v53 = vadd.f32 %v7127_v4, %v7126_v47  ;;  %v7129_v31 = vpop.f32.mrb[34].mxu0 }
 0x446   : > { %v7130_v37 = vpop.f32.mrb[35].mxu0 }
 0x447   : > { %v10903_v6 = vadd.f32 %v7128_v53, %v10765_v56  ;;  %v7131_v28 = vadd.f32 %v7130_v37, %v7129_v31 }
 0x449   : > { %v10906_v39 = vadd.f32 %v7131_v28, %v10769_v17 }
 0x44b   : > { %v7132_v51 = vpop.f32.mrb[36].mxu0 }
 0x44c   : > { %v7133_v23 = vpop.f32.mrb[37].mxu0 }
 0x44d   : > { %v7134_v59 = vadd.f32 %v7133_v23, %v7132_v51  ;;  %v7135_v15 = vpop.f32.mrb[38].mxu0 }
 0x44e   : > { %v7136_v0 = vpop.f32.mrb[39].mxu0 }
 0x44f   : > { %v10909_v60 = vadd.f32 %v7134_v59, %v10777_v1  ;;  %v7137_v42 = vadd.f32 %v7136_v0, %v7135_v15 }
 0x451   : > { %v10912_v34 = vadd.f32 %v7137_v42, %v10781_v30 }
 0x453   : > { %v7138_v57 = vpop.f32.mrb[40].mxu0 }
 0x454   : > { %v7139_v54 = vpop.f32.mrb[41].mxu0 }
 0x455   : > { %v7140_v56 = vadd.f32 %v7139_v54, %v7138_v57  ;;  %v7141_v18 = vpop.f32.mrb[42].mxu0 }
 0x456   : > { %v7142_v5 = vpop.f32.mrb[43].mxu0 }
 0x457   : > { %v10915_v17 = vadd.f32 %v7140_v56, %v10789_v38  ;;  %v7143_v43 = vadd.f32 %v7142_v5, %v7141_v18 }
 0x459   : > { %v10918_v24 = vadd.f32 %v7143_v43, %v10793_v46 }
 0x45b   : > { %v7144_v25 = vpop.f32.mrb[44].mxu0 }
 0x45c   : > { %v7145_v22 = vpop.f32.mrb[45].mxu0 }
 0x45d   : > { %v7146_v1 = vadd.f32 %v7145_v22, %v7144_v25  ;;  %v7147_v61 = vpop.f32.mrb[46].mxu0 }
 0x45e   : > { %v7148_v58 = vpop.f32.mrb[47].mxu0 }
 0x45f   : > { %v10921_v30 = vadd.f32 %v7146_v1, %v10801_v48  ;;  %v7149_v63 = vadd.f32 %v7148_v58, %v7147_v61  ;;  %v7190_v35 = vpop.f32.mrb[128].mxu1 }
 0x460   : > { %v7191_v38 = vpop.f32.mrb[129].mxu1 }
 0x461   : > { %v10924_v26 = vadd.f32 %v7149_v63, %v10805_v62  ;;  %v7192_v32 = vadd.f32 %v7191_v38, %v7190_v35  ;;  %v7193_v46 = vpop.f32.mrb[130].mxu1 }
 0x462   : > { %v7194_v53 = vpop.f32.mrb[131].mxu1 }
 0x463   : > { %v7150_v29 = vpop.f32.mrb[48].mxu0  ;;  %v5760_v37 = vadd.f32 %v7192_v32, %v10855_v55  ;;  %v7195_v48 = vadd.f32 %v7194_v53, %v7193_v46 }
 0x464   : > { %v7151_v10 = vpop.f32.mrb[49].mxu0 }
 0x465   : > { %v7152_v47 = vadd.f32 %v7151_v10, %v7150_v29  ;;  %v7153_v4 = vpop.f32.mrb[50].mxu0  ;;  %v5763_v62 = vadd.f32 %v7195_v48, %v10858_v19  ;;  %v5886_v59 = vmax.f32 %v5760_v37, 0.0 }
 0x466   : > { %v7154_v31 = vpop.f32.mrb[51].mxu0 }
 0x467   : > { %v10928_v28 = vadd.f32 %v7152_v47, %v10813_v49  ;;  %v7155_v51 = vadd.f32 %v7154_v31, %v7153_v4  ;;  %v5887_v15 = vmax.f32 %v5763_v62, 0.0  ;;  %v7196_v0 = vpop.f32.mrb[132].mxu1 }
 0x468   : > { %v7197_v57 = vpop.f32.mrb[133].mxu1 }
 0x469   : > { %v10932_v23 = vadd.f32 %v7155_v51, %v10817_v20  ;;  %v6746_v56 = vpack.c.bf16 %v5887_v15, %v5886_v59  ;;  %v7198_v18 = vadd.f32 %v7197_v57, %v7196_v0  ;;  %v7199_v5 = vpop.f32.mrb[134].mxu1 }
 0x46a   : > { %v7200_v43 = vpop.f32.mrb[135].mxu1 }
 0x46b   : > { %v7156_v42 = vpop.f32.mrb[52].mxu0  ;;  %6747 = vst [vmem:[%s7916_s11] sm:$0xff] %v6746_v56   ;;  %v5768_v22 = vadd.f32 %v7198_v18, %v10861_v50  ;;  %v7201_v20 = vadd.f32 %v7200_v43, %v7199_v5 }
 0x46c   : > { %v7157_v54 = vpop.f32.mrb[53].mxu0 }
 0x46d   : > { %v7158_v55 = vadd.f32 %v7157_v54, %v7156_v42  ;;  %v7159_v49 = vpop.f32.mrb[54].mxu0  ;;  %v5771_v61 = vadd.f32 %v7201_v20, %v10864_v36  ;;  %v5888_v63 = vmax.f32 %v5768_v22, 0.0 }
 0x46e   : > { %v7160_v25 = vpop.f32.mrb[55].mxu0 }
 0x46f   : > { %v10937_v19 = vadd.f32 %v7158_v55, %v10825_v12  ;;  %v7161_v1 = vadd.f32 %v7160_v25, %v7159_v49  ;;  %v5889_v35 = vmax.f32 %v5771_v61, 0.0  ;;  %v7202_v29 = vpop.f32.mrb[136].mxu1 }
 0x470   : > { %v7203_v10 = vpop.f32.mrb[137].mxu1 }
 0x471   : > { %v10941_v58 = vadd.f32 %v7161_v1, %v10829_v13  ;;  %v6751_v47 = vpack.c.bf16 %v5889_v35, %v5888_v63  ;;  %v7204_v46 = vadd.f32 %v7203_v10, %v7202_v29  ;;  %v7205_v4 = vpop.f32.mrb[138].mxu1 }
 0x472   : > { %v7206_v53 = vpop.f32.mrb[139].mxu1 }
 0x473   : > { %v7162_v38 = vpop.f32.mrb[56].mxu0  ;;  %6823 = vst [vmem:[%s7916_s11 + $0x8] sm:$0xff] %v6751_v47   ;;  %v5776_v37 = vadd.f32 %v7204_v46, %v10867_v3  ;;  %v7207_v13 = vadd.f32 %v7206_v53, %v7205_v4 }
 0x474   : > { %v7163_v32 = vpop.f32.mrb[57].mxu0 }
 0x475   : > { %v7164_v50 = vadd.f32 %v7163_v32, %v7162_v38  ;;  %v7165_v12 = vpop.f32.mrb[58].mxu0  ;;  %v5779_v51 = vadd.f32 %v7207_v13, %v10870_v8  ;;  %v5890_v59 = vmax.f32 %v5776_v37, 0.0 }
 0x476   : > { %v7166_v31 = vpop.f32.mrb[59].mxu0 }
 0x477   : > { %v10946_v36 = vadd.f32 %v7164_v50, %v10837_v11  ;;  %v7167_v48 = vadd.f32 %v7166_v31, %v7165_v12  ;;  %v5891_v15 = vmax.f32 %v5779_v51, 0.0  ;;  %v7208_v0 = vpop.f32.mrb[140].mxu1 }
 0x478   : > { %v7209_v57 = vpop.f32.mrb[141].mxu1 }
 0x479   : > { %v10950_v62 = vadd.f32 %v7167_v48, %v10841_v14  ;;  %v6756_v56 = vpack.c.bf16 %v5891_v15, %v5890_v59  ;;  %v7210_v18 = vadd.f32 %v7209_v57, %v7208_v0  ;;  %v7211_v55 = vpop.f32.mrb[142].mxu1 }
 0x47a   : > { %v7212_v5 = vpop.f32.mrb[143].mxu1 }
 0x47b   : > { %v7168_v42 = vpop.f32.mrb[60].mxu0  ;;  %6824 = vst [vmem:[%s7916_s11 + $0x10] sm:$0xff] %v6756_v56   ;;  %v5784_v8 = vadd.f32 %v7210_v18, %v10873_v2  ;;  %v7213_v43 = vadd.f32 %v7212_v5, %v7211_v55 }
 0x47c   : > { %v7169_v54 = vpop.f32.mrb[61].mxu0 }
 0x47d   : > { %v7170_v3 = vadd.f32 %v7169_v54, %v7168_v42  ;;  %v7171_v11 = vpop.f32.mrb[62].mxu0  ;;  %v5787_v22 = vadd.f32 %v7213_v43, %v10876_v40  ;;  %v5892_v1 = vmax.f32 %v5784_v8, 0.0 }
 0x47e   : > { %v7172_v49 = vpop.f32.mrb[63].mxu0 }
 0x47f   : > { %v10955_v14 = vadd.f32 %v7170_v3, %v10848_v21  ;;  %v7173_v25 = vadd.f32 %v7172_v49, %v7171_v11  ;;  %v5893_v61 = vmax.f32 %v5787_v22, 0.0  ;;  %v7214_v63 = vpop.f32.mrb[144].mxu1 }
 0x480   : > { %v7215_v35 = vpop.f32.mrb[145].mxu1 }
 0x481   : > { %v10959_v20 = vadd.f32 %v7173_v25, %v10852_v41  ;;  %v6761_v29 = vpack.c.bf16 %v5893_v61, %v5892_v1  ;;  %v7216_v38 = vadd.f32 %v7215_v35, %v7214_v63  ;;  %v7217_v10 = vpop.f32.mrb[146].mxu1 }
 0x482   : > { %v7218_v32 = vpop.f32.mrb[147].mxu1 }
 0x483   : > { %6825 = vst [vmem:[%s7916_s11 + $0x18] sm:$0xff] %v6761_v29   ;;  %v5792_v21 = vadd.f32 %v7216_v38, %v10879_v7  ;;  %v7219_v2 = vadd.f32 %v7218_v32, %v7217_v10 }
 0x485   : > { %v5795_v47 = vadd.f32 %v7219_v2, %v10882_v44  ;;  %v5894_v46 = vmax.f32 %v5792_v21, 0.0 }
 0x487   : > { %v5895_v40 = vmax.f32 %v5795_v47, 0.0  ;;  %v7220_v50 = vpop.f32.mrb[148].mxu1 }
 0x488   : > { %v7221_v41 = vpop.f32.mrb[149].mxu1 }
 0x489   : > { %v6766_v4 = vpack.c.bf16 %v5895_v40, %v5894_v46  ;;  %v7222_v12 = vadd.f32 %v7221_v41, %v7220_v50  ;;  %v7223_v53 = vpop.f32.mrb[150].mxu1 }
 0x48a   : > { %v7224_v31 = vpop.f32.mrb[151].mxu1 }
 0x48b   : > { %6826 = vst [vmem:[%s7916_s11 + $0x20] sm:$0xff] %v6766_v4   ;;  %v5800_v37 = vadd.f32 %v7222_v12, %v10885_v45  ;;  %v7225_v13 = vadd.f32 %v7224_v31, %v7223_v53 }
 0x48d   : > { %v5803_v48 = vadd.f32 %v7225_v13, %v10888_v9  ;;  %v5896_v51 = vmax.f32 %v5800_v37, 0.0 }
 0x48f   : > { %v5897_v7 = vmax.f32 %v5803_v48, 0.0  ;;  %v7226_v59 = vpop.f32.mrb[152].mxu1 }
 0x490   : > { %v7227_v15 = vpop.f32.mrb[153].mxu1 }
 0x491   : > { %v6771_v44 = vpack.c.bf16 %v5897_v7, %v5896_v51  ;;  %v7228_v0 = vadd.f32 %v7227_v15, %v7226_v59  ;;  %v7229_v42 = vpop.f32.mrb[154].mxu1 }
 0x492   : > { %v7230_v57 = vpop.f32.mrb[155].mxu1 }
 0x493   : > { %6827 = vst [vmem:[%s7916_s11 + $0x28] sm:$0xff] %v6771_v44   ;;  %v5808_v54 = vadd.f32 %v7228_v0, %v10891_v33  ;;  %v7231_v56 = vadd.f32 %v7230_v57, %v7229_v42 }
 0x495   : > { %v5811_v18 = vadd.f32 %v7231_v56, %v10894_v52  ;;  %v5898_v3 = vmax.f32 %v5808_v54, 0.0 }
 0x497   : > { %v5899_v45 = vmax.f32 %v5811_v18, 0.0  ;;  %v7232_v55 = vpop.f32.mrb[156].mxu1 }
 0x498   : > { %v7233_v11 = vpop.f32.mrb[157].mxu1 }
 0x499   : > { %v6776_v9 = vpack.c.bf16 %v5899_v45, %v5898_v3  ;;  %v7234_v5 = vadd.f32 %v7233_v11, %v7232_v55  ;;  %v7235_v49 = vpop.f32.mrb[158].mxu1 }
 0x49a   : > { %v7236_v8 = vpop.f32.mrb[159].mxu1 }
 0x49b   : > { %6828 = vst [vmem:[%s7916_s11 + $0x30] sm:$0xff] %v6776_v9   ;;  %v5816_v43 = vadd.f32 %v7234_v5, %v10897_v16  ;;  %v7237_v25 = vadd.f32 %v7236_v8, %v7235_v49 }
 0x49d   : > { %v5819_v22 = vadd.f32 %v7237_v25, %v10900_v27  ;;  %v5900_v1 = vmax.f32 %v5816_v43, 0.0 }
 0x49f   : > { %v5901_v33 = vmax.f32 %v5819_v22, 0.0  ;;  %v7238_v61 = vpop.f32.mrb[160].mxu1 }
 0x4a0   : > { %v7239_v63 = vpop.f32.mrb[161].mxu1 }
 0x4a1   : > { %v6781_v52 = vpack.c.bf16 %v5901_v33, %v5900_v1  ;;  %v7240_v35 = vadd.f32 %v7239_v63, %v7238_v61  ;;  %v7241_v29 = vpop.f32.mrb[162].mxu1 }
 0x4a2   : > { %v7242_v38 = vpop.f32.mrb[163].mxu1 }
 0x4a3   : > { %6829 = vst [vmem:[%s7916_s11 + $0x38] sm:$0xff] %v6781_v52   ;;  %v5824_v10 = vadd.f32 %v7240_v35, %v10903_v6  ;;  %v7243_v32 = vadd.f32 %v7242_v38, %v7241_v29 }
 0x4a5   : > { %v5827_v21 = vadd.f32 %v7243_v32, %v10906_v39  ;;  %v5902_v2 = vmax.f32 %v5824_v10, 0.0 }
 0x4a7   : > { %v5903_v16 = vmax.f32 %v5827_v21, 0.0  ;;  %v7244_v47 = vpop.f32.mrb[164].mxu1 }
 0x4a8   : > { %v7245_v46 = vpop.f32.mrb[165].mxu1 }
 0x4a9   : > { %v6786_v27 = vpack.c.bf16 %v5903_v16, %v5902_v2  ;;  %v7246_v40 = vadd.f32 %v7245_v46, %v7244_v47  ;;  %v7247_v50 = vpop.f32.mrb[166].mxu1 }
 0x4aa   : > { %v7248_v41 = vpop.f32.mrb[167].mxu1 }
 0x4ab   : > { %6830 = vst [vmem:[%s7916_s11 + $0x40] sm:$0xff] %v6786_v27   ;;  %v5832_v4 = vadd.f32 %v7246_v40, %v10909_v60  ;;  %v7249_v12 = vadd.f32 %v7248_v41, %v7247_v50 }
 0x4ad   : > { %v5835_v53 = vadd.f32 %v7249_v12, %v10912_v34  ;;  %v5904_v31 = vmax.f32 %v5832_v4, 0.0 }
 0x4af   : > { %v5905_v6 = vmax.f32 %v5835_v53, 0.0  ;;  %v7250_v37 = vpop.f32.mrb[168].mxu1 }
 0x4b0   : > { %v7251_v13 = vpop.f32.mrb[169].mxu1 }
 0x4b1   : > { %v6791_v39 = vpack.c.bf16 %v5905_v6, %v5904_v31  ;;  %v7252_v48 = vadd.f32 %v7251_v13, %v7250_v37  ;;  %v7253_v51 = vpop.f32.mrb[170].mxu1 }
 0x4b2   : > { %v7254_v7 = vpop.f32.mrb[171].mxu1 }
 0x4b3   : > { %6831 = vst [vmem:[%s7916_s11 + $0x48] sm:$0xff] %v6791_v39   ;;  %v5840_v59 = vadd.f32 %v7252_v48, %v10915_v17  ;;  %v7255_v15 = vadd.f32 %v7254_v7, %v7253_v51 }
 0x4b5   : > { %v5843_v44 = vadd.f32 %v7255_v15, %v10918_v24  ;;  %v5906_v0 = vmax.f32 %v5840_v59, 0.0 }
 0x4b7   : > { %v5907_v60 = vmax.f32 %v5843_v44, 0.0  ;;  %v7256_v42 = vpop.f32.mrb[172].mxu1 }
 0x4b8   : > { %v7257_v57 = vpop.f32.mrb[173].mxu1 }
 0x4b9   : > { %v6796_v34 = vpack.c.bf16 %v5907_v60, %v5906_v0  ;;  %v7258_v54 = vadd.f32 %v7257_v57, %v7256_v42  ;;  %v7259_v56 = vpop.f32.mrb[174].mxu1 }
 0x4ba   : > { %v7260_v18 = vpop.f32.mrb[175].mxu1 }
 0x4bb   : > { %6832 = vst [vmem:[%s7916_s11 + $0x50] sm:$0xff] %v6796_v34   ;;  %v5848_v3 = vadd.f32 %v7258_v54, %v10921_v30  ;;  %v7261_v45 = vadd.f32 %v7260_v18, %v7259_v56 }
 0x4bd   : > { %v5851_v55 = vadd.f32 %v7261_v45, %v10924_v26  ;;  %v5908_v11 = vmax.f32 %v5848_v3, 0.0 }
 0x4bf   : > { %v5909_v17 = vmax.f32 %v5851_v55, 0.0 }
 0x4c1   : > { %v6801_v24 = vpack.c.bf16 %v5909_v17, %v5908_v11 }
 0x4c3   : > { %v7262_v9 = vpop.f32.mrb[176].mxu1  ;;  %6833 = vst [vmem:[%s7916_s11 + $0x58] sm:$0xff] %v6801_v24  }
 0x4c4   : > { %v7263_v5 = vpop.f32.mrb[177].mxu1 }
 0x4c5   : > { %v7264_v49 = vadd.f32 %v7263_v5, %v7262_v9  ;;  %v7265_v8 = vpop.f32.mrb[178].mxu1 }
 0x4c6   : > { %v7266_v43 = vpop.f32.mrb[179].mxu1 }
 0x4c7   : > { %v5856_v25 = vadd.f32 %v7264_v49, %v10928_v28  ;;  %v7267_v22 = vadd.f32 %v7266_v43, %v7265_v8 }
 0x4c9   : > { %v5859_v1 = vadd.f32 %v7267_v22, %v10932_v23  ;;  %v5910_v33 = vmax.f32 %v5856_v25, 0.0 }
 0x4cb   : > { %v5911_v30 = vmax.f32 %v5859_v1, 0.0  ;;  %v7268_v61 = vpop.f32.mrb[180].mxu1 }
 0x4cc   : > { %v7269_v63 = vpop.f32.mrb[181].mxu1 }
 0x4cd   : > { %v6806_v26 = vpack.c.bf16 %v5911_v30, %v5910_v33  ;;  %v7270_v52 = vadd.f32 %v7269_v63, %v7268_v61  ;;  %v7271_v35 = vpop.f32.mrb[182].mxu1 }
 0x4ce   : > { %v7272_v29 = vpop.f32.mrb[183].mxu1 }
 0x4cf   : > { %6834 = vst [vmem:[%s7916_s11 + $0x60] sm:$0xff] %v6806_v26   ;;  %v5864_v38 = vadd.f32 %v7270_v52, %v10937_v19  ;;  %v7273_v10 = vadd.f32 %v7272_v29, %v7271_v35 }
 0x4d1   : > { %v5867_v32 = vadd.f32 %v7273_v10, %v10941_v58  ;;  %v5912_v21 = vmax.f32 %v5864_v38, 0.0 }
 0x4d3   : > { %v5913_v28 = vmax.f32 %v5867_v32, 0.0  ;;  %v7274_v2 = vpop.f32.mrb[184].mxu1 }
 0x4d4   : > { %v7275_v16 = vpop.f32.mrb[185].mxu1 }
 0x4d5   : > { %v6811_v23 = vpack.c.bf16 %v5913_v28, %v5912_v21  ;;  %v7276_v47 = vadd.f32 %v7275_v16, %v7274_v2  ;;  %v7277_v46 = vpop.f32.mrb[186].mxu1 }
 0x4d6   : > { %v7278_v27 = vpop.f32.mrb[187].mxu1 }
 0x4d7   : > { %6835 = vst [vmem:[%s7916_s11 + $0x68] sm:$0xff] %v6811_v23   ;;  %v5872_v40 = vadd.f32 %v7276_v47, %v10946_v36  ;;  %v7279_v50 = vadd.f32 %v7278_v27, %v7277_v46 }
 0x4d9   : > { %v5875_v41 = vadd.f32 %v7279_v50, %v10950_v62  ;;  %v5914_v19 = vmax.f32 %v5872_v40, 0.0 }
 0x4db   : > { %v5915_v4 = vmax.f32 %v5875_v41, 0.0  ;;  %v7280_v12 = vpop.f32.mrb[188].mxu1 }
 0x4dc   : > { %v7281_v58 = vpop.f32.mrb[189].mxu1 }
 0x4dd   : > { %v6816_v53 = vpack.c.bf16 %v5915_v4, %v5914_v19  ;;  %v7282_v31 = vadd.f32 %v7281_v58, %v7280_v12  ;;  %v7283_v6 = vpop.f32.mrb[190].mxu1 }
 0x4de   : > { %v7284_v37 = vpop.f32.mrb[191].mxu1 }
 0x4df   : > { %6836 = vst [vmem:[%s7916_s11 + $0x70] sm:$0xff] %v6816_v53   ;;  %v5880_v13 = vadd.f32 %v7282_v31, %v10955_v14  ;;  %v7285_v39 = vadd.f32 %v7284_v37, %v7283_v6 }
 0x4e1   : > { %v5883_v48 = vadd.f32 %v7285_v39, %v10959_v20  ;;  %v5916_v51 = vmax.f32 %v5880_v13, 0.0 }
 0x4e3   : > { %v5917_v36 = vmax.f32 %v5883_v48, 0.0 }
 0x4e5   : > { %v6821_v7 = vpack.c.bf16 %v5917_v36, %v5916_v51 }
 0x4e7   : > { %6837 = vst [vmem:[%s7916_s11 + $0x78] sm:$0xff] %v6821_v7  }
 0x4e8 PF: > { %s16_s23 = sadd.s32 1, %s7820_s23   ;;  %s11474_s21 = smov %s7816_s22 }
 0x4e9   : > { %p13_p5 = scmp.ge.s32.totalorder %s16_s23, 4   ;;  %s11475_s22 = smov %s11477_s24 }
 0x4eb   :  { %15 = sbr.rel (!%p13_p5) target bundleno = 2 (0x2), region = 185 }
 0x4f2   :  { %6110 = vsyncmov [#allocation3] }
 0x4f5   :  { %s6111_s7 = vpop.sfrf %6110 }
 0x4f6   :  { %p6706_p6 = scmp.ne.s32.totalorder %s6111_s7, 0 }
 0x4f8   :  { %6115 = shalt.err (%p6706_p6)  }
 0x4f9   :  { %6117 = vsyncmov [#allocation3 + $0x1] }
 0x4fc   :  { %s6118_s19 = vpop.sfrf %6117 }
 0x4fd   :  { %p6707_p7 = scmp.ne.s32.totalorder %s6118_s19, 0 }
 0x4ff   :  { %6122 = shalt.err (%p6707_p7)  }

</bundles_post_ra>
